<compile_context>
chip_gen: v7x
topology: tpu7x:2x2x1
jax: 0.10.0
libtpu: 0.0.40
codegen_flags: <defaults>
</compile_context>

<pallas_src>
import jax
import jax.numpy as jnp
from jax import lax
from jax.experimental import pallas as pl
from jax.experimental.pallas import tpu as pltpu

NUM_ITEMS = 10000
EMBED_DIM = 32
NUM_RECS = 10
HIST_LEN = 8

GRID = 2                       # column tiles streamed through the pipeline
N_PAD = 10240                  # padded item count
TILE_N = N_PAD // GRID         # 5120 lanes per streamed tile
HALF = 1280                    # lanes per packed score row (one 40-vreg chunk)
CHUNKS = TILE_N // HALF        # 4 chunks scored per grid step
PACK_ROWS = GRID * CHUNKS      # 8 sublane rows in the packed score block


def _recommend_kernel(hist_ref, table_hbm, tt_ref, idx_ref,
                      hist_buf, dma_sems, user_ref, scores_ref):
    """hist_ref : (H,) i32 scalar-prefetch (SMEM) item ids
       table_hbm: (N, D) f32 in HBM (pl.ANY) - only H rows are gathered
       tt_ref   : (D, TILE_N) f32 VMEM tile of the cached transposed table
       idx_ref  : (1, K) i32 output, top-k indices sorted by score desc
       scratch  : hist_buf (H, D) f32, dma_sems (H,), user_ref (D, 1) f32,
                  scores_ref (PACK_ROWS, HALF) f32 packed score block."""
    i = pl.program_id(0)
    last = pl.num_programs(0) - 1
    D = tt_ref.shape[0]
    H = hist_buf.shape[0]
    K = idx_ref.shape[1]
    rows, half = scores_ref.shape
    n_items = table_hbm.shape[0]

    # ---- step 0: DMA-gather the H history rows (H x D x 4B = 1 KiB) from HBM,
    #      compute the user embedding once, keep it resident in VMEM scratch.
    @pl.when(i == 0)
    def _():
        copies = [
            pltpu.make_async_copy(
                table_hbm.at[pl.ds(hist_ref[h], 1), :],
                hist_buf.at[pl.ds(h, 1), :],
                dma_sems.at[h],
            )
            for h in range(H)
        ]
        for cp in copies:
            cp.start()
        for cp in copies:
            cp.wait()
        # Single (H, D) load + one sublane reduce instead of H masked loads.
        mean_row = jnp.sum(hist_buf[...], axis=0, keepdims=True) * (1.0 / H)
        user_ref[...] = jnp.transpose(mean_row)               # (D, 1)

    # ---- every step: exact-f32 scoring of this tile, chunk by chunk.
    #      Never materialize the full (D, TILE_N) tile; slice the ref directly.
    u_b = jnp.broadcast_to(user_ref[...], (D, half))          # hoisted once/step
    for c in range(CHUNKS):                                   # static: unrolled
        chunk = tt_ref[:, c * half:(c + 1) * half]            # (D, HALF) load
        row = jnp.sum(chunk * u_b, axis=0, keepdims=True)     # (1, HALF)
        scores_ref[pl.ds(CHUNKS * i + c, 1), :] = row

    # ---- last step: iterative top-k over the packed (rows, half) block.
    @pl.when(i == last)
    def _():
        gid = (lax.broadcasted_iota(jnp.int32, (rows, half), 0) * half
               + lax.broadcasted_iota(jnp.int32, (rows, half), 1))
        s = jnp.where(gid < n_items, scores_ref[...], -jnp.inf)  # mask padding
        sentinel = rows * half                    # > any valid global index
        k_ids = lax.broadcasted_iota(jnp.int32, (1, K), 1)
        out_idx = jnp.zeros((1, K), jnp.int32)
        for j in range(K):                        # K small & static: unrolled
            mx = jnp.max(jnp.max(s, axis=1, keepdims=True),
                         axis=0, keepdims=True)                      # (1, 1)
            cand = jnp.where(s == mx, gid, sentinel)
            idx = jnp.min(jnp.min(cand, axis=1, keepdims=True),
                          axis=0, keepdims=True)                     # (1, 1)
            out_idx = jnp.where(k_ids == j, idx, out_idx)
            s = jnp.where(gid == idx, -jnp.inf, s)
        idx_ref[...] = out_idx


def prepare_table_t(item_embeddings):
    """Model-weight prep (done ONCE, cached): lane-dense (D, N_pad) layout."""
    table = item_embeddings.astype(jnp.float32)
    n, d = table.shape
    tt = jnp.zeros((d, N_PAD), jnp.float32)
    return tt.at[:, :n].set(table.T)


def recommend(user_history, item_embeddings, table_t_padded, k=NUM_RECS):
    """Returns top-k item indices (int32, shape (k,)), sorted by score desc."""
    hist = user_history.astype(jnp.int32)
    table = item_embeddings.astype(jnp.float32)
    n, d = table.shape
    h = hist.shape[0]
    assert table_t_padded.shape == (d, N_PAD) and n <= N_PAD

    grid_spec = pltpu.PrefetchScalarGridSpec(
        num_scalar_prefetch=1,
        grid=(GRID,),
        in_specs=[
            pl.BlockSpec(memory_space=pl.ANY),                    # (N, D) stays in HBM
            pl.BlockSpec((d, TILE_N), lambda i, hist: (0, i)),    # streamed column tile
        ],
        out_specs=pl.BlockSpec((1, k), lambda i, hist: (0, 0)),
        scratch_shapes=[
            pltpu.VMEM((h, d), jnp.float32),             # gathered history rows
            pltpu.SemaphoreType.DMA((h,)),
            pltpu.VMEM((d, 1), jnp.float32),             # user embedding column
            pltpu.VMEM((PACK_ROWS, HALF), jnp.float32),  # packed score block
        ],
    )
    out = pl.pallas_call(
        _recommend_kernel,
        out_shape=jax.ShapeDtypeStruct((1, k), jnp.int32),
        grid_spec=grid_spec,
        compiler_params=pltpu.CompilerParams(
            dimension_semantics=("arbitrary",)),
        cost_estimate=pl.CostEstimate(
            flops=2 * N_PAD * d + 2 * h * d,
            transcendentals=0,
            bytes_accessed=N_PAD * d * 4 + h * d * 4 + k * 4),
    )(hist, table, table_t_padded)
    return out.reshape(k)


if __name__ == "__main__":
    key = jax.random.PRNGKey(0)
    k_table, k_hist = jax.random.split(key)

    # Deterministic "parameters" (module __init__ uses torch.rand((10000, 32)))
    item_embeddings = jax.random.uniform(
        k_table, (NUM_ITEMS, EMBED_DIM), dtype=jnp.float32
    )
    # Cached transposed/padded layout — prepared once, like a model weight.
    table_t_padded = jax.block_until_ready(prepare_table_t(item_embeddings))

    # Example input: a history of item ids
    user_history = jax.random.randint(
        k_hist, (HIST_LEN,), 0, NUM_ITEMS, dtype=jnp.int32
    )

    topk_idx = jax.block_until_ready(
        recommend(user_history, item_embeddings, table_t_padded)
    )

    # Pure-JAX reference mirroring the torch forward (topk.indices)
    user_emb = item_embeddings[user_history].mean(axis=0)
    ref_scores = jnp.sum(item_embeddings * user_emb[None, :], axis=1)
    _, ref_idx = jax.lax.top_k(ref_scores, NUM_RECS)
    assert jnp.array_equal(topk_idx, ref_idx.astype(jnp.int32)), (topk_idx, ref_idx)

    # TODO(synk): for v7x-scale throughput, batch users ((B, D) @ (D, N) MXU
    # matmul with the table streamed once) instead of splitting one user's
    # scoring across TensorCores — per-user work is too small to amortize a
    # cross-core candidate merge.
    print("KERNEL_OK")
</pallas_src>

<mosaic_0001>
module attributes {stable_mosaic.version = 11 : i64} {
  func.func @_recommend_kernel(%arg0: i32, %arg1: memref<8xi32, #tpu.memory_space<smem>>, %arg2: memref<10000x32xf32, #tpu.memory_space<any>>, %arg3: memref<32x5120xf32, #tpu.memory_space<vmem>>, %arg4: memref<1x10xi32, #tpu.memory_space<vmem>>, %arg5: memref<8x32xf32, #tpu.memory_space<vmem>>, %arg6: memref<8x!tpu.dma_semaphore, #tpu.memory_space<semaphore_mem>>, %arg7: memref<32x1xf32, #tpu.memory_space<vmem>>, %arg8: memref<8x1280xf32, #tpu.memory_space<vmem>>) attributes {dimension_semantics = [#tpu.dimension_semantics<arbitrary>], iteration_bounds = array<i64: 2>, scalar_prefetch = 1 : i64, scratch_operands = 4 : i64, tpu.core_type = #tpu.core_type<tc>, window_params = [{}, {transform_indices = @transform_1, window_bounds = array<i64: 32, 5120>}, {pipeline_mode = #tpu.pipeline_mode<synchronous>, transform_indices = @transform_2, window_bounds = array<i64: 1, 10>}]} {
    %c0_i32 = arith.constant 0 : i32
    %0 = arith.cmpi eq, %arg0, %c0_i32 : i32
    %1 = arith.extui %0 : i1 to i32
    %c0_i32_0 = arith.constant 0 : i32
    %2 = arith.cmpi ne, %1, %c0_i32_0 : i32
    scf.if %2 {
      %c0_20 = arith.constant 0 : index
      %41 = memref.load %arg1[%c0_20] : memref<8xi32, #tpu.memory_space<smem>>
      %c1 = arith.constant 1 : index
      %42 = memref.load %arg1[%c1] : memref<8xi32, #tpu.memory_space<smem>>
      %c2 = arith.constant 2 : index
      %43 = memref.load %arg1[%c2] : memref<8xi32, #tpu.memory_space<smem>>
      %c3 = arith.constant 3 : index
      %44 = memref.load %arg1[%c3] : memref<8xi32, #tpu.memory_space<smem>>
      %c4 = arith.constant 4 : index
      %45 = memref.load %arg1[%c4] : memref<8xi32, #tpu.memory_space<smem>>
      %c5 = arith.constant 5 : index
      %46 = memref.load %arg1[%c5] : memref<8xi32, #tpu.memory_space<smem>>
      %c6 = arith.constant 6 : index
      %47 = memref.load %arg1[%c6] : memref<8xi32, #tpu.memory_space<smem>>
      %c7 = arith.constant 7 : index
      %48 = memref.load %arg1[%c7] : memref<8xi32, #tpu.memory_space<smem>>
      %c0_i32_21 = arith.constant 0 : i32
      %c0_i32_22 = arith.constant 0 : i32
      %49 = tpu.memref_slice %arg2[%41, %c0_i32_22] : memref<10000x32xf32, #tpu.memory_space<any>> -> memref<1x32xf32, #tpu.memory_space<any>>
      %c0_i32_23 = arith.constant 0 : i32
      %c0_i32_24 = arith.constant 0 : i32
      %50 = tpu.memref_slice %arg5[%c0_i32_23, %c0_i32_24] : memref<8x32xf32, #tpu.memory_space<vmem>> -> memref<1x32xf32, #tpu.memory_space<vmem>>
      %51 = tpu.memref_slice %arg6[%c0_i32_21] : memref<8x!tpu.dma_semaphore, #tpu.memory_space<semaphore_mem>> -> memref<1x!tpu.dma_semaphore, #tpu.memory_space<semaphore_mem>>
      %52 = tpu.memref_squeeze %51 : memref<1x!tpu.dma_semaphore, #tpu.memory_space<semaphore_mem>> -> memref<!tpu.dma_semaphore, #tpu.memory_space<semaphore_mem>>
      tpu.enqueue_dma source(%49 : memref<1x32xf32, #tpu.memory_space<any>>) target(%50 : memref<1x32xf32, #tpu.memory_space<vmem>>) target_semaphore(%52 : memref<!tpu.dma_semaphore, #tpu.memory_space<semaphore_mem>>)
      %c1_i32_25 = arith.constant 1 : i32
      %c0_i32_26 = arith.constant 0 : i32
      %53 = tpu.memref_slice %arg2[%42, %c0_i32_26] : memref<10000x32xf32, #tpu.memory_space<any>> -> memref<1x32xf32, #tpu.memory_space<any>>
      %c1_i32_27 = arith.constant 1 : i32
      %c0_i32_28 = arith.constant 0 : i32
      %54 = tpu.memref_slice %arg5[%c1_i32_27, %c0_i32_28] : memref<8x32xf32, #tpu.memory_space<vmem>> -> memref<1x32xf32, #tpu.memory_space<vmem>>
      %55 = tpu.memref_slice %arg6[%c1_i32_25] : memref<8x!tpu.dma_semaphore, #tpu.memory_space<semaphore_mem>> -> memref<1x!tpu.dma_semaphore, #tpu.memory_space<semaphore_mem>>
      %56 = tpu.memref_squeeze %55 : memref<1x!tpu.dma_semaphore, #tpu.memory_space<semaphore_mem>> -> memref<!tpu.dma_semaphore, #tpu.memory_space<semaphore_mem>>
      tpu.enqueue_dma source(%53 : memref<1x32xf32, #tpu.memory_space<any>>) target(%54 : memref<1x32xf32, #tpu.memory_space<vmem>>) target_semaphore(%56 : memref<!tpu.dma_semaphore, #tpu.memory_space<semaphore_mem>>)
      %c2_i32_29 = arith.constant 2 : i32
      %c0_i32_30 = arith.constant 0 : i32
      %57 = tpu.memref_slice %arg2[%43, %c0_i32_30] : memref<10000x32xf32, #tpu.memory_space<any>> -> memref<1x32xf32, #tpu.memory_space<any>>
      %c2_i32_31 = arith.constant 2 : i32
      %c0_i32_32 = arith.constant 0 : i32
      %58 = tpu.memref_slice %arg5[%c2_i32_31, %c0_i32_32] : memref<8x32xf32, #tpu.memory_space<vmem>> -> memref<1x32xf32, #tpu.memory_space<vmem>>
      %59 = tpu.memref_slice %arg6[%c2_i32_29] : memref<8x!tpu.dma_semaphore, #tpu.memory_space<semaphore_mem>> -> memref<1x!tpu.dma_semaphore, #tpu.memory_space<semaphore_mem>>
      %60 = tpu.memref_squeeze %59 : memref<1x!tpu.dma_semaphore, #tpu.memory_space<semaphore_mem>> -> memref<!tpu.dma_semaphore, #tpu.memory_space<semaphore_mem>>
      tpu.enqueue_dma source(%57 : memref<1x32xf32, #tpu.memory_space<any>>) target(%58 : memref<1x32xf32, #tpu.memory_space<vmem>>) target_semaphore(%60 : memref<!tpu.dma_semaphore, #tpu.memory_space<semaphore_mem>>)
      %c3_i32_33 = arith.constant 3 : i32
      %c0_i32_34 = arith.constant 0 : i32
      %61 = tpu.memref_slice %arg2[%44, %c0_i32_34] : memref<10000x32xf32, #tpu.memory_space<any>> -> memref<1x32xf32, #tpu.memory_space<any>>
      %c3_i32_35 = arith.constant 3 : i32
      %c0_i32_36 = arith.constant 0 : i32
      %62 = tpu.memref_slice %arg5[%c3_i32_35, %c0_i32_36] : memref<8x32xf32, #tpu.memory_space<vmem>> -> memref<1x32xf32, #tpu.memory_space<vmem>>
      %63 = tpu.memref_slice %arg6[%c3_i32_33] : memref<8x!tpu.dma_semaphore, #tpu.memory_space<semaphore_mem>> -> memref<1x!tpu.dma_semaphore, #tpu.memory_space<semaphore_mem>>
      %64 = tpu.memref_squeeze %63 : memref<1x!tpu.dma_semaphore, #tpu.memory_space<semaphore_mem>> -> memref<!tpu.dma_semaphore, #tpu.memory_space<semaphore_mem>>
      tpu.enqueue_dma source(%61 : memref<1x32xf32, #tpu.memory_space<any>>) target(%62 : memref<1x32xf32, #tpu.memory_space<vmem>>) target_semaphore(%64 : memref<!tpu.dma_semaphore, #tpu.memory_space<semaphore_mem>>)
      %c4_i32_37 = arith.constant 4 : i32
      %c0_i32_38 = arith.constant 0 : i32
      %65 = tpu.memref_slice %arg2[%45, %c0_i32_38] : memref<10000x32xf32, #tpu.memory_space<any>> -> memref<1x32xf32, #tpu.memory_space<any>>
      %c4_i32_39 = arith.constant 4 : i32
      %c0_i32_40 = arith.constant 0 : i32
      %66 = tpu.memref_slice %arg5[%c4_i32_39, %c0_i32_40] : memref<8x32xf32, #tpu.memory_space<vmem>> -> memref<1x32xf32, #tpu.memory_space<vmem>>
      %67 = tpu.memref_slice %arg6[%c4_i32_37] : memref<8x!tpu.dma_semaphore, #tpu.memory_space<semaphore_mem>> -> memref<1x!tpu.dma_semaphore, #tpu.memory_space<semaphore_mem>>
      %68 = tpu.memref_squeeze %67 : memref<1x!tpu.dma_semaphore, #tpu.memory_space<semaphore_mem>> -> memref<!tpu.dma_semaphore, #tpu.memory_space<semaphore_mem>>
      tpu.enqueue_dma source(%65 : memref<1x32xf32, #tpu.memory_space<any>>) target(%66 : memref<1x32xf32, #tpu.memory_space<vmem>>) target_semaphore(%68 : memref<!tpu.dma_semaphore, #tpu.memory_space<semaphore_mem>>)
      %c5_i32 = arith.constant 5 : i32
      %c0_i32_41 = arith.constant 0 : i32
      %69 = tpu.memref_slice %arg2[%46, %c0_i32_41] : memref<10000x32xf32, #tpu.memory_space<any>> -> memref<1x32xf32, #tpu.memory_space<any>>
      %c5_i32_42 = arith.constant 5 : i32
      %c0_i32_43 = arith.constant 0 : i32
      %70 = tpu.memref_slice %arg5[%c5_i32_42, %c0_i32_43] : memref<8x32xf32, #tpu.memory_space<vmem>> -> memref<1x32xf32, #tpu.memory_space<vmem>>
      %71 = tpu.memref_slice %arg6[%c5_i32] : memref<8x!tpu.dma_semaphore, #tpu.memory_space<semaphore_mem>> -> memref<1x!tpu.dma_semaphore, #tpu.memory_space<semaphore_mem>>
      %72 = tpu.memref_squeeze %71 : memref<1x!tpu.dma_semaphore, #tpu.memory_space<semaphore_mem>> -> memref<!tpu.dma_semaphore, #tpu.memory_space<semaphore_mem>>
      tpu.enqueue_dma source(%69 : memref<1x32xf32, #tpu.memory_space<any>>) target(%70 : memref<1x32xf32, #tpu.memory_space<vmem>>) target_semaphore(%72 : memref<!tpu.dma_semaphore, #tpu.memory_space<semaphore_mem>>)
      %c6_i32 = arith.constant 6 : i32
      %c0_i32_44 = arith.constant 0 : i32
      %73 = tpu.memref_slice %arg2[%47, %c0_i32_44] : memref<10000x32xf32, #tpu.memory_space<any>> -> memref<1x32xf32, #tpu.memory_space<any>>
      %c6_i32_45 = arith.constant 6 : i32
      %c0_i32_46 = arith.constant 0 : i32
      %74 = tpu.memref_slice %arg5[%c6_i32_45, %c0_i32_46] : memref<8x32xf32, #tpu.memory_space<vmem>> -> memref<1x32xf32, #tpu.memory_space<vmem>>
      %75 = tpu.memref_slice %arg6[%c6_i32] : memref<8x!tpu.dma_semaphore, #tpu.memory_space<semaphore_mem>> -> memref<1x!tpu.dma_semaphore, #tpu.memory_space<semaphore_mem>>
      %76 = tpu.memref_squeeze %75 : memref<1x!tpu.dma_semaphore, #tpu.memory_space<semaphore_mem>> -> memref<!tpu.dma_semaphore, #tpu.memory_space<semaphore_mem>>
      tpu.enqueue_dma source(%73 : memref<1x32xf32, #tpu.memory_space<any>>) target(%74 : memref<1x32xf32, #tpu.memory_space<vmem>>) target_semaphore(%76 : memref<!tpu.dma_semaphore, #tpu.memory_space<semaphore_mem>>)
      %c7_i32 = arith.constant 7 : i32
      %c0_i32_47 = arith.constant 0 : i32
      %77 = tpu.memref_slice %arg2[%48, %c0_i32_47] : memref<10000x32xf32, #tpu.memory_space<any>> -> memref<1x32xf32, #tpu.memory_space<any>>
      %c7_i32_48 = arith.constant 7 : i32
      %c0_i32_49 = arith.constant 0 : i32
      %78 = tpu.memref_slice %arg5[%c7_i32_48, %c0_i32_49] : memref<8x32xf32, #tpu.memory_space<vmem>> -> memref<1x32xf32, #tpu.memory_space<vmem>>
      %79 = tpu.memref_slice %arg6[%c7_i32] : memref<8x!tpu.dma_semaphore, #tpu.memory_space<semaphore_mem>> -> memref<1x!tpu.dma_semaphore, #tpu.memory_space<semaphore_mem>>
      %80 = tpu.memref_squeeze %79 : memref<1x!tpu.dma_semaphore, #tpu.memory_space<semaphore_mem>> -> memref<!tpu.dma_semaphore, #tpu.memory_space<semaphore_mem>>
      tpu.enqueue_dma source(%77 : memref<1x32xf32, #tpu.memory_space<any>>) target(%78 : memref<1x32xf32, #tpu.memory_space<vmem>>) target_semaphore(%80 : memref<!tpu.dma_semaphore, #tpu.memory_space<semaphore_mem>>)
      %c0_i32_50 = arith.constant 0 : i32
      %c0_i32_51 = arith.constant 0 : i32
      %81 = tpu.memref_slice %arg2[%41, %c0_i32_51] : memref<10000x32xf32, #tpu.memory_space<any>> -> memref<1x32xf32, #tpu.memory_space<any>>
      %c0_i32_52 = arith.constant 0 : i32
      %c0_i32_53 = arith.constant 0 : i32
      %82 = tpu.memref_slice %arg5[%c0_i32_52, %c0_i32_53] : memref<8x32xf32, #tpu.memory_space<vmem>> -> memref<1x32xf32, #tpu.memory_space<vmem>>
      %83 = tpu.memref_slice %arg6[%c0_i32_50] : memref<8x!tpu.dma_semaphore, #tpu.memory_space<semaphore_mem>> -> memref<1x!tpu.dma_semaphore, #tpu.memory_space<semaphore_mem>>
      %84 = tpu.memref_squeeze %83 : memref<1x!tpu.dma_semaphore, #tpu.memory_space<semaphore_mem>> -> memref<!tpu.dma_semaphore, #tpu.memory_space<semaphore_mem>>
      tpu.wait_dma2 semaphore(%84 : memref<!tpu.dma_semaphore, #tpu.memory_space<semaphore_mem>>) src(%81 : memref<1x32xf32, #tpu.memory_space<any>>) dst(%82 : memref<1x32xf32, #tpu.memory_space<vmem>>)
      %c1_i32_54 = arith.constant 1 : i32
      %c0_i32_55 = arith.constant 0 : i32
      %85 = tpu.memref_slice %arg2[%42, %c0_i32_55] : memref<10000x32xf32, #tpu.memory_space<any>> -> memref<1x32xf32, #tpu.memory_space<any>>
      %c1_i32_56 = arith.constant 1 : i32
      %c0_i32_57 = arith.constant 0 : i32
      %86 = tpu.memref_slice %arg5[%c1_i32_56, %c0_i32_57] : memref<8x32xf32, #tpu.memory_space<vmem>> -> memref<1x32xf32, #tpu.memory_space<vmem>>
      %87 = tpu.memref_slice %arg6[%c1_i32_54] : memref<8x!tpu.dma_semaphore, #tpu.memory_space<semaphore_mem>> -> memref<1x!tpu.dma_semaphore, #tpu.memory_space<semaphore_mem>>
      %88 = tpu.memref_squeeze %87 : memref<1x!tpu.dma_semaphore, #tpu.memory_space<semaphore_mem>> -> memref<!tpu.dma_semaphore, #tpu.memory_space<semaphore_mem>>
      tpu.wait_dma2 semaphore(%88 : memref<!tpu.dma_semaphore, #tpu.memory_space<semaphore_mem>>) src(%85 : memref<1x32xf32, #tpu.memory_space<any>>) dst(%86 : memref<1x32xf32, #tpu.memory_space<vmem>>)
      %c2_i32_58 = arith.constant 2 : i32
      %c0_i32_59 = arith.constant 0 : i32
      %89 = tpu.memref_slice %arg2[%43, %c0_i32_59] : memref<10000x32xf32, #tpu.memory_space<any>> -> memref<1x32xf32, #tpu.memory_space<any>>
      %c2_i32_60 = arith.constant 2 : i32
      %c0_i32_61 = arith.constant 0 : i32
      %90 = tpu.memref_slice %arg5[%c2_i32_60, %c0_i32_61] : memref<8x32xf32, #tpu.memory_space<vmem>> -> memref<1x32xf32, #tpu.memory_space<vmem>>
      %91 = tpu.memref_slice %arg6[%c2_i32_58] : memref<8x!tpu.dma_semaphore, #tpu.memory_space<semaphore_mem>> -> memref<1x!tpu.dma_semaphore, #tpu.memory_space<semaphore_mem>>
      %92 = tpu.memref_squeeze %91 : memref<1x!tpu.dma_semaphore, #tpu.memory_space<semaphore_mem>> -> memref<!tpu.dma_semaphore, #tpu.memory_space<semaphore_mem>>
      tpu.wait_dma2 semaphore(%92 : memref<!tpu.dma_semaphore, #tpu.memory_space<semaphore_mem>>) src(%89 : memref<1x32xf32, #tpu.memory_space<any>>) dst(%90 : memref<1x32xf32, #tpu.memory_space<vmem>>)
      %c3_i32_62 = arith.constant 3 : i32
      %c0_i32_63 = arith.constant 0 : i32
      %93 = tpu.memref_slice %arg2[%44, %c0_i32_63] : memref<10000x32xf32, #tpu.memory_space<any>> -> memref<1x32xf32, #tpu.memory_space<any>>
      %c3_i32_64 = arith.constant 3 : i32
      %c0_i32_65 = arith.constant 0 : i32
      %94 = tpu.memref_slice %arg5[%c3_i32_64, %c0_i32_65] : memref<8x32xf32, #tpu.memory_space<vmem>> -> memref<1x32xf32, #tpu.memory_space<vmem>>
      %95 = tpu.memref_slice %arg6[%c3_i32_62] : memref<8x!tpu.dma_semaphore, #tpu.memory_space<semaphore_mem>> -> memref<1x!tpu.dma_semaphore, #tpu.memory_space<semaphore_mem>>
      %96 = tpu.memref_squeeze %95 : memref<1x!tpu.dma_semaphore, #tpu.memory_space<semaphore_mem>> -> memref<!tpu.dma_semaphore, #tpu.memory_space<semaphore_mem>>
      tpu.wait_dma2 semaphore(%96 : memref<!tpu.dma_semaphore, #tpu.memory_space<semaphore_mem>>) src(%93 : memref<1x32xf32, #tpu.memory_space<any>>) dst(%94 : memref<1x32xf32, #tpu.memory_space<vmem>>)
      %c4_i32_66 = arith.constant 4 : i32
      %c0_i32_67 = arith.constant 0 : i32
      %97 = tpu.memref_slice %arg2[%45, %c0_i32_67] : memref<10000x32xf32, #tpu.memory_space<any>> -> memref<1x32xf32, #tpu.memory_space<any>>
      %c4_i32_68 = arith.constant 4 : i32
      %c0_i32_69 = arith.constant 0 : i32
      %98 = tpu.memref_slice %arg5[%c4_i32_68, %c0_i32_69] : memref<8x32xf32, #tpu.memory_space<vmem>> -> memref<1x32xf32, #tpu.memory_space<vmem>>
      %99 = tpu.memref_slice %arg6[%c4_i32_66] : memref<8x!tpu.dma_semaphore, #tpu.memory_space<semaphore_mem>> -> memref<1x!tpu.dma_semaphore, #tpu.memory_space<semaphore_mem>>
      %100 = tpu.memref_squeeze %99 : memref<1x!tpu.dma_semaphore, #tpu.memory_space<semaphore_mem>> -> memref<!tpu.dma_semaphore, #tpu.memory_space<semaphore_mem>>
      tpu.wait_dma2 semaphore(%100 : memref<!tpu.dma_semaphore, #tpu.memory_space<semaphore_mem>>) src(%97 : memref<1x32xf32, #tpu.memory_space<any>>) dst(%98 : memref<1x32xf32, #tpu.memory_space<vmem>>)
      %c5_i32_70 = arith.constant 5 : i32
      %c0_i32_71 = arith.constant 0 : i32
      %101 = tpu.memref_slice %arg2[%46, %c0_i32_71] : memref<10000x32xf32, #tpu.memory_space<any>> -> memref<1x32xf32, #tpu.memory_space<any>>
      %c5_i32_72 = arith.constant 5 : i32
      %c0_i32_73 = arith.constant 0 : i32
      %102 = tpu.memref_slice %arg5[%c5_i32_72, %c0_i32_73] : memref<8x32xf32, #tpu.memory_space<vmem>> -> memref<1x32xf32, #tpu.memory_space<vmem>>
      %103 = tpu.memref_slice %arg6[%c5_i32_70] : memref<8x!tpu.dma_semaphore, #tpu.memory_space<semaphore_mem>> -> memref<1x!tpu.dma_semaphore, #tpu.memory_space<semaphore_mem>>
      %104 = tpu.memref_squeeze %103 : memref<1x!tpu.dma_semaphore, #tpu.memory_space<semaphore_mem>> -> memref<!tpu.dma_semaphore, #tpu.memory_space<semaphore_mem>>
      tpu.wait_dma2 semaphore(%104 : memref<!tpu.dma_semaphore, #tpu.memory_space<semaphore_mem>>) src(%101 : memref<1x32xf32, #tpu.memory_space<any>>) dst(%102 : memref<1x32xf32, #tpu.memory_space<vmem>>)
      %c6_i32_74 = arith.constant 6 : i32
      %c0_i32_75 = arith.constant 0 : i32
      %105 = tpu.memref_slice %arg2[%47, %c0_i32_75] : memref<10000x32xf32, #tpu.memory_space<any>> -> memref<1x32xf32, #tpu.memory_space<any>>
      %c6_i32_76 = arith.constant 6 : i32
      %c0_i32_77 = arith.constant 0 : i32
      %106 = tpu.memref_slice %arg5[%c6_i32_76, %c0_i32_77] : memref<8x32xf32, #tpu.memory_space<vmem>> -> memref<1x32xf32, #tpu.memory_space<vmem>>
      %107 = tpu.memref_slice %arg6[%c6_i32_74] : memref<8x!tpu.dma_semaphore, #tpu.memory_space<semaphore_mem>> -> memref<1x!tpu.dma_semaphore, #tpu.memory_space<semaphore_mem>>
      %108 = tpu.memref_squeeze %107 : memref<1x!tpu.dma_semaphore, #tpu.memory_space<semaphore_mem>> -> memref<!tpu.dma_semaphore, #tpu.memory_space<semaphore_mem>>
      tpu.wait_dma2 semaphore(%108 : memref<!tpu.dma_semaphore, #tpu.memory_space<semaphore_mem>>) src(%105 : memref<1x32xf32, #tpu.memory_space<any>>) dst(%106 : memref<1x32xf32, #tpu.memory_space<vmem>>)
      %c7_i32_78 = arith.constant 7 : i32
      %c0_i32_79 = arith.constant 0 : i32
      %109 = tpu.memref_slice %arg2[%48, %c0_i32_79] : memref<10000x32xf32, #tpu.memory_space<any>> -> memref<1x32xf32, #tpu.memory_space<any>>
      %c7_i32_80 = arith.constant 7 : i32
      %c0_i32_81 = arith.constant 0 : i32
      %110 = tpu.memref_slice %arg5[%c7_i32_80, %c0_i32_81] : memref<8x32xf32, #tpu.memory_space<vmem>> -> memref<1x32xf32, #tpu.memory_space<vmem>>
      %111 = tpu.memref_slice %arg6[%c7_i32_78] : memref<8x!tpu.dma_semaphore, #tpu.memory_space<semaphore_mem>> -> memref<1x!tpu.dma_semaphore, #tpu.memory_space<semaphore_mem>>
      %112 = tpu.memref_squeeze %111 : memref<1x!tpu.dma_semaphore, #tpu.memory_space<semaphore_mem>> -> memref<!tpu.dma_semaphore, #tpu.memory_space<semaphore_mem>>
      tpu.wait_dma2 semaphore(%112 : memref<!tpu.dma_semaphore, #tpu.memory_space<semaphore_mem>>) src(%109 : memref<1x32xf32, #tpu.memory_space<any>>) dst(%110 : memref<1x32xf32, #tpu.memory_space<vmem>>)
      %c0_82 = arith.constant 0 : index
      %c0_83 = arith.constant 0 : index
      %113 = vector.load %arg5[%c0_82, %c0_83] : memref<8x32xf32, #tpu.memory_space<vmem>>, vector<8x32xf32>
      %cst_84 = arith.constant dense<0.000000e+00> : vector<32xf32>
      %114 = vector.multi_reduction <add>, %113, %cst_84 [0] : vector<8x32xf32> to vector<32xf32>
      %115 = vector.shape_cast %114 : vector<32xf32> to vector<1x32xf32>
      %cst_85 = arith.constant 1.250000e-01 : f32
      %116 = vector.broadcast %cst_85 : f32 to vector<1x32xf32>
      %117 = arith.mulf %115, %116 : vector<1x32xf32>
      %118 = tpu.transpose %117, [1, 0] : vector<1x32xf32> -> vector<32x1xf32>
      %c0_86 = arith.constant 0 : index
      %c0_87 = arith.constant 0 : index
      %119 = vector.load %arg7[%c0_86, %c0_87] : memref<32x1xf32, #tpu.memory_space<vmem>>, vector<32x1xf32>
      tpu.vector_store %arg7[%c0_86, %c0_87], %118 {strides = array<i32>} : memref<32x1xf32, #tpu.memory_space<vmem>>, vector<32x1xf32>,
    } else {
    }
    %c0 = arith.constant 0 : index
    %c0_1 = arith.constant 0 : index
    %3 = vector.load %arg7[%c0, %c0_1] : memref<32x1xf32, #tpu.memory_space<vmem>>, vector<32x1xf32>
    %4 = vector.shape_cast %3 : vector<32x1xf32> to vector<32x1xf32>
    %5 = vector.broadcast %4 : vector<32x1xf32> to vector<32x1280xf32>
    %c0_2 = arith.constant 0 : index
    %c0_3 = arith.constant 0 : index
    %6 = vector.load %arg3[%c0_2, %c0_3] : memref<32x5120xf32, #tpu.memory_space<vmem>>, vector<32x1280xf32>
    %7 = arith.mulf %6, %5 : vector<32x1280xf32>
    %cst = arith.constant dense<0.000000e+00> : vector<1280xf32>
    %8 = vector.multi_reduction <add>, %7, %cst [0] : vector<32x1280xf32> to vector<1280xf32>
    %9 = vector.shape_cast %8 : vector<1280xf32> to vector<1x1280xf32>
    %c4_i32 = arith.constant 4 : i32
    %10 = arith.muli %c4_i32, %arg0 : i32
    %c0_i32_4 = arith.constant 0 : i32
    %11 = arith.addi %10, %c0_i32_4 : i32
    %12 = arith.index_cast %11 : i32 to index
    %c0_5 = arith.constant 0 : index
    %13 = vector.load %arg8[%12, %c0_5] : memref<8x1280xf32, #tpu.memory_space<vmem>>, vector<1x1280xf32>
    tpu.vector_store %arg8[%12, %c0_5], %9 {strides = array<i32>} : memref<8x1280xf32, #tpu.memory_space<vmem>>, vector<1x1280xf32>,
    %c0_6 = arith.constant 0 : index
    %c1280 = arith.constant 1280 : index
    %14 = vector.load %arg3[%c0_6, %c1280] : memref<32x5120xf32, #tpu.memory_space<vmem>>, vector<32x1280xf32>
    %15 = arith.mulf %14, %5 : vector<32x1280xf32>
    %cst_7 = arith.constant dense<0.000000e+00> : vector<1280xf32>
    %16 = vector.multi_reduction <add>, %15, %cst_7 [0] : vector<32x1280xf32> to vector<1280xf32>
    %17 = vector.shape_cast %16 : vector<1280xf32> to vector<1x1280xf32>
    %c4_i32_8 = arith.constant 4 : i32
    %18 = arith.muli %c4_i32_8, %arg0 : i32
    %c1_i32 = arith.constant 1 : i32
    %19 = arith.addi %18, %c1_i32 : i32
    %20 = arith.index_cast %19 : i32 to index
    %c0_9 = arith.constant 0 : index
    %21 = vector.load %arg8[%20, %c0_9] : memref<8x1280xf32, #tpu.memory_space<vmem>>, vector<1x1280xf32>
    tpu.vector_store %arg8[%20, %c0_9], %17 {strides = array<i32>} : memref<8x1280xf32, #tpu.memory_space<vmem>>, vector<1x1280xf32>,
    %c0_10 = arith.constant 0 : index
    %c2560 = arith.constant 2560 : index
    %22 = vector.load %arg3[%c0_10, %c2560] : memref<32x5120xf32, #tpu.memory_space<vmem>>, vector<32x1280xf32>
    %23 = arith.mulf %22, %5 : vector<32x1280xf32>
    %cst_11 = arith.constant dense<0.000000e+00> : vector<1280xf32>
    %24 = vector.multi_reduction <add>, %23, %cst_11 [0] : vector<32x1280xf32> to vector<1280xf32>
    %25 = vector.shape_cast %24 : vector<1280xf32> to vector<1x1280xf32>
    %c4_i32_12 = arith.constant 4 : i32
    %26 = arith.muli %c4_i32_12, %arg0 : i32
    %c2_i32 = arith.constant 2 : i32
    %27 = arith.addi %26, %c2_i32 : i32
    %28 = arith.index_cast %27 : i32 to index
    %c0_13 = arith.constant 0 : index
    %29 = vector.load %arg8[%28, %c0_13] : memref<8x1280xf32, #tpu.memory_space<vmem>>, vector<1x1280xf32>
    tpu.vector_store %arg8[%28, %c0_13], %25 {strides = array<i32>} : memref<8x1280xf32, #tpu.memory_space<vmem>>, vector<1x1280xf32>,
    %c0_14 = arith.constant 0 : index
    %c3840 = arith.constant 3840 : index
    %30 = vector.load %arg3[%c0_14, %c3840] : memref<32x5120xf32, #tpu.memory_space<vmem>>, vector<32x1280xf32>
    %31 = arith.mulf %30, %5 : vector<32x1280xf32>
    %cst_15 = arith.constant dense<0.000000e+00> : vector<1280xf32>
    %32 = vector.multi_reduction <add>, %31, %cst_15 [0] : vector<32x1280xf32> to vector<1280xf32>
    %33 = vector.shape_cast %32 : vector<1280xf32> to vector<1x1280xf32>
    %c4_i32_16 = arith.constant 4 : i32
    %34 = arith.muli %c4_i32_16, %arg0 : i32
    %c3_i32 = arith.constant 3 : i32
    %35 = arith.addi %34, %c3_i32 : i32
    %36 = arith.index_cast %35 : i32 to index
    %c0_17 = arith.constant 0 : index
    %37 = vector.load %arg8[%36, %c0_17] : memref<8x1280xf32, #tpu.memory_space<vmem>>, vector<1x1280xf32>
    tpu.vector_store %arg8[%36, %c0_17], %33 {strides = array<i32>} : memref<8x1280xf32, #tpu.memory_space<vmem>>, vector<1x1280xf32>,
    %c1_i32_18 = arith.constant 1 : i32
    %38 = arith.cmpi eq, %arg0, %c1_i32_18 : i32
    %39 = arith.extui %38 : i1 to i32
    %c0_i32_19 = arith.constant 0 : i32
    %40 = arith.cmpi ne, %39, %c0_i32_19 : i32
    scf.if %40 {
      %41 = tpu.iota {dimensions = array<i32: 0>} : vector<8x1280xi32>
      %c1280_i32 = arith.constant 1280 : i32
      %42 = vector.broadcast %c1280_i32 : i32 to vector<8x1280xi32>
      %43 = arith.muli %41, %42 : vector<8x1280xi32>
      %44 = tpu.iota {dimensions = array<i32: 1>} : vector<8x1280xi32>
      %45 = arith.addi %43, %44 : vector<8x1280xi32>
      %c10000_i32 = arith.constant 10000 : i32
      %46 = vector.broadcast %c10000_i32 : i32 to vector<8x1280xi32>
      %47 = arith.cmpi slt, %45, %46 : vector<8x1280xi32>
      %c0_20 = arith.constant 0 : index
      %c0_21 = arith.constant 0 : index
      %48 = vector.load %arg8[%c0_20, %c0_21] : memref<8x1280xf32, #tpu.memory_space<vmem>>, vector<8x1280xf32>
      %cst_22 = arith.constant 0xFF800000 : f32
      %49 = vector.broadcast %cst_22 : f32 to vector<8x1280xf32>
      %50 = arith.select %47, %48, %49 : vector<8x1280xi1>, vector<8x1280xf32>
      %51 = tpu.iota {dimensions = array<i32: 1>} : vector<1x10xi32>
      %c0_i32_23 = arith.constant 0 : i32
      %52 = vector.broadcast %c0_i32_23 : i32 to vector<1x10xi32>
      %cst_24 = arith.constant dense<0xFF800000> : vector<8xf32>
      %53 = vector.multi_reduction <maximumf>, %50, %cst_24 [1] : vector<8x1280xf32> to vector<8xf32>
      %54 = vector.shape_cast %53 : vector<8xf32> to vector<8x1xf32>
      %cst_25 = arith.constant dense<0xFF800000> : vector<1xf32>
      %55 = vector.multi_reduction <maximumf>, %54, %cst_25 [0] : vector<8x1xf32> to vector<1xf32>
      %56 = vector.shape_cast %55 : vector<1xf32> to vector<1x1xf32>
      %57 = vector.broadcast %56 : vector<1x1xf32> to vector<8x1280xf32>
      %58 = arith.cmpf oeq, %50, %57 : vector<8x1280xf32>
      %c10240_i32 = arith.constant 10240 : i32
      %59 = vector.broadcast %c10240_i32 : i32 to vector<8x1280xi32>
      %60 = arith.select %58, %45, %59 : vector<8x1280xi1>, vector<8x1280xi32>
      %cst_26 = arith.constant dense<2147483647> : vector<8xi32>
      %61 = vector.multi_reduction <minsi>, %60, %cst_26 [1] : vector<8x1280xi32> to vector<8xi32>
      %62 = vector.shape_cast %61 : vector<8xi32> to vector<8x1xi32>
      %cst_27 = arith.constant dense<2147483647> : vector<1xi32>
      %63 = vector.multi_reduction <minsi>, %62, %cst_27 [0] : vector<8x1xi32> to vector<1xi32>
      %64 = vector.shape_cast %63 : vector<1xi32> to vector<1x1xi32>
      %c0_i32_28 = arith.constant 0 : i32
      %65 = vector.broadcast %c0_i32_28 : i32 to vector<1x10xi32>
      %66 = arith.cmpi eq, %51, %65 : vector<1x10xi32>
      %67 = vector.shape_cast %64 : vector<1x1xi32> to vector<1x1xi32>
      %68 = vector.broadcast %67 : vector<1x1xi32> to vector<1x10xi32>
      %69 = arith.select %66, %68, %52 : vector<1x10xi1>, vector<1x10xi32>
      %70 = vector.broadcast %64 : vector<1x1xi32> to vector<8x1280xi32>
      %71 = arith.cmpi eq, %45, %70 : vector<8x1280xi32>
      %cst_29 = arith.constant 0xFF800000 : f32
      %72 = vector.broadcast %cst_29 : f32 to vector<8x1280xf32>
      %73 = arith.select %71, %72, %50 : vector<8x1280xi1>, vector<8x1280xf32>
      %cst_30 = arith.constant dense<0xFF800000> : vector<8xf32>
      %74 = vector.multi_reduction <maximumf>, %73, %cst_30 [1] : vector<8x1280xf32> to vector<8xf32>
      %75 = vector.shape_cast %74 : vector<8xf32> to vector<8x1xf32>
      %cst_31 = arith.constant dense<0xFF800000> : vector<1xf32>
      %76 = vector.multi_reduction <maximumf>, %75, %cst_31 [0] : vector<8x1xf32> to vector<1xf32>
      %77 = vector.shape_cast %76 : vector<1xf32> to vector<1x1xf32>
      %78 = vector.broadcast %77 : vector<1x1xf32> to vector<8x1280xf32>
      %79 = arith.cmpf oeq, %73, %78 : vector<8x1280xf32>
      %c10240_i32_32 = arith.constant 10240 : i32
      %80 = vector.broadcast %c10240_i32_32 : i32 to vector<8x1280xi32>
      %81 = arith.select %79, %45, %80 : vector<8x1280xi1>, vector<8x1280xi32>
      %cst_33 = arith.constant dense<2147483647> : vector<8xi32>
      %82 = vector.multi_reduction <minsi>, %81, %cst_33 [1] : vector<8x1280xi32> to vector<8xi32>
      %83 = vector.shape_cast %82 : vector<8xi32> to vector<8x1xi32>
      %cst_34 = arith.constant dense<2147483647> : vector<1xi32>
      %84 = vector.multi_reduction <minsi>, %83, %cst_34 [0] : vector<8x1xi32> to vector<1xi32>
      %85 = vector.shape_cast %84 : vector<1xi32> to vector<1x1xi32>
      %c1_i32_35 = arith.constant 1 : i32
      %86 = vector.broadcast %c1_i32_35 : i32 to vector<1x10xi32>
      %87 = arith.cmpi eq, %51, %86 : vector<1x10xi32>
      %88 = vector.shape_cast %85 : vector<1x1xi32> to vector<1x1xi32>
      %89 = vector.broadcast %88 : vector<1x1xi32> to vector<1x10xi32>
      %90 = arith.select %87, %89, %69 : vector<1x10xi1>, vector<1x10xi32>
      %91 = vector.broadcast %85 : vector<1x1xi32> to vector<8x1280xi32>
      %92 = arith.cmpi eq, %45, %91 : vector<8x1280xi32>
      %cst_36 = arith.constant 0xFF800000 : f32
      %93 = vector.broadcast %cst_36 : f32 to vector<8x1280xf32>
      %94 = arith.select %92, %93, %73 : vector<8x1280xi1>, vector<8x1280xf32>
      %cst_37 = arith.constant dense<0xFF800000> : vector<8xf32>
      %95 = vector.multi_reduction <maximumf>, %94, %cst_37 [1] : vector<8x1280xf32> to vector<8xf32>
      %96 = vector.shape_cast %95 : vector<8xf32> to vector<8x1xf32>
      %cst_38 = arith.constant dense<0xFF800000> : vector<1xf32>
      %97 = vector.multi_reduction <maximumf>, %96, %cst_38 [0] : vector<8x1xf32> to vector<1xf32>
      %98 = vector.shape_cast %97 : vector<1xf32> to vector<1x1xf32>
      %99 = vector.broadcast %98 : vector<1x1xf32> to vector<8x1280xf32>
      %100 = arith.cmpf oeq, %94, %99 : vector<8x1280xf32>
      %c10240_i32_39 = arith.constant 10240 : i32
      %101 = vector.broadcast %c10240_i32_39 : i32 to vector<8x1280xi32>
      %102 = arith.select %100, %45, %101 : vector<8x1280xi1>, vector<8x1280xi32>
      %cst_40 = arith.constant dense<2147483647> : vector<8xi32>
      %103 = vector.multi_reduction <minsi>, %102, %cst_40 [1] : vector<8x1280xi32> to vector<8xi32>
      %104 = vector.shape_cast %103 : vector<8xi32> to vector<8x1xi32>
      %cst_41 = arith.constant dense<2147483647> : vector<1xi32>
      %105 = vector.multi_reduction <minsi>, %104, %cst_41 [0] : vector<8x1xi32> to vector<1xi32>
      %106 = vector.shape_cast %105 : vector<1xi32> to vector<1x1xi32>
      %c2_i32_42 = arith.constant 2 : i32
      %107 = vector.broadcast %c2_i32_42 : i32 to vector<1x10xi32>
      %108 = arith.cmpi eq, %51, %107 : vector<1x10xi32>
      %109 = vector.shape_cast %106 : vector<1x1xi32> to vector<1x1xi32>
      %110 = vector.broadcast %109 : vector<1x1xi32> to vector<1x10xi32>
      %111 = arith.select %108, %110, %90 : vector<1x10xi1>, vector<1x10xi32>
      %112 = vector.broadcast %106 : vector<1x1xi32> to vector<8x1280xi32>
      %113 = arith.cmpi eq, %45, %112 : vector<8x1280xi32>
      %cst_43 = arith.constant 0xFF800000 : f32
      %114 = vector.broadcast %cst_43 : f32 to vector<8x1280xf32>
      %115 = arith.select %113, %114, %94 : vector<8x1280xi1>, vector<8x1280xf32>
      %cst_44 = arith.constant dense<0xFF800000> : vector<8xf32>
      %116 = vector.multi_reduction <maximumf>, %115, %cst_44 [1] : vector<8x1280xf32> to vector<8xf32>
      %117 = vector.shape_cast %116 : vector<8xf32> to vector<8x1xf32>
      %cst_45 = arith.constant dense<0xFF800000> : vector<1xf32>
      %118 = vector.multi_reduction <maximumf>, %117, %cst_45 [0] : vector<8x1xf32> to vector<1xf32>
      %119 = vector.shape_cast %118 : vector<1xf32> to vector<1x1xf32>
      %120 = vector.broadcast %119 : vector<1x1xf32> to vector<8x1280xf32>
      %121 = arith.cmpf oeq, %115, %120 : vector<8x1280xf32>
      %c10240_i32_46 = arith.constant 10240 : i32
      %122 = vector.broadcast %c10240_i32_46 : i32 to vector<8x1280xi32>
      %123 = arith.select %121, %45, %122 : vector<8x1280xi1>, vector<8x1280xi32>
      %cst_47 = arith.constant dense<2147483647> : vector<8xi32>
      %124 = vector.multi_reduction <minsi>, %123, %cst_47 [1] : vector<8x1280xi32> to vector<8xi32>
      %125 = vector.shape_cast %124 : vector<8xi32> to vector<8x1xi32>
      %cst_48 = arith.constant dense<2147483647> : vector<1xi32>
      %126 = vector.multi_reduction <minsi>, %125, %cst_48 [0] : vector<8x1xi32> to vector<1xi32>
      %127 = vector.shape_cast %126 : vector<1xi32> to vector<1x1xi32>
      %c3_i32_49 = arith.constant 3 : i32
      %128 = vector.broadcast %c3_i32_49 : i32 to vector<1x10xi32>
      %129 = arith.cmpi eq, %51, %128 : vector<1x10xi32>
      %130 = vector.shape_cast %127 : vector<1x1xi32> to vector<1x1xi32>
      %131 = vector.broadcast %130 : vector<1x1xi32> to vector<1x10xi32>
      %132 = arith.select %129, %131, %111 : vector<1x10xi1>, vector<1x10xi32>
      %133 = vector.broadcast %127 : vector<1x1xi32> to vector<8x1280xi32>
      %134 = arith.cmpi eq, %45, %133 : vector<8x1280xi32>
      %cst_50 = arith.constant 0xFF800000 : f32
      %135 = vector.broadcast %cst_50 : f32 to vector<8x1280xf32>
      %136 = arith.select %134, %135, %115 : vector<8x1280xi1>, vector<8x1280xf32>
      %cst_51 = arith.constant dense<0xFF800000> : vector<8xf32>
      %137 = vector.multi_reduction <maximumf>, %136, %cst_51 [1] : vector<8x1280xf32> to vector<8xf32>
      %138 = vector.shape_cast %137 : vector<8xf32> to vector<8x1xf32>
      %cst_52 = arith.constant dense<0xFF800000> : vector<1xf32>
      %139 = vector.multi_reduction <maximumf>, %138, %cst_52 [0] : vector<8x1xf32> to vector<1xf32>
      %140 = vector.shape_cast %139 : vector<1xf32> to vector<1x1xf32>
      %141 = vector.broadcast %140 : vector<1x1xf32> to vector<8x1280xf32>
      %142 = arith.cmpf oeq, %136, %141 : vector<8x1280xf32>
      %c10240_i32_53 = arith.constant 10240 : i32
      %143 = vector.broadcast %c10240_i32_53 : i32 to vector<8x1280xi32>
      %144 = arith.select %142, %45, %143 : vector<8x1280xi1>, vector<8x1280xi32>
      %cst_54 = arith.constant dense<2147483647> : vector<8xi32>
      %145 = vector.multi_reduction <minsi>, %144, %cst_54 [1] : vector<8x1280xi32> to vector<8xi32>
      %146 = vector.shape_cast %145 : vector<8xi32> to vector<8x1xi32>
      %cst_55 = arith.constant dense<2147483647> : vector<1xi32>
      %147 = vector.multi_reduction <minsi>, %146, %cst_55 [0] : vector<8x1xi32> to vector<1xi32>
      %148 = vector.shape_cast %147 : vector<1xi32> to vector<1x1xi32>
      %c4_i32_56 = arith.constant 4 : i32
      %149 = vector.broadcast %c4_i32_56 : i32 to vector<1x10xi32>
      %150 = arith.cmpi eq, %51, %149 : vector<1x10xi32>
      %151 = vector.shape_cast %148 : vector<1x1xi32> to vector<1x1xi32>
      %152 = vector.broadcast %151 : vector<1x1xi32> to vector<1x10xi32>
      %153 = arith.select %150, %152, %132 : vector<1x10xi1>, vector<1x10xi32>
      %154 = vector.broadcast %148 : vector<1x1xi32> to vector<8x1280xi32>
      %155 = arith.cmpi eq, %45, %154 : vector<8x1280xi32>
      %cst_57 = arith.constant 0xFF800000 : f32
      %156 = vector.broadcast %cst_57 : f32 to vector<8x1280xf32>
      %157 = arith.select %155, %156, %136 : vector<8x1280xi1>, vector<8x1280xf32>
      %cst_58 = arith.constant dense<0xFF800000> : vector<8xf32>
      %158 = vector.multi_reduction <maximumf>, %157, %cst_58 [1] : vector<8x1280xf32> to vector<8xf32>
      %159 = vector.shape_cast %158 : vector<8xf32> to vector<8x1xf32>
      %cst_59 = arith.constant dense<0xFF800000> : vector<1xf32>
      %160 = vector.multi_reduction <maximumf>, %159, %cst_59 [0] : vector<8x1xf32> to vector<1xf32>
      %161 = vector.shape_cast %160 : vector<1xf32> to vector<1x1xf32>
      %162 = vector.broadcast %161 : vector<1x1xf32> to vector<8x1280xf32>
      %163 = arith.cmpf oeq, %157, %162 : vector<8x1280xf32>
      %c10240_i32_60 = arith.constant 10240 : i32
      %164 = vector.broadcast %c10240_i32_60 : i32 to vector<8x1280xi32>
      %165 = arith.select %163, %45, %164 : vector<8x1280xi1>, vector<8x1280xi32>
      %cst_61 = arith.constant dense<2147483647> : vector<8xi32>
      %166 = vector.multi_reduction <minsi>, %165, %cst_61 [1] : vector<8x1280xi32> to vector<8xi32>
      %167 = vector.shape_cast %166 : vector<8xi32> to vector<8x1xi32>
      %cst_62 = arith.constant dense<2147483647> : vector<1xi32>
      %168 = vector.multi_reduction <minsi>, %167, %cst_62 [0] : vector<8x1xi32> to vector<1xi32>
      %169 = vector.shape_cast %168 : vector<1xi32> to vector<1x1xi32>
      %c5_i32 = arith.constant 5 : i32
      %170 = vector.broadcast %c5_i32 : i32 to vector<1x10xi32>
      %171 = arith.cmpi eq, %51, %170 : vector<1x10xi32>
      %172 = vector.shape_cast %169 : vector<1x1xi32> to vector<1x1xi32>
      %173 = vector.broadcast %172 : vector<1x1xi32> to vector<1x10xi32>
      %174 = arith.select %171, %173, %153 : vector<1x10xi1>, vector<1x10xi32>
      %175 = vector.broadcast %169 : vector<1x1xi32> to vector<8x1280xi32>
      %176 = arith.cmpi eq, %45, %175 : vector<8x1280xi32>
      %cst_63 = arith.constant 0xFF800000 : f32
      %177 = vector.broadcast %cst_63 : f32 to vector<8x1280xf32>
      %178 = arith.select %176, %177, %157 : vector<8x1280xi1>, vector<8x1280xf32>
      %cst_64 = arith.constant dense<0xFF800000> : vector<8xf32>
      %179 = vector.multi_reduction <maximumf>, %178, %cst_64 [1] : vector<8x1280xf32> to vector<8xf32>
      %180 = vector.shape_cast %179 : vector<8xf32> to vector<8x1xf32>
      %cst_65 = arith.constant dense<0xFF800000> : vector<1xf32>
      %181 = vector.multi_reduction <maximumf>, %180, %cst_65 [0] : vector<8x1xf32> to vector<1xf32>
      %182 = vector.shape_cast %181 : vector<1xf32> to vector<1x1xf32>
      %183 = vector.broadcast %182 : vector<1x1xf32> to vector<8x1280xf32>
      %184 = arith.cmpf oeq, %178, %183 : vector<8x1280xf32>
      %c10240_i32_66 = arith.constant 10240 : i32
      %185 = vector.broadcast %c10240_i32_66 : i32 to vector<8x1280xi32>
      %186 = arith.select %184, %45, %185 : vector<8x1280xi1>, vector<8x1280xi32>
      %cst_67 = arith.constant dense<2147483647> : vector<8xi32>
      %187 = vector.multi_reduction <minsi>, %186, %cst_67 [1] : vector<8x1280xi32> to vector<8xi32>
      %188 = vector.shape_cast %187 : vector<8xi32> to vector<8x1xi32>
      %cst_68 = arith.constant dense<2147483647> : vector<1xi32>
      %189 = vector.multi_reduction <minsi>, %188, %cst_68 [0] : vector<8x1xi32> to vector<1xi32>
      %190 = vector.shape_cast %189 : vector<1xi32> to vector<1x1xi32>
      %c6_i32 = arith.constant 6 : i32
      %191 = vector.broadcast %c6_i32 : i32 to vector<1x10xi32>
      %192 = arith.cmpi eq, %51, %191 : vector<1x10xi32>
      %193 = vector.shape_cast %190 : vector<1x1xi32> to vector<1x1xi32>
      %194 = vector.broadcast %193 : vector<1x1xi32> to vector<1x10xi32>
      %195 = arith.select %192, %194, %174 : vector<1x10xi1>, vector<1x10xi32>
      %196 = vector.broadcast %190 : vector<1x1xi32> to vector<8x1280xi32>
      %197 = arith.cmpi eq, %45, %196 : vector<8x1280xi32>
      %cst_69 = arith.constant 0xFF800000 : f32
      %198 = vector.broadcast %cst_69 : f32 to vector<8x1280xf32>
      %199 = arith.select %197, %198, %178 : vector<8x1280xi1>, vector<8x1280xf32>
      %cst_70 = arith.constant dense<0xFF800000> : vector<8xf32>
      %200 = vector.multi_reduction <maximumf>, %199, %cst_70 [1] : vector<8x1280xf32> to vector<8xf32>
      %201 = vector.shape_cast %200 : vector<8xf32> to vector<8x1xf32>
      %cst_71 = arith.constant dense<0xFF800000> : vector<1xf32>
      %202 = vector.multi_reduction <maximumf>, %201, %cst_71 [0] : vector<8x1xf32> to vector<1xf32>
      %203 = vector.shape_cast %202 : vector<1xf32> to vector<1x1xf32>
      %204 = vector.broadcast %203 : vector<1x1xf32> to vector<8x1280xf32>
      %205 = arith.cmpf oeq, %199, %204 : vector<8x1280xf32>
      %c10240_i32_72 = arith.constant 10240 : i32
      %206 = vector.broadcast %c10240_i32_72 : i32 to vector<8x1280xi32>
      %207 = arith.select %205, %45, %206 : vector<8x1280xi1>, vector<8x1280xi32>
      %cst_73 = arith.constant dense<2147483647> : vector<8xi32>
      %208 = vector.multi_reduction <minsi>, %207, %cst_73 [1] : vector<8x1280xi32> to vector<8xi32>
      %209 = vector.shape_cast %208 : vector<8xi32> to vector<8x1xi32>
      %cst_74 = arith.constant dense<2147483647> : vector<1xi32>
      %210 = vector.multi_reduction <minsi>, %209, %cst_74 [0] : vector<8x1xi32> to vector<1xi32>
      %211 = vector.shape_cast %210 : vector<1xi32> to vector<1x1xi32>
      %c7_i32 = arith.constant 7 : i32
      %212 = vector.broadcast %c7_i32 : i32 to vector<1x10xi32>
      %213 = arith.cmpi eq, %51, %212 : vector<1x10xi32>
      %214 = vector.shape_cast %211 : vector<1x1xi32> to vector<1x1xi32>
      %215 = vector.broadcast %214 : vector<1x1xi32> to vector<1x10xi32>
      %216 = arith.select %213, %215, %195 : vector<1x10xi1>, vector<1x10xi32>
      %217 = vector.broadcast %211 : vector<1x1xi32> to vector<8x1280xi32>
      %218 = arith.cmpi eq, %45, %217 : vector<8x1280xi32>
      %cst_75 = arith.constant 0xFF800000 : f32
      %219 = vector.broadcast %cst_75 : f32 to vector<8x1280xf32>
      %220 = arith.select %218, %219, %199 : vector<8x1280xi1>, vector<8x1280xf32>
      %cst_76 = arith.constant dense<0xFF800000> : vector<8xf32>
      %221 = vector.multi_reduction <maximumf>, %220, %cst_76 [1] : vector<8x1280xf32> to vector<8xf32>
      %222 = vector.shape_cast %221 : vector<8xf32> to vector<8x1xf32>
      %cst_77 = arith.constant dense<0xFF800000> : vector<1xf32>
      %223 = vector.multi_reduction <maximumf>, %222, %cst_77 [0] : vector<8x1xf32> to vector<1xf32>
      %224 = vector.shape_cast %223 : vector<1xf32> to vector<1x1xf32>
      %225 = vector.broadcast %224 : vector<1x1xf32> to vector<8x1280xf32>
      %226 = arith.cmpf oeq, %220, %225 : vector<8x1280xf32>
      %c10240_i32_78 = arith.constant 10240 : i32
      %227 = vector.broadcast %c10240_i32_78 : i32 to vector<8x1280xi32>
      %228 = arith.select %226, %45, %227 : vector<8x1280xi1>, vector<8x1280xi32>
      %cst_79 = arith.constant dense<2147483647> : vector<8xi32>
      %229 = vector.multi_reduction <minsi>, %228, %cst_79 [1] : vector<8x1280xi32> to vector<8xi32>
      %230 = vector.shape_cast %229 : vector<8xi32> to vector<8x1xi32>
      %cst_80 = arith.constant dense<2147483647> : vector<1xi32>
      %231 = vector.multi_reduction <minsi>, %230, %cst_80 [0] : vector<8x1xi32> to vector<1xi32>
      %232 = vector.shape_cast %231 : vector<1xi32> to vector<1x1xi32>
      %c8_i32 = arith.constant 8 : i32
      %233 = vector.broadcast %c8_i32 : i32 to vector<1x10xi32>
      %234 = arith.cmpi eq, %51, %233 : vector<1x10xi32>
      %235 = vector.shape_cast %232 : vector<1x1xi32> to vector<1x1xi32>
      %236 = vector.broadcast %235 : vector<1x1xi32> to vector<1x10xi32>
      %237 = arith.select %234, %236, %216 : vector<1x10xi1>, vector<1x10xi32>
      %238 = vector.broadcast %232 : vector<1x1xi32> to vector<8x1280xi32>
      %239 = arith.cmpi eq, %45, %238 : vector<8x1280xi32>
      %cst_81 = arith.constant 0xFF800000 : f32
      %240 = vector.broadcast %cst_81 : f32 to vector<8x1280xf32>
      %241 = arith.select %239, %240, %220 : vector<8x1280xi1>, vector<8x1280xf32>
      %cst_82 = arith.constant dense<0xFF800000> : vector<8xf32>
      %242 = vector.multi_reduction <maximumf>, %241, %cst_82 [1] : vector<8x1280xf32> to vector<8xf32>
      %243 = vector.shape_cast %242 : vector<8xf32> to vector<8x1xf32>
      %cst_83 = arith.constant dense<0xFF800000> : vector<1xf32>
      %244 = vector.multi_reduction <maximumf>, %243, %cst_83 [0] : vector<8x1xf32> to vector<1xf32>
      %245 = vector.shape_cast %244 : vector<1xf32> to vector<1x1xf32>
      %246 = vector.broadcast %245 : vector<1x1xf32> to vector<8x1280xf32>
      %247 = arith.cmpf oeq, %241, %246 : vector<8x1280xf32>
      %c10240_i32_84 = arith.constant 10240 : i32
      %248 = vector.broadcast %c10240_i32_84 : i32 to vector<8x1280xi32>
      %249 = arith.select %247, %45, %248 : vector<8x1280xi1>, vector<8x1280xi32>
      %cst_85 = arith.constant dense<2147483647> : vector<8xi32>
      %250 = vector.multi_reduction <minsi>, %249, %cst_85 [1] : vector<8x1280xi32> to vector<8xi32>
      %251 = vector.shape_cast %250 : vector<8xi32> to vector<8x1xi32>
      %cst_86 = arith.constant dense<2147483647> : vector<1xi32>
      %252 = vector.multi_reduction <minsi>, %251, %cst_86 [0] : vector<8x1xi32> to vector<1xi32>
      %253 = vector.shape_cast %252 : vector<1xi32> to vector<1x1xi32>
      %c9_i32 = arith.constant 9 : i32
      %254 = vector.broadcast %c9_i32 : i32 to vector<1x10xi32>
      %255 = arith.cmpi eq, %51, %254 : vector<1x10xi32>
      %256 = vector.shape_cast %253 : vector<1x1xi32> to vector<1x1xi32>
      %257 = vector.broadcast %256 : vector<1x1xi32> to vector<1x10xi32>
      %258 = arith.select %255, %257, %237 : vector<1x10xi1>, vector<1x10xi32>
      %c0_87 = arith.constant 0 : index
      %c0_88 = arith.constant 0 : index
      %259 = vector.load %arg4[%c0_87, %c0_88] : memref<1x10xi32, #tpu.memory_space<vmem>>, vector<1x10xi32>
      tpu.vector_store %arg4[%c0_87, %c0_88], %258 {strides = array<i32>} : memref<1x10xi32, #tpu.memory_space<vmem>>, vector<1x10xi32>,
    } else {
    }
    return
  }
  func.func @transform_1(%arg0: i32, %arg1: memref<8xi32, #tpu.memory_space<smem>>) -> (i32, i32) {
    %c0_i32 = arith.constant 0 : i32
    %c0_i32_0 = arith.constant 0 : i32
    return %c0_i32, %arg0 : i32, i32
  }
  func.func @transform_2(%arg0: i32, %arg1: memref<8xi32, #tpu.memory_space<smem>>) -> (i32, i32) {
    %c0_i32 = arith.constant 0 : i32
    %c0_i32_0 = arith.constant 0 : i32
    %c0_i32_1 = arith.constant 0 : i32
    return %c0_i32, %c0_i32_0 : i32, i32
  }
}

</mosaic_0001>

<bundles_post_ra>
// kernel: tpu_custom_call.1
= control target key start
LH: loop header
LB: loop body
LE: loop exit
PB: predicated region body
PF: predicated region fallthrough
CT: control target
= control target key end

     0   :  { %s5200_s0 = inlined_call_operand.vmem [shape: s32[8], index: 0, kind: input, shape index: {}]   ;;  %s5201_s1 = inlined_call_operand.vmem [shape: f32[10000,32], index: 1, kind: input, shape index: {}]   ;;  %s5202_s2 = inlined_call_operand.vmem [shape: f32[32,10240], index: 2, kind: input, shape index: {}]   ;;  %s5203_s3 = inlined_call_operand.hbm [shape: s32[1,10], index: 3, kind: output, shape index: {}]  }
   0x1   :  { %s8_s14 = sshll.u32 %s5200_s0, 4  ;;  %s9_s14 = int_to_ptr.vmem [resolvable:$true] %s8_s14 }
   0x2   :  { %s3333_s15 = scalar_lea.vmem %s9_s14, 16  ;;  %p3338_p1 = scmp.lt.s32.totalorder %s9_s14, %s9_s14 }
   0x3   :  { %p3334_p0 = scmp.ne.s32.totalorder %s9_s14, %s3333_s15  ;;  %p3339_p2 = scmp.lt.s32.totalorder %s3333_s15, %s3333_s15 }
   0x5   :  { %p3340_p3 = por %p3339_p2, %p3338_p1 }
   0x7   :  { %p3341_p4 = pnand %p3340_p3, %p3334_p0 }
   0x9   :  { %3344 = shalt.err (!%p3341_p4)  }
   0xa   :  { %s3417_s16 = smov [#allocation7]  }
   0xb   :  { %11 = dma.vmem_to_smem %s9_s14, 16, %s3417_s16, [#allocation6] }
   0xc   :  { %3383 = dma.done.wait [#allocation6], 16 }
   0xd   :  { %3384 = vsyncadd [#allocation6], 4294967280 }
   0xe   :  { %13 = sfence }
   0xf   :  { %14 = vsyncpa [#allocation10], 0  ;;  %s3444_s17 = smov 0   ;;  %s3446_s18 = smov 0  }
  0x10   :  { %s3448_s19 = smov 0  }
  0x11 LB: > { %s3460_s0 = sadd.s32 4294967295, %s3415_s19   ;;  %s3463_s20 = sadd.s32 1, %s3415_s19   ;;  %s3415_s19 = sphi %s3448_s19, %s5211_s19   ;;  %s3411_s18 = sphi %s3446_s18, %s5210_s18   ;;  %s3407_s17 = sphi %s3444_s17, %s5209_s17  }
  0x12   : > { %s24_s21 = ssub.s32 %s3415_s19, %s3463_s20  ;;  %s27_s22 = sadd.s32 1, %s3411_s18 }
  0x13   : > { %p25_p5 = scmp.eq.s32.totalorder %s24_s21, 0  ;;  %p34_p6 = scmp.ne.s32.totalorder %s3411_s18, %s3407_s17 }
  0x14   : > { %p35_p7 = scmp.eq.s32.totalorder %s3415_s19, 0  ;;  %p3256_p9 = scmp.ge.s32.totalorder %s3415_s19, 2 }
  0x15   : > { %s3472_s23 = scalar_select %p25_p5, %s3411_s18, %s27_s22  }
  0x16   : > { %p36_p8 = por %p35_p7, %p34_p6  ;;  %81 = sbr.rel (%p3256_p9) target bundleno = 114 (0x72), region = 16 }
  0x1d   : > { %84 = sbr.rel (!%p36_p8) target bundleno = 114 (0x72), region = 20  ;;  %s86_s24 = sand.u32 (%p36_p8), 1, %s3411_s18  }
  0x1e   : > { %s3293_s25 = smul.u32 (%p36_p8), 320, %s3415_s19 }
  0x1f   : > { %s3294_s26 = smul.u32 (%p36_p8), 1280, %s86_s24 }
  0x20   : > { %s3480_s29 = scalar_lea.vmem (%p36_p8), %s5202_s2, %s3293_s25 }
  0x21   : > { %v104_v0 = vld [vmem:[%s3480_s29] sm:$0xff] (%p36_p8)  ;;  %v106_v1 = vld [vmem:[%s3480_s29 + $0x8] sm:$0xff] (%p36_p8)  ;;  %v108_v2 = vld [vmem:[%s3480_s29 + $0x10] sm:$0xff] (%p36_p8)  ;;  %s3485_s30 = scalar_lea.vmem (%p36_p8), [#allocation8], %s3294_s26 }
  0x22   : > { %105 = vst [vmem:[%s3485_s30] sm:$0xff] (%p36_p8), %v104_v0  ;;  %107 = vst [vmem:[%s3485_s30 + $0x8] sm:$0xff] (%p36_p8), %v106_v1  ;;  %v110_v3 = vld [vmem:[%s3480_s29 + $0x18] sm:$0xff] (%p36_p8)  ;;  %v112_v4 = vld [vmem:[%s3480_s29 + $0x20] sm:$0xff] (%p36_p8) }
  0x23   : > { %109 = vst [vmem:[%s3485_s30 + $0x10] sm:$0xff] (%p36_p8), %v108_v2  ;;  %v114_v5 = vld [vmem:[%s3480_s29 + $0x28] sm:$0xff] (%p36_p8)  ;;  %111 = vst [vmem:[%s3485_s30 + $0x18] sm:$0xff] (%p36_p8), %v110_v3  ;;  %v116_v6 = vld [vmem:[%s3480_s29 + $0x30] sm:$0xff] (%p36_p8) }
  0x24   : > { %113 = vst [vmem:[%s3485_s30 + $0x20] sm:$0xff] %v112_v4  ;;  %115 = vst [vmem:[%s3485_s30 + $0x28] sm:$0xff] %v114_v5  ;;  %v118_v7 = vld [vmem:[%s3480_s29 + $0x38] sm:$0xff]  ;;  %v120_v8 = vld [vmem:[%s3480_s29 + $0x40] sm:$0xff] }
  0x25   : > { %117 = vst [vmem:[%s3485_s30 + $0x30] sm:$0xff] %v116_v6  ;;  %119 = vst [vmem:[%s3485_s30 + $0x38] sm:$0xff] %v118_v7  ;;  %v122_v9 = vld [vmem:[%s3480_s29 + $0x48] sm:$0xff]  ;;  %v124_v10 = vld [vmem:[%s3480_s29 + $0x50] sm:$0xff] }
  0x26   : > { %121 = vst [vmem:[%s3485_s30 + $0x40] sm:$0xff] %v120_v8  ;;  %v126_v11 = vld [vmem:[%s3480_s29 + $0x58] sm:$0xff]  ;;  %123 = vst [vmem:[%s3485_s30 + $0x48] sm:$0xff] %v122_v9  ;;  %v128_v12 = vld [vmem:[%s3480_s29 + $0x60] sm:$0xff] }
  0x27   : > { %125 = vst [vmem:[%s3485_s30 + $0x50] sm:$0xff] %v124_v10  ;;  %127 = vst [vmem:[%s3485_s30 + $0x58] sm:$0xff] %v126_v11  ;;  %v130_v13 = vld [vmem:[%s3480_s29 + $0x68] sm:$0xff]  ;;  %v132_v14 = vld [vmem:[%s3480_s29 + $0x70] sm:$0xff] }
  0x28   : > { %129 = vst [vmem:[%s3485_s30 + $0x60] sm:$0xff] %v128_v12  ;;  %131 = vst [vmem:[%s3485_s30 + $0x68] sm:$0xff] %v130_v13  ;;  %v134_v15 = vld [vmem:[%s3480_s29 + $0x78] sm:$0xff]  ;;  %v136_v16 = vld [vmem:[%s3480_s29 + $0x80] sm:$0xff] }
  0x29   : > { %133 = vst [vmem:[%s3485_s30 + $0x70] sm:$0xff] %v132_v14  ;;  %v138_v17 = vld [vmem:[%s3480_s29 + $0x88] sm:$0xff]  ;;  %135 = vst [vmem:[%s3485_s30 + $0x78] sm:$0xff] %v134_v15  ;;  %v140_v18 = vld [vmem:[%s3480_s29 + $0x90] sm:$0xff] }
  0x2a   : > { %137 = vst [vmem:[%s3485_s30 + $0x80] sm:$0xff] %v136_v16  ;;  %139 = vst [vmem:[%s3485_s30 + $0x88] sm:$0xff] %v138_v17  ;;  %v142_v19 = vld [vmem:[%s3480_s29 + $0x98] sm:$0xff]  ;;  %v144_v20 = vld [vmem:[%s3480_s29 + $0xa0] sm:$0xff] }
  0x2b   : > { %141 = vst [vmem:[%s3485_s30 + $0x90] sm:$0xff] %v140_v18  ;;  %143 = vst [vmem:[%s3485_s30 + $0x98] sm:$0xff] %v142_v19  ;;  %v146_v21 = vld [vmem:[%s3480_s29 + $0xa8] sm:$0xff]  ;;  %v148_v22 = vld [vmem:[%s3480_s29 + $0xb0] sm:$0xff] }
  0x2c   : > { %145 = vst [vmem:[%s3485_s30 + $0xa0] sm:$0xff] %v144_v20  ;;  %v150_v23 = vld [vmem:[%s3480_s29 + $0xb8] sm:$0xff]  ;;  %147 = vst [vmem:[%s3485_s30 + $0xa8] sm:$0xff] %v146_v21  ;;  %v152_v24 = vld [vmem:[%s3480_s29 + $0xc0] sm:$0xff] }
  0x2d   : > { %149 = vst [vmem:[%s3485_s30 + $0xb0] sm:$0xff] %v148_v22  ;;  %151 = vst [vmem:[%s3485_s30 + $0xb8] sm:$0xff] %v150_v23  ;;  %v154_v25 = vld [vmem:[%s3480_s29 + $0xc8] sm:$0xff]  ;;  %v156_v26 = vld [vmem:[%s3480_s29 + $0xd0] sm:$0xff] }
  0x2e   : > { %153 = vst [vmem:[%s3485_s30 + $0xc0] sm:$0xff] %v152_v24  ;;  %155 = vst [vmem:[%s3485_s30 + $0xc8] sm:$0xff] %v154_v25  ;;  %v158_v27 = vld [vmem:[%s3480_s29 + $0xd8] sm:$0xff]  ;;  %v160_v28 = vld [vmem:[%s3480_s29 + $0xe0] sm:$0xff] }
  0x2f   : > { %157 = vst [vmem:[%s3485_s30 + $0xd0] sm:$0xff] %v156_v26  ;;  %v162_v29 = vld [vmem:[%s3480_s29 + $0xe8] sm:$0xff]  ;;  %159 = vst [vmem:[%s3485_s30 + $0xd8] sm:$0xff] %v158_v27  ;;  %v164_v30 = vld [vmem:[%s3480_s29 + $0xf0] sm:$0xff] }
  0x30   : > { %161 = vst [vmem:[%s3485_s30 + $0xe0] sm:$0xff] %v160_v28  ;;  %163 = vst [vmem:[%s3485_s30 + $0xe8] sm:$0xff] %v162_v29  ;;  %v166_v31 = vld [vmem:[%s3480_s29 + $0xf8] sm:$0xff]  ;;  %v168_v32 = vld [vmem:[%s3480_s29 + $0x100] sm:$0xff] }
  0x31   : > { %165 = vst [vmem:[%s3485_s30 + $0xf0] sm:$0xff] %v164_v30  ;;  %167 = vst [vmem:[%s3485_s30 + $0xf8] sm:$0xff] %v166_v31  ;;  %v170_v33 = vld [vmem:[%s3480_s29 + $0x108] sm:$0xff]  ;;  %v172_v34 = vld [vmem:[%s3480_s29 + $0x110] sm:$0xff] }
  0x32   : > { %169 = vst [vmem:[%s3485_s30 + $0x100] sm:$0xff] %v168_v32  ;;  %v174_v35 = vld [vmem:[%s3480_s29 + $0x118] sm:$0xff]  ;;  %171 = vst [vmem:[%s3485_s30 + $0x108] sm:$0xff] %v170_v33  ;;  %v176_v36 = vld [vmem:[%s3480_s29 + $0x120] sm:$0xff] }
  0x33   : > { %173 = vst [vmem:[%s3485_s30 + $0x110] sm:$0xff] %v172_v34  ;;  %175 = vst [vmem:[%s3485_s30 + $0x118] sm:$0xff] %v174_v35  ;;  %v178_v37 = vld [vmem:[%s3480_s29 + $0x128] sm:$0xff]  ;;  %v180_v38 = vld [vmem:[%s3480_s29 + $0x130] sm:$0xff] }
  0x34   : > { %177 = vst [vmem:[%s3485_s30 + $0x120] sm:$0xff] %v176_v36  ;;  %179 = vst [vmem:[%s3485_s30 + $0x128] sm:$0xff] %v178_v37  ;;  %v182_v39 = vld [vmem:[%s3480_s29 + $0x138] sm:$0xff]  ;;  %v184_v40 = vld [vmem:[%s3480_s29 + $0x280] sm:$0xff] }
  0x35   : > { %181 = vst [vmem:[%s3485_s30 + $0x130] sm:$0xff] %v180_v38  ;;  %v186_v41 = vld [vmem:[%s3480_s29 + $0x288] sm:$0xff]  ;;  %183 = vst [vmem:[%s3485_s30 + $0x138] sm:$0xff] %v182_v39  ;;  %v188_v42 = vld [vmem:[%s3480_s29 + $0x290] sm:$0xff] }
  0x36   : > { %185 = vst [vmem:[%s3485_s30 + $0x140] sm:$0xff] %v184_v40  ;;  %187 = vst [vmem:[%s3485_s30 + $0x148] sm:$0xff] %v186_v41  ;;  %v190_v43 = vld [vmem:[%s3480_s29 + $0x298] sm:$0xff]  ;;  %v192_v44 = vld [vmem:[%s3480_s29 + $0x2a0] sm:$0xff] }
  0x37   : > { %189 = vst [vmem:[%s3485_s30 + $0x150] sm:$0xff] %v188_v42  ;;  %191 = vst [vmem:[%s3485_s30 + $0x158] sm:$0xff] %v190_v43  ;;  %v194_v45 = vld [vmem:[%s3480_s29 + $0x2a8] sm:$0xff]  ;;  %v196_v46 = vld [vmem:[%s3480_s29 + $0x2b0] sm:$0xff] }
  0x38   : > { %193 = vst [vmem:[%s3485_s30 + $0x160] sm:$0xff] %v192_v44  ;;  %v198_v47 = vld [vmem:[%s3480_s29 + $0x2b8] sm:$0xff]  ;;  %195 = vst [vmem:[%s3485_s30 + $0x168] sm:$0xff] %v194_v45  ;;  %v200_v48 = vld [vmem:[%s3480_s29 + $0x2c0] sm:$0xff] }
  0x39   : > { %197 = vst [vmem:[%s3485_s30 + $0x170] sm:$0xff] %v196_v46  ;;  %199 = vst [vmem:[%s3485_s30 + $0x178] sm:$0xff] %v198_v47  ;;  %v202_v49 = vld [vmem:[%s3480_s29 + $0x2c8] sm:$0xff]  ;;  %v204_v50 = vld [vmem:[%s3480_s29 + $0x2d0] sm:$0xff] }
  0x3a   : > { %201 = vst [vmem:[%s3485_s30 + $0x180] sm:$0xff] %v200_v48  ;;  %203 = vst [vmem:[%s3485_s30 + $0x188] sm:$0xff] %v202_v49  ;;  %v206_v51 = vld [vmem:[%s3480_s29 + $0x2d8] sm:$0xff]  ;;  %v208_v52 = vld [vmem:[%s3480_s29 + $0x2e0] sm:$0xff] }
  0x3b   : > { %205 = vst [vmem:[%s3485_s30 + $0x190] sm:$0xff] %v204_v50  ;;  %v210_v53 = vld [vmem:[%s3480_s29 + $0x2e8] sm:$0xff]  ;;  %207 = vst [vmem:[%s3485_s30 + $0x198] sm:$0xff] %v206_v51  ;;  %v212_v54 = vld [vmem:[%s3480_s29 + $0x2f0] sm:$0xff] }
  0x3c   : > { %209 = vst [vmem:[%s3485_s30 + $0x1a0] sm:$0xff] %v208_v52  ;;  %211 = vst [vmem:[%s3485_s30 + $0x1a8] sm:$0xff] %v210_v53  ;;  %v214_v55 = vld [vmem:[%s3480_s29 + $0x2f8] sm:$0xff]  ;;  %v216_v56 = vld [vmem:[%s3480_s29 + $0x300] sm:$0xff] }
  0x3d   : > { %213 = vst [vmem:[%s3485_s30 + $0x1b0] sm:$0xff] %v212_v54  ;;  %215 = vst [vmem:[%s3485_s30 + $0x1b8] sm:$0xff] %v214_v55  ;;  %v218_v57 = vld [vmem:[%s3480_s29 + $0x308] sm:$0xff]  ;;  %v220_v58 = vld [vmem:[%s3480_s29 + $0x310] sm:$0xff] }
  0x3e   : > { %217 = vst [vmem:[%s3485_s30 + $0x1c0] sm:$0xff] %v216_v56  ;;  %v222_v59 = vld [vmem:[%s3480_s29 + $0x318] sm:$0xff]  ;;  %219 = vst [vmem:[%s3485_s30 + $0x1c8] sm:$0xff] %v218_v57  ;;  %v224_v60 = vld [vmem:[%s3480_s29 + $0x320] sm:$0xff] }
  0x3f   : > { %221 = vst [vmem:[%s3485_s30 + $0x1d0] sm:$0xff] %v220_v58  ;;  %223 = vst [vmem:[%s3485_s30 + $0x1d8] sm:$0xff] %v222_v59  ;;  %v226_v61 = vld [vmem:[%s3480_s29 + $0x328] sm:$0xff]  ;;  %v228_v62 = vld [vmem:[%s3480_s29 + $0x330] sm:$0xff] }
  0x40   : > { %225 = vst [vmem:[%s3485_s30 + $0x1e0] sm:$0xff] %v224_v60  ;;  %227 = vst [vmem:[%s3485_s30 + $0x1e8] sm:$0xff] %v226_v61  ;;  %v230_v63 = vld [vmem:[%s3480_s29 + $0x338] sm:$0xff]  ;;  %v232_v0 = vld [vmem:[%s3480_s29 + $0x340] sm:$0xff] }
  0x41   : > { %229 = vst [vmem:[%s3485_s30 + $0x1f0] sm:$0xff] %v228_v62  ;;  %v234_v1 = vld [vmem:[%s3480_s29 + $0x348] sm:$0xff]  ;;  %231 = vst [vmem:[%s3485_s30 + $0x1f8] sm:$0xff] %v230_v63  ;;  %v236_v2 = vld [vmem:[%s3480_s29 + $0x350] sm:$0xff] }
  0x42   : > { %233 = vst [vmem:[%s3485_s30 + $0x200] sm:$0xff] %v232_v0  ;;  %235 = vst [vmem:[%s3485_s30 + $0x208] sm:$0xff] %v234_v1  ;;  %v238_v3 = vld [vmem:[%s3480_s29 + $0x358] sm:$0xff]  ;;  %v240_v4 = vld [vmem:[%s3480_s29 + $0x360] sm:$0xff] }
  0x43   : > { %237 = vst [vmem:[%s3485_s30 + $0x210] sm:$0xff] %v236_v2  ;;  %239 = vst [vmem:[%s3485_s30 + $0x218] sm:$0xff] %v238_v3  ;;  %v242_v5 = vld [vmem:[%s3480_s29 + $0x368] sm:$0xff]  ;;  %v244_v6 = vld [vmem:[%s3480_s29 + $0x370] sm:$0xff] }
  0x44   : > { %241 = vst [vmem:[%s3485_s30 + $0x220] sm:$0xff] %v240_v4  ;;  %v246_v7 = vld [vmem:[%s3480_s29 + $0x378] sm:$0xff]  ;;  %243 = vst [vmem:[%s3485_s30 + $0x228] sm:$0xff] %v242_v5  ;;  %v248_v8 = vld [vmem:[%s3480_s29 + $0x380] sm:$0xff] }
  0x45   : > { %245 = vst [vmem:[%s3485_s30 + $0x230] sm:$0xff] %v244_v6  ;;  %247 = vst [vmem:[%s3485_s30 + $0x238] sm:$0xff] %v246_v7  ;;  %v250_v9 = vld [vmem:[%s3480_s29 + $0x388] sm:$0xff]  ;;  %v252_v10 = vld [vmem:[%s3480_s29 + $0x390] sm:$0xff] }
  0x46   : > { %249 = vst [vmem:[%s3485_s30 + $0x240] sm:$0xff] %v248_v8  ;;  %251 = vst [vmem:[%s3485_s30 + $0x248] sm:$0xff] %v250_v9  ;;  %v254_v11 = vld [vmem:[%s3480_s29 + $0x398] sm:$0xff]  ;;  %v256_v12 = vld [vmem:[%s3480_s29 + $0x3a0] sm:$0xff] }
  0x47   : > { %253 = vst [vmem:[%s3485_s30 + $0x250] sm:$0xff] %v252_v10  ;;  %v258_v13 = vld [vmem:[%s3480_s29 + $0x3a8] sm:$0xff]  ;;  %255 = vst [vmem:[%s3485_s30 + $0x258] sm:$0xff] %v254_v11  ;;  %v260_v14 = vld [vmem:[%s3480_s29 + $0x3b0] sm:$0xff] }
  0x48   : > { %257 = vst [vmem:[%s3485_s30 + $0x260] sm:$0xff] %v256_v12  ;;  %259 = vst [vmem:[%s3485_s30 + $0x268] sm:$0xff] %v258_v13  ;;  %v262_v15 = vld [vmem:[%s3480_s29 + $0x3b8] sm:$0xff]  ;;  %v264_v16 = vld [vmem:[%s3480_s29 + $0x500] sm:$0xff] }
  0x49   : > { %261 = vst [vmem:[%s3485_s30 + $0x270] sm:$0xff] %v260_v14  ;;  %263 = vst [vmem:[%s3485_s30 + $0x278] sm:$0xff] %v262_v15  ;;  %v266_v17 = vld [vmem:[%s3480_s29 + $0x508] sm:$0xff]  ;;  %v268_v18 = vld [vmem:[%s3480_s29 + $0x510] sm:$0xff] }
  0x4a   : > { %265 = vst [vmem:[%s3485_s30 + $0x280] sm:$0xff] %v264_v16  ;;  %v270_v19 = vld [vmem:[%s3480_s29 + $0x518] sm:$0xff]  ;;  %267 = vst [vmem:[%s3485_s30 + $0x288] sm:$0xff] %v266_v17  ;;  %v272_v20 = vld [vmem:[%s3480_s29 + $0x520] sm:$0xff] }
  0x4b   : > { %269 = vst [vmem:[%s3485_s30 + $0x290] sm:$0xff] %v268_v18  ;;  %271 = vst [vmem:[%s3485_s30 + $0x298] sm:$0xff] %v270_v19  ;;  %v274_v21 = vld [vmem:[%s3480_s29 + $0x528] sm:$0xff]  ;;  %v276_v22 = vld [vmem:[%s3480_s29 + $0x530] sm:$0xff] }
  0x4c   : > { %273 = vst [vmem:[%s3485_s30 + $0x2a0] sm:$0xff] %v272_v20  ;;  %275 = vst [vmem:[%s3485_s30 + $0x2a8] sm:$0xff] %v274_v21  ;;  %v278_v23 = vld [vmem:[%s3480_s29 + $0x538] sm:$0xff]  ;;  %v280_v24 = vld [vmem:[%s3480_s29 + $0x540] sm:$0xff] }
  0x4d   : > { %277 = vst [vmem:[%s3485_s30 + $0x2b0] sm:$0xff] %v276_v22  ;;  %v282_v25 = vld [vmem:[%s3480_s29 + $0x548] sm:$0xff]  ;;  %279 = vst [vmem:[%s3485_s30 + $0x2b8] sm:$0xff] %v278_v23  ;;  %v284_v26 = vld [vmem:[%s3480_s29 + $0x550] sm:$0xff] }
  0x4e   : > { %281 = vst [vmem:[%s3485_s30 + $0x2c0] sm:$0xff] %v280_v24  ;;  %283 = vst [vmem:[%s3485_s30 + $0x2c8] sm:$0xff] %v282_v25  ;;  %v286_v27 = vld [vmem:[%s3480_s29 + $0x558] sm:$0xff]  ;;  %v288_v28 = vld [vmem:[%s3480_s29 + $0x560] sm:$0xff] }
  0x4f   : > { %285 = vst [vmem:[%s3485_s30 + $0x2d0] sm:$0xff] %v284_v26  ;;  %287 = vst [vmem:[%s3485_s30 + $0x2d8] sm:$0xff] %v286_v27  ;;  %v290_v29 = vld [vmem:[%s3480_s29 + $0x568] sm:$0xff]  ;;  %v292_v30 = vld [vmem:[%s3480_s29 + $0x570] sm:$0xff] }
  0x50   : > { %289 = vst [vmem:[%s3485_s30 + $0x2e0] sm:$0xff] %v288_v28  ;;  %v294_v31 = vld [vmem:[%s3480_s29 + $0x578] sm:$0xff]  ;;  %291 = vst [vmem:[%s3485_s30 + $0x2e8] sm:$0xff] %v290_v29  ;;  %v296_v32 = vld [vmem:[%s3480_s29 + $0x580] sm:$0xff] }
  0x51   : > { %293 = vst [vmem:[%s3485_s30 + $0x2f0] sm:$0xff] %v292_v30  ;;  %295 = vst [vmem:[%s3485_s30 + $0x2f8] sm:$0xff] %v294_v31  ;;  %v298_v33 = vld [vmem:[%s3480_s29 + $0x588] sm:$0xff]  ;;  %v300_v34 = vld [vmem:[%s3480_s29 + $0x590] sm:$0xff] }
  0x52   : > { %297 = vst [vmem:[%s3485_s30 + $0x300] sm:$0xff] %v296_v32  ;;  %299 = vst [vmem:[%s3485_s30 + $0x308] sm:$0xff] %v298_v33  ;;  %v302_v35 = vld [vmem:[%s3480_s29 + $0x598] sm:$0xff]  ;;  %v304_v36 = vld [vmem:[%s3480_s29 + $0x5a0] sm:$0xff] }
  0x53   : > { %301 = vst [vmem:[%s3485_s30 + $0x310] sm:$0xff] %v300_v34  ;;  %v306_v37 = vld [vmem:[%s3480_s29 + $0x5a8] sm:$0xff]  ;;  %303 = vst [vmem:[%s3485_s30 + $0x318] sm:$0xff] %v302_v35  ;;  %v308_v38 = vld [vmem:[%s3480_s29 + $0x5b0] sm:$0xff] }
  0x54   : > { %305 = vst [vmem:[%s3485_s30 + $0x320] sm:$0xff] %v304_v36  ;;  %307 = vst [vmem:[%s3485_s30 + $0x328] sm:$0xff] %v306_v37  ;;  %v310_v39 = vld [vmem:[%s3480_s29 + $0x5b8] sm:$0xff]  ;;  %v312_v40 = vld [vmem:[%s3480_s29 + $0x5c0] sm:$0xff] }
  0x55   : > { %309 = vst [vmem:[%s3485_s30 + $0x330] sm:$0xff] %v308_v38  ;;  %311 = vst [vmem:[%s3485_s30 + $0x338] sm:$0xff] %v310_v39  ;;  %v314_v41 = vld [vmem:[%s3480_s29 + $0x5c8] sm:$0xff]  ;;  %v316_v42 = vld [vmem:[%s3480_s29 + $0x5d0] sm:$0xff] }
  0x56   : > { %313 = vst [vmem:[%s3485_s30 + $0x340] sm:$0xff] %v312_v40  ;;  %v318_v43 = vld [vmem:[%s3480_s29 + $0x5d8] sm:$0xff]  ;;  %315 = vst [vmem:[%s3485_s30 + $0x348] sm:$0xff] %v314_v41  ;;  %v320_v44 = vld [vmem:[%s3480_s29 + $0x5e0] sm:$0xff] }
  0x57   : > { %317 = vst [vmem:[%s3485_s30 + $0x350] sm:$0xff] %v316_v42  ;;  %319 = vst [vmem:[%s3485_s30 + $0x358] sm:$0xff] %v318_v43  ;;  %v322_v45 = vld [vmem:[%s3480_s29 + $0x5e8] sm:$0xff]  ;;  %v324_v46 = vld [vmem:[%s3480_s29 + $0x5f0] sm:$0xff] }
  0x58   : > { %321 = vst [vmem:[%s3485_s30 + $0x360] sm:$0xff] %v320_v44  ;;  %323 = vst [vmem:[%s3485_s30 + $0x368] sm:$0xff] %v322_v45  ;;  %v326_v47 = vld [vmem:[%s3480_s29 + $0x5f8] sm:$0xff]  ;;  %v328_v48 = vld [vmem:[%s3480_s29 + $0x600] sm:$0xff] }
  0x59   : > { %325 = vst [vmem:[%s3485_s30 + $0x370] sm:$0xff] %v324_v46  ;;  %v330_v49 = vld [vmem:[%s3480_s29 + $0x608] sm:$0xff]  ;;  %327 = vst [vmem:[%s3485_s30 + $0x378] sm:$0xff] %v326_v47  ;;  %v332_v50 = vld [vmem:[%s3480_s29 + $0x610] sm:$0xff] }
  0x5a   : > { %329 = vst [vmem:[%s3485_s30 + $0x380] sm:$0xff] %v328_v48  ;;  %331 = vst [vmem:[%s3485_s30 + $0x388] sm:$0xff] %v330_v49  ;;  %v334_v51 = vld [vmem:[%s3480_s29 + $0x618] sm:$0xff]  ;;  %v336_v52 = vld [vmem:[%s3480_s29 + $0x620] sm:$0xff] }
  0x5b   : > { %333 = vst [vmem:[%s3485_s30 + $0x390] sm:$0xff] %v332_v50  ;;  %335 = vst [vmem:[%s3485_s30 + $0x398] sm:$0xff] %v334_v51  ;;  %v338_v53 = vld [vmem:[%s3480_s29 + $0x628] sm:$0xff]  ;;  %v340_v54 = vld [vmem:[%s3480_s29 + $0x630] sm:$0xff] }
  0x5c   : > { %337 = vst [vmem:[%s3485_s30 + $0x3a0] sm:$0xff] %v336_v52  ;;  %v342_v55 = vld [vmem:[%s3480_s29 + $0x638] sm:$0xff]  ;;  %339 = vst [vmem:[%s3485_s30 + $0x3a8] sm:$0xff] %v338_v53  ;;  %v344_v56 = vld [vmem:[%s3480_s29 + $0x780] sm:$0xff] }
  0x5d   : > { %341 = vst [vmem:[%s3485_s30 + $0x3b0] sm:$0xff] %v340_v54  ;;  %343 = vst [vmem:[%s3485_s30 + $0x3b8] sm:$0xff] %v342_v55  ;;  %v346_v57 = vld [vmem:[%s3480_s29 + $0x788] sm:$0xff]  ;;  %v348_v58 = vld [vmem:[%s3480_s29 + $0x790] sm:$0xff] }
  0x5e   : > { %345 = vst [vmem:[%s3485_s30 + $0x3c0] sm:$0xff] %v344_v56  ;;  %347 = vst [vmem:[%s3485_s30 + $0x3c8] sm:$0xff] %v346_v57  ;;  %v350_v59 = vld [vmem:[%s3480_s29 + $0x798] sm:$0xff]  ;;  %v352_v60 = vld [vmem:[%s3480_s29 + $0x7a0] sm:$0xff] }
  0x5f   : > { %349 = vst [vmem:[%s3485_s30 + $0x3d0] sm:$0xff] %v348_v58  ;;  %v354_v61 = vld [vmem:[%s3480_s29 + $0x7a8] sm:$0xff]  ;;  %351 = vst [vmem:[%s3485_s30 + $0x3d8] sm:$0xff] %v350_v59  ;;  %v356_v62 = vld [vmem:[%s3480_s29 + $0x7b0] sm:$0xff] }
  0x60   : > { %353 = vst [vmem:[%s3485_s30 + $0x3e0] sm:$0xff] %v352_v60  ;;  %355 = vst [vmem:[%s3485_s30 + $0x3e8] sm:$0xff] %v354_v61  ;;  %v358_v63 = vld [vmem:[%s3480_s29 + $0x7b8] sm:$0xff]  ;;  %v360_v0 = vld [vmem:[%s3480_s29 + $0x7c0] sm:$0xff] }
  0x61   : > { %357 = vst [vmem:[%s3485_s30 + $0x3f0] sm:$0xff] %v356_v62  ;;  %359 = vst [vmem:[%s3485_s30 + $0x3f8] sm:$0xff] %v358_v63  ;;  %v362_v1 = vld [vmem:[%s3480_s29 + $0x7c8] sm:$0xff]  ;;  %v364_v2 = vld [vmem:[%s3480_s29 + $0x7d0] sm:$0xff] }
  0x62   : > { %361 = vst [vmem:[%s3485_s30 + $0x400] sm:$0xff] %v360_v0  ;;  %v366_v3 = vld [vmem:[%s3480_s29 + $0x7d8] sm:$0xff]  ;;  %363 = vst [vmem:[%s3485_s30 + $0x408] sm:$0xff] %v362_v1  ;;  %v368_v4 = vld [vmem:[%s3480_s29 + $0x7e0] sm:$0xff] }
  0x63   : > { %365 = vst [vmem:[%s3485_s30 + $0x410] sm:$0xff] %v364_v2  ;;  %367 = vst [vmem:[%s3485_s30 + $0x418] sm:$0xff] %v366_v3  ;;  %v370_v5 = vld [vmem:[%s3480_s29 + $0x7e8] sm:$0xff]  ;;  %v372_v6 = vld [vmem:[%s3480_s29 + $0x7f0] sm:$0xff] }
  0x64   : > { %369 = vst [vmem:[%s3485_s30 + $0x420] sm:$0xff] %v368_v4  ;;  %371 = vst [vmem:[%s3485_s30 + $0x428] sm:$0xff] %v370_v5  ;;  %v374_v7 = vld [vmem:[%s3480_s29 + $0x7f8] sm:$0xff]  ;;  %v376_v8 = vld [vmem:[%s3480_s29 + $0x800] sm:$0xff] }
  0x65   : > { %373 = vst [vmem:[%s3485_s30 + $0x430] sm:$0xff] %v372_v6  ;;  %v378_v9 = vld [vmem:[%s3480_s29 + $0x808] sm:$0xff]  ;;  %375 = vst [vmem:[%s3485_s30 + $0x438] sm:$0xff] %v374_v7  ;;  %v380_v10 = vld [vmem:[%s3480_s29 + $0x810] sm:$0xff] }
  0x66   : > { %377 = vst [vmem:[%s3485_s30 + $0x440] sm:$0xff] %v376_v8  ;;  %379 = vst [vmem:[%s3485_s30 + $0x448] sm:$0xff] %v378_v9  ;;  %v382_v11 = vld [vmem:[%s3480_s29 + $0x818] sm:$0xff]  ;;  %v384_v12 = vld [vmem:[%s3480_s29 + $0x820] sm:$0xff] }
  0x67   : > { %381 = vst [vmem:[%s3485_s30 + $0x450] sm:$0xff] %v380_v10  ;;  %383 = vst [vmem:[%s3485_s30 + $0x458] sm:$0xff] %v382_v11  ;;  %v386_v13 = vld [vmem:[%s3480_s29 + $0x828] sm:$0xff]  ;;  %v388_v14 = vld [vmem:[%s3480_s29 + $0x830] sm:$0xff] }
  0x68   : > { %385 = vst [vmem:[%s3485_s30 + $0x460] sm:$0xff] %v384_v12  ;;  %v390_v15 = vld [vmem:[%s3480_s29 + $0x838] sm:$0xff]  ;;  %387 = vst [vmem:[%s3485_s30 + $0x468] sm:$0xff] %v386_v13  ;;  %v392_v16 = vld [vmem:[%s3480_s29 + $0x840] sm:$0xff] }
  0x69   : > { %389 = vst [vmem:[%s3485_s30 + $0x470] sm:$0xff] %v388_v14  ;;  %391 = vst [vmem:[%s3485_s30 + $0x478] sm:$0xff] %v390_v15  ;;  %v394_v17 = vld [vmem:[%s3480_s29 + $0x848] sm:$0xff]  ;;  %v396_v18 = vld [vmem:[%s3480_s29 + $0x850] sm:$0xff] }
  0x6a   : > { %393 = vst [vmem:[%s3485_s30 + $0x480] sm:$0xff] %v392_v16  ;;  %395 = vst [vmem:[%s3485_s30 + $0x488] sm:$0xff] %v394_v17  ;;  %v398_v19 = vld [vmem:[%s3480_s29 + $0x858] sm:$0xff]  ;;  %v400_v20 = vld [vmem:[%s3480_s29 + $0x860] sm:$0xff] }
  0x6b   : > { %397 = vst [vmem:[%s3485_s30 + $0x490] sm:$0xff] %v396_v18  ;;  %v402_v21 = vld [vmem:[%s3480_s29 + $0x868] sm:$0xff]  ;;  %399 = vst [vmem:[%s3485_s30 + $0x498] sm:$0xff] %v398_v19  ;;  %v404_v22 = vld [vmem:[%s3480_s29 + $0x870] sm:$0xff] }
  0x6c   : > { %401 = vst [vmem:[%s3485_s30 + $0x4a0] sm:$0xff] %v400_v20  ;;  %403 = vst [vmem:[%s3485_s30 + $0x4a8] sm:$0xff] %v402_v21  ;;  %v406_v23 = vld [vmem:[%s3480_s29 + $0x878] sm:$0xff]  ;;  %v408_v24 = vld [vmem:[%s3480_s29 + $0x880] sm:$0xff] }
  0x6d   : > { %405 = vst [vmem:[%s3485_s30 + $0x4b0] sm:$0xff] %v404_v22  ;;  %407 = vst [vmem:[%s3485_s30 + $0x4b8] sm:$0xff] %v406_v23  ;;  %v410_v25 = vld [vmem:[%s3480_s29 + $0x888] sm:$0xff]  ;;  %v412_v26 = vld [vmem:[%s3480_s29 + $0x890] sm:$0xff] }
  0x6e   : > { %409 = vst [vmem:[%s3485_s30 + $0x4c0] sm:$0xff] %v408_v24  ;;  %v414_v27 = vld [vmem:[%s3480_s29 + $0x898] sm:$0xff]  ;;  %411 = vst [vmem:[%s3485_s30 + $0x4c8] sm:$0xff] %v410_v25  ;;  %v416_v28 = vld [vmem:[%s3480_s29 + $0x8a0] sm:$0xff] }
  0x6f   : > { %413 = vst [vmem:[%s3485_s30 + $0x4d0] sm:$0xff] %v412_v26  ;;  %415 = vst [vmem:[%s3485_s30 + $0x4d8] sm:$0xff] %v414_v27  ;;  %v418_v29 = vld [vmem:[%s3480_s29 + $0x8a8] sm:$0xff]  ;;  %v420_v30 = vld [vmem:[%s3480_s29 + $0x8b0] sm:$0xff] }
  0x70   : > { %417 = vst [vmem:[%s3485_s30 + $0x4e0] sm:$0xff] %v416_v28  ;;  %419 = vst [vmem:[%s3485_s30 + $0x4e8] sm:$0xff] %v418_v29  ;;  %v422_v31 = vld [vmem:[%s3480_s29 + $0x8b8] sm:$0xff] }
  0x71   : > { %421 = vst [vmem:[%s3485_s30 + $0x4f0] sm:$0xff] %v420_v30  ;;  %423 = vst [vmem:[%s3485_s30 + $0x4f8] sm:$0xff] %v422_v31 }
  0x72 PF: > { %p3258_p10 = scmp.ge.s32.totalorder %s3415_s19, 1  ;;  %p428_p11 = scmp.lt.s32.totalorder %s3415_s19, 3 }
  0x74   : > { %p429_p12 = pnand %p3258_p10, %p428_p11 }
  0x75   : > { %s435_s4 = sand.u32 (!%p429_p12), 1, %s3407_s17   ;;  %p3259_p13 = scmp.ne.s32.totalorder (!%p429_p12), %s3460_s0, 0 }
  0x76   : > { %432 = sbr.rel (%p429_p12) target bundleno = 5505 (0x1581), region = 43 }
  0x77   : > { %s3295_s5 = smul.u32 (!%p429_p12), 1280, %s435_s4 }
  0x79   : > { %s3807_s6 = scalar_lea.vmem (!%p429_p12), [#allocation8], %s3295_s5 }
  0x7d   : > { %453 = sbr.rel (%p3259_p13) target bundleno = 329 (0x149), region = 51  ;;  %s454_s7 = sld [smem:[#allocation7]] (!%p3259_p13) }
  0x7e   : > { %s3260_s8 = sld [smem:[#allocation7 + $0x1]] (!%p3259_p13)  ;;  %s3261_s9 = sld [smem:[#allocation7 + $0x2]] (!%p3259_p13) }
  0x7f   : > { %s3262_s10 = sld [smem:[#allocation7 + $0x3]] (!%p3259_p13)  ;;  %s3263_s11 = sld [smem:[#allocation7 + $0x4]] (!%p3259_p13) }
  0x80   : > { %s3264_s12 = sld [smem:[#allocation7 + $0x5]] (!%p3259_p13)  ;;  %s3265_s13 = sld [smem:[#allocation7 + $0x6]] (!%p3259_p13) }
  0x81   : > { %s3810_s14 = sld [smem:[#allocation7 + $0x7]] (!%p3259_p13) }
  0x83   : > { %s462_s19 = scalar_lea.vmem (!%p3259_p13), %s5201_s1, %s454_s7 }
  0x84   : > { %v480_v32 = vld [vmem:[%s462_s19] sm:$0x1] }
  0x85   : > { %481 = vst [vmem:[#allocation2] sm:$0x1] %v480_v32 }
  0x86   : > { %506 = vsyncadd [#allocation3], 16  ;;  %s507_s22 = scalar_lea.vmem %s5201_s1, %s3260_s8 }
  0x87   : > { %v527_v33 = vld [vmem:[%s507_s22] sm:$0x1] }
  0x88   : > { %528 = vst [vmem:[#allocation2 + $0x1] sm:$0x1] %v527_v33 }
  0x89   : > { %553 = vsyncadd [#allocation3 + $0x1], 16  ;;  %s554_s26 = scalar_lea.vmem %s5201_s1, %s3261_s9 }
  0x8a   : > { %v574_v34 = vld [vmem:[%s554_s26] sm:$0x1] }
  0x8b   : > { %575 = vst [vmem:[#allocation2 + $0x2] sm:$0x1] %v574_v34 }
  0x8c   : > { %600 = vsyncadd [#allocation3 + $0x2], 16  ;;  %s601_s29 = scalar_lea.vmem %s5201_s1, %s3262_s10 }
  0x8d   : > { %v621_v35 = vld [vmem:[%s601_s29] sm:$0x1] }
  0x8e   : > { %622 = vst [vmem:[#allocation2 + $0x3] sm:$0x1] %v621_v35 }
  0x8f   : > { %647 = vsyncadd [#allocation3 + $0x3], 16  ;;  %s648_s5 = scalar_lea.vmem %s5201_s1, %s3263_s11 }
  0x90   : > { %v668_v36 = vld [vmem:[%s648_s5] sm:$0x1] }
  0x91   : > { %669 = vst [vmem:[#allocation2 + $0x4] sm:$0x1] %v668_v36 }
  0x92   : > { %694 = vsyncadd [#allocation3 + $0x4], 16  ;;  %s695_s9 = scalar_lea.vmem %s5201_s1, %s3264_s12 }
  0x93   : > { %v715_v37 = vld [vmem:[%s695_s9] sm:$0x1] }
  0x94   : > { %716 = vst [vmem:[#allocation2 + $0x5] sm:$0x1] %v715_v37 }
  0x95   : > { %741 = vsyncadd [#allocation3 + $0x5], 16  ;;  %s742_s10 = scalar_lea.vmem %s5201_s1, %s3265_s13 }
  0x96   : > { %v762_v38 = vld [vmem:[%s742_s10] sm:$0x1] }
  0x97   : > { %763 = vst [vmem:[#allocation2 + $0x6] sm:$0x1] %v762_v38 }
  0x98   : > { %788 = vsyncadd [#allocation3 + $0x6], 16  ;;  %s789_s17 = scalar_lea.vmem %s5201_s1, %s3810_s14 }
  0x99   : > { %v809_v39 = vld [vmem:[%s789_s17] sm:$0x1] }
  0x9a   : > { %810 = vst [vmem:[#allocation2 + $0x7] sm:$0x1] %v809_v39 }
  0x9b   : > { %835 = vsyncadd [#allocation3 + $0x7], 16 }
  0x9c   : > { %3385 = dma.done.wait [#allocation3], 16 }
  0x9d   : > { %3386 = vsyncadd [#allocation3], 4294967280 }
  0x9e   : > { %3387 = dma.done.wait [#allocation3 + $0x1], 16 }
  0x9f   : > { %3388 = vsyncadd [#allocation3 + $0x1], 4294967280 }
  0xa0   : > { %3389 = dma.done.wait [#allocation3 + $0x2], 16 }
  0xa1   : > { %3390 = vsyncadd [#allocation3 + $0x2], 4294967280 }
  0xa2   : > { %3391 = dma.done.wait [#allocation3 + $0x3], 16 }
  0xa3   : > { %3392 = vsyncadd [#allocation3 + $0x3], 4294967280 }
  0xa4   : > { %3393 = dma.done.wait [#allocation3 + $0x4], 16 }
  0xa5   : > { %3394 = vsyncadd [#allocation3 + $0x4], 4294967280 }
  0xa6   : > { %3395 = dma.done.wait [#allocation3 + $0x5], 16 }
  0xa7   : > { %3396 = vsyncadd [#allocation3 + $0x5], 4294967280 }
  0xa8   : > { %3397 = dma.done.wait [#allocation3 + $0x6], 16 }
  0xa9   : > { %3398 = vsyncadd [#allocation3 + $0x6], 4294967280 }
  0xaa   : > { %3399 = dma.done.wait [#allocation3 + $0x7], 16 }
  0xab   : > { %3400 = vsyncadd [#allocation3 + $0x7], 4294967280  ;;  %vm854_vm0 = vcmask 261120   ;;  %v853_v40 = vld [vmem:[#allocation2] sm:$0xff]  ;;  %vm895_vm1 = vcmask 7168  }
  0xac   : > { %v855_v41 = vsel %vm854_vm0, %v853_v40, 0.0 }
  0xad   : > { %v856_v42 = vrot.slane %v855_v41, 4 }
  0xaf   : > { %v857_v43 = vadd.f32 %v856_v42, %v855_v41 }
  0xb1   : > { %v858_v44 = vrot.slane %v857_v43, 2 }
  0xb3   : > { %v859_v45 = vadd.f32 %v858_v44, %v857_v43 }
  0xb5   : > { %v860_v46 = vrot.slane %v859_v45, 1 }
  0xb7   : > { %v861_v47 = vadd.f32 %v860_v46, %v859_v45 }
  0xb9   : > { %v862_v48 = vmul.f32 0.125, %v861_v47 }
  0xbb   : > { %863 = vxpose.xlu0.b32.start.end [1/1] (short) (narrow) %v862_v48, 32 }
 0x13b   : > { %v879_v49 = vpop.trf.xlu0 }
 0x13c   : > { %896 = vst.msk [vmem:[#allocation4] sm:$0xff] %vm895_vm1, %v879_v49 }
 0x13f   : > { %v880_v50 = vpop.trf.xlu0 }
 0x140   : > { %897 = vst.msk [vmem:[#allocation4 + $0x8] sm:$0xff] %vm895_vm1, %v880_v50 }
 0x143   : > { %v881_v51 = vpop.trf.xlu0 }
 0x144   : > { %898 = vst.msk [vmem:[#allocation4 + $0x10] sm:$0xff] %vm895_vm1, %v881_v51 }
 0x147   : > { %v882_v52 = vpop.trf.xlu0 }
 0x148   : > { %899 = vst.msk [vmem:[#allocation4 + $0x18] sm:$0xff] %vm895_vm1, %v882_v52 }
 0x149 PF: > { %v900_v54 = vld [vmem:[#allocation4] sm:$0xff]  ;;  %v3418_v55 = vmov 0   ;;  %v901_v57 = vld [vmem:[#allocation4 + $0x8] sm:$0xff]  ;;  %v3419_v58 = vmov 1966171168   ;;  %v5204_v60 = vlaneseq  ;;  %v924_v61 = vld [vmem:[%s3807_s6] sm:$0xff] }
 0x14a   : > { %3332 = vset.pattern.permute.xlu1 %v3418_v55  ;;  %3331 = vset.pattern.permute.xlu0 %v3418_v55  ;;  %v1110_v59 = vunpack.c.l.s4 %v3419_v58  ;;  %v925_v62 = vld [vmem:[%s3807_s6 + $0x8] sm:$0xff]  ;;  %v926_v63 = vld [vmem:[%s3807_s6 + $0x10] sm:$0xff]  ;;  %v927_v0 = vld [vmem:[%s3807_s6 + $0x18] sm:$0xff]  ;;  %s3940_s12 = sshll.u32 %s3460_s0, 2  ;;  %p3280_p0 = scmp.ne.s32.totalorder %s3460_s0, 1 }
 0x14b   : > { %v902_v53 = vld [vmem:[#allocation4 + $0x10] sm:$0xff]  ;;  %906 = vperm.xlu0 %3331, %v900_v54   ;;  %v3842_v2 = vshrl.u32 %v5204_v60, 7  ;;  %v929_v4 = vld [vmem:[%s3807_s6 + $0x28] sm:$0xff]  ;;  %v930_v5 = vld [vmem:[%s3807_s6 + $0x30] sm:$0xff]  ;;  %s1171_s13 = sshra.s32 %s3940_s12, 3  ;;  %s1174_s21 = sand.u32 7, %s3940_s12 }
 0x14c   : > { %916 = vperm.xlu1 %3332, %v902_v53   ;;  %v1111_v1 = vunpack.c.0.s8 %v1110_v59  ;;  %v928_v3 = vld [vmem:[%s3807_s6 + $0x20] sm:$0xff]  ;;  %v931_v6 = vld [vmem:[%s3807_s6 + $0x38] sm:$0xff]  ;;  %v933_v8 = vld [vmem:[%s3807_s6 + $0x48] sm:$0xff]  ;;  %s3268_s14 = smul.u32 80, %s1171_s13  ;;  %s1361_s25 = sadd.s32 1, %s3940_s12 }
 0x14d   : > { %v932_v7 = vld [vmem:[%s3807_s6 + $0x40] sm:$0xff]  ;;  %v935_v12 = vld [vmem:[%s3807_s6 + $0x148] sm:$0xff]  ;;  %v936_v14 = vld [vmem:[%s3807_s6 + $0x150] sm:$0xff]  ;;  %s4113_s26 = sshra.s32 %s1361_s25, 3  ;;  %s1441_s28 = sand.u32 7, %s1361_s25 }
 0x14e   : > { %v934_v11 = vld [vmem:[%s3807_s6 + $0x140] sm:$0xff]  ;;  %v937_v15 = vld [vmem:[%s3807_s6 + $0x158] sm:$0xff]  ;;  %v939_v17 = vld [vmem:[%s3807_s6 + $0x168] sm:$0xff]  ;;  %v3867_v23 = vsub.s32 %v1111_v1, %v3842_v2  ;;  %s1177_s22 = sadd.s32 %s3268_s14, %s1174_s21  ;;  %s3271_s27 = smul.u32 80, %s4113_s26 }
 0x14f   : > { %v903_v56 = vld [vmem:[#allocation4 + $0x18] sm:$0xff]  ;;  %911 = vperm.xlu0 %3331, %v901_v57   ;;  %v944_v13 = vld [vmem:[%s3807_s6 + $0x280] sm:$0xff]  ;;  %v946_v19 = vld [vmem:[%s3807_s6 + $0x290] sm:$0xff]  ;;  %s4024_s24 = scalar_lea.vmem [#allocation5], %s1177_s22  ;;  %s1624_s4 = sadd.s32 2, %s3940_s12 }
 0x150   : > { %921 = vperm.xlu1 %3332, %v903_v56   ;;  %v938_v16 = vld [vmem:[%s3807_s6 + $0x160] sm:$0xff]  ;;  %v945_v18 = vld [vmem:[%s3807_s6 + $0x288] sm:$0xff]  ;;  %v947_v20 = vld [vmem:[%s3807_s6 + $0x298] sm:$0xff]  ;;  %s4172_s29 = sadd.s32 %s3271_s27, %s1441_s28  ;;  %s4263_s5 = sshra.s32 %s1624_s4, 3 }
 0x151   : > { %v940_v24 = vld [vmem:[%s3807_s6 + $0x170] sm:$0xff]  ;;  %v948_v25 = vld [vmem:[%s3807_s6 + $0x2a0] sm:$0xff]  ;;  %v949_v26 = vld [vmem:[%s3807_s6 + $0x2a8] sm:$0xff]  ;;  %s4217_s30 = scalar_lea.vmem [#allocation5], %s4172_s29  ;;  %s3274_s7 = smul.u32 80, %s4263_s5 }
 0x152   : > { %v941_v31 = vld [vmem:[%s3807_s6 + $0x178] sm:$0xff]  ;;  %v942_v32 = vld [vmem:[%s3807_s6 + $0x180] sm:$0xff]  ;;  %v943_v33 = vld [vmem:[%s3807_s6 + $0x188] sm:$0xff]  ;;  %s1704_s8 = sand.u32 7, %s1624_s4  ;;  %s1887_s16 = sadd.s32 3, %s3940_s12 }
 0x153   : > { %v950_v39 = vld [vmem:[%s3807_s6 + $0x2b0] sm:$0xff]  ;;  %v951_v40 = vld [vmem:[%s3807_s6 + $0x2b8] sm:$0xff]  ;;  %v952_v41 = vld [vmem:[%s3807_s6 + $0x2c0] sm:$0xff]  ;;  %s4321_s9 = sadd.s32 %s3274_s7, %s1704_s8  ;;  %s1967_s19 = sand.u32 7, %s1887_s16 }
 0x154   : > { %v953_v46 = vld [vmem:[%s3807_s6 + $0x2c8] sm:$0xff]  ;;  %v954_v47 = vld [vmem:[%s3807_s6 + $0x3c0] sm:$0xff]  ;;  %v956_v54 = vld [vmem:[%s3807_s6 + $0x3d0] sm:$0xff]  ;;  %s4365_s15 = scalar_lea.vmem [#allocation5], %s4321_s9 }
 0x155   : > { %v955_v48 = vld [vmem:[%s3807_s6 + $0x3c8] sm:$0xff]  ;;  %v957_v55 = vld [vmem:[%s3807_s6 + $0x3d8] sm:$0xff]  ;;  %v958_v56 = vld [vmem:[%s3807_s6 + $0x3e0] sm:$0xff] }
 0x1ca   : > { %v3852_v10 = vpop.permute.xlu0 %906 }
 0x1cb   : > { %v3850_v9 = vpop.permute.xlu1 %916  ;;  %v964_v21 = vmul.f32 %v924_v61, %v3852_v10  ;;  %v965_v22 = vmul.f32 %v925_v62, %v3852_v10  ;;  %v966_v27 = vmul.f32 %v926_v63, %v3852_v10  ;;  %v967_v28 = vmul.f32 %v927_v0, %v3852_v10  ;;  %v959_v62 = vld [vmem:[%s3807_s6 + $0x3e8] sm:$0xff]  ;;  %v960_v63 = vld [vmem:[%s3807_s6 + $0x3f0] sm:$0xff]  ;;  %v961_v0 = vld [vmem:[%s3807_s6 + $0x3f8] sm:$0xff] }
 0x1cc   : > { %v968_v29 = vmul.f32 %v928_v3, %v3852_v10  ;;  %v969_v30 = vmul.f32 %v929_v4, %v3852_v10  ;;  %v970_v34 = vmul.f32 %v930_v5, %v3852_v10  ;;  %v971_v35 = vmul.f32 %v931_v6, %v3852_v10 }
 0x1cd   : > { %v3882_v36 = vmul.f32 %v932_v7, %v3852_v10  ;;  %v3885_v37 = vmul.f32 %v933_v8, %v3852_v10  ;;  %v984_v42 = vmul.f32 %v944_v13, %v3850_v9  ;;  %v985_v43 = vmul.f32 %v945_v18, %v3850_v9 }
 0x1ce   : > { %v3887_v38 = vpop.permute.xlu0 %911  ;;  %v986_v44 = vmul.f32 %v946_v19, %v3850_v9  ;;  %v987_v45 = vmul.f32 %v947_v20, %v3850_v9  ;;  %v988_v51 = vmul.f32 %v948_v25, %v3850_v9  ;;  %v989_v52 = vmul.f32 %v949_v26, %v3850_v9 }
 0x1cf   : > { %v974_v49 = vmul.f32 %v934_v11, %v3887_v38  ;;  %v975_v50 = vmul.f32 %v935_v12, %v3887_v38  ;;  %v3903_v53 = vpop.permute.xlu1 %921  ;;  %v976_v57 = vmul.f32 %v936_v14, %v3887_v38  ;;  %v977_v58 = vmul.f32 %v937_v15, %v3887_v38 }
 0x1d0   : > { %v978_v59 = vmul.f32 %v938_v16, %v3887_v38  ;;  %v979_v61 = vmul.f32 %v939_v17, %v3887_v38  ;;  %v980_v1 = vmul.f32 %v940_v24, %v3887_v38  ;;  %v981_v3 = vmul.f32 %v941_v31, %v3887_v38 }
 0x1d1   : > { %v3918_v4 = vmul.f32 %v942_v32, %v3887_v38  ;;  %v3921_v5 = vmul.f32 %v943_v33, %v3887_v38  ;;  %v990_v6 = vmul.f32 %v950_v39, %v3850_v9  ;;  %v991_v7 = vmul.f32 %v951_v40, %v3850_v9 }
 0x1d2   : > { %v3926_v8 = vmul.f32 %v952_v41, %v3850_v9  ;;  %v3929_v11 = vmul.f32 %v953_v46, %v3850_v9  ;;  %v994_v12 = vmul.f32 %v954_v47, %v3903_v53  ;;  %v995_v13 = vmul.f32 %v955_v48, %v3903_v53 }
 0x1d3   : > { %v996_v14 = vmul.f32 %v956_v54, %v3903_v53  ;;  %v997_v15 = vmul.f32 %v957_v55, %v3903_v53  ;;  %v998_v16 = vmul.f32 %v958_v56, %v3903_v53  ;;  %v999_v17 = vmul.f32 %v959_v62, %v3903_v53 }
 0x1d4   : > { %v1000_v18 = vmul.f32 %v960_v63, %v3903_v53  ;;  %v1001_v19 = vmul.f32 %v961_v0, %v3903_v53  ;;  %v1004_v20 = vadd.f32 %v974_v49, %v964_v21  ;;  %v1013_v24 = vadd.f32 %v975_v50, %v965_v22 }
 0x1d5   : > { %v1022_v25 = vadd.f32 %v976_v57, %v966_v27  ;;  %v1031_v26 = vadd.f32 %v977_v58, %v967_v28  ;;  %v1040_v31 = vadd.f32 %v978_v59, %v968_v29  ;;  %v1049_v32 = vadd.f32 %v979_v61, %v969_v30 }
 0x1d6   : > { %v1058_v33 = vadd.f32 %v980_v1, %v970_v34  ;;  %v1067_v39 = vadd.f32 %v981_v3, %v971_v35  ;;  %v1005_v40 = vadd.f32 %v1004_v20, %v984_v42  ;;  %v1014_v41 = vadd.f32 %v1013_v24, %v985_v43 }
 0x1d7   : > { %v1023_v46 = vadd.f32 %v1022_v25, %v986_v44  ;;  %v1032_v47 = vadd.f32 %v1031_v26, %v987_v45  ;;  %v1041_v48 = vadd.f32 %v1040_v31, %v988_v51  ;;  %v1050_v54 = vadd.f32 %v1049_v32, %v989_v52 }
 0x1d8   : > { %v1059_v55 = vadd.f32 %v1058_v33, %v990_v6  ;;  %v1068_v56 = vadd.f32 %v1067_v39, %v991_v7  ;;  %v1006_v62 = vadd.f32 %v1005_v40, %v994_v12  ;;  %v1015_v63 = vadd.f32 %v1014_v41, %v995_v13 }
 0x1d9   : > { %v1024_v60 = vadd.f32 %v1023_v46, %v996_v14  ;;  %v1033_v0 = vadd.f32 %v1032_v47, %v997_v15  ;;  %v1042_v21 = vadd.f32 %v1041_v48, %v998_v16  ;;  %v1051_v22 = vadd.f32 %v1050_v54, %v999_v17  ;;  %v962_v47 = vld [vmem:[%s3807_s6 + $0x400] sm:$0xff]  ;;  %v963_v48 = vld [vmem:[%s3807_s6 + $0x408] sm:$0xff] }
 0x1da   : > { %v1060_v27 = vadd.f32 %v1059_v55, %v1000_v18  ;;  %v1069_v28 = vadd.f32 %v1068_v56, %v1001_v19  ;;  %v1007_v29 = vrot.slane %v1006_v62, 4  ;;  %v1016_v30 = vrot.slane %v1015_v63, 4 }
 0x1db   : > { %v1025_v34 = vrot.slane %v1024_v60, 4  ;;  %v1034_v35 = vrot.slane %v1033_v0, 4  ;;  %v1043_v42 = vrot.slane %v1042_v21, 4  ;;  %v1052_v43 = vrot.slane %v1051_v22, 4 }
 0x1dc   : > { %v1061_v44 = vrot.slane %v1060_v27, 4  ;;  %v1070_v45 = vrot.slane %v1069_v28, 4  ;;  %v1008_v49 = vadd.f32 %v1007_v29, %v1006_v62  ;;  %v1017_v50 = vadd.f32 %v1016_v30, %v1015_v63 }
 0x1dd   : > { %v1026_v51 = vadd.f32 %v1025_v34, %v1024_v60  ;;  %v1035_v52 = vadd.f32 %v1034_v35, %v1033_v0  ;;  %v1044_v57 = vadd.f32 %v1043_v42, %v1042_v21  ;;  %v1053_v58 = vadd.f32 %v1052_v43, %v1051_v22  ;;  %v1191_v34 = vld [vmem:[%s3807_s6 + $0x50] sm:$0xff]  ;;  %v1192_v35 = vld [vmem:[%s3807_s6 + $0x58] sm:$0xff] }
 0x1de   : > { %v1062_v59 = vadd.f32 %v1061_v44, %v1060_v27  ;;  %v1071_v61 = vadd.f32 %v1070_v45, %v1069_v28  ;;  %v1009_v1 = vrot.slane %v1008_v49, 2  ;;  %v1018_v3 = vrot.slane %v1017_v50, 2 }
 0x1df   : > { %v1027_v6 = vrot.slane %v1026_v51, 2  ;;  %v1036_v7 = vrot.slane %v1035_v52, 2  ;;  %v1045_v12 = vrot.slane %v1044_v57, 2  ;;  %v1054_v13 = vrot.slane %v1053_v58, 2 }
 0x1e0   : > { %v1063_v14 = vrot.slane %v1062_v59, 2  ;;  %v1072_v15 = vrot.slane %v1071_v61, 2  ;;  %v1010_v16 = vadd.f32 %v1009_v1, %v1008_v49  ;;  %v1019_v17 = vadd.f32 %v1018_v3, %v1017_v50  ;;  %v1193_v49 = vld [vmem:[%s3807_s6 + $0x60] sm:$0xff]  ;;  %v1194_v50 = vld [vmem:[%s3807_s6 + $0x68] sm:$0xff] }
 0x1e1   : > { %v1028_v18 = vadd.f32 %v1027_v6, %v1026_v51  ;;  %v1037_v60 = vadd.f32 %v1036_v7, %v1035_v52  ;;  %v1046_v19 = vadd.f32 %v1045_v12, %v1044_v57  ;;  %v1055_v20 = vadd.f32 %v1054_v13, %v1053_v58  ;;  %v1195_v51 = vld [vmem:[%s3807_s6 + $0x70] sm:$0xff]  ;;  %v1196_v52 = vld [vmem:[%s3807_s6 + $0x78] sm:$0xff]  ;;  %v1198_v6 = vld [vmem:[%s3807_s6 + $0x88] sm:$0xff] }
 0x1e2   : > { %v1064_v24 = vadd.f32 %v1063_v14, %v1062_v59  ;;  %v1073_v25 = vadd.f32 %v1072_v15, %v1071_v61  ;;  %v1011_v26 = vrot.slane %v1010_v16, 1  ;;  %v1020_v31 = vrot.slane %v1019_v17, 1  ;;  %v1199_v7 = vld [vmem:[%s3807_s6 + $0x90] sm:$0xff]  ;;  %v1200_v12 = vld [vmem:[%s3807_s6 + $0x98] sm:$0xff] }
 0x1e3   : > { %v1029_v32 = vrot.slane %v1028_v18, 1  ;;  %v1038_v33 = vrot.slane %v1037_v60, 1  ;;  %v1047_v39 = vrot.slane %v1046_v19, 1  ;;  %v1056_v40 = vrot.slane %v1055_v20, 1  ;;  %v1201_v15 = vld [vmem:[%s3807_s6 + $0x190] sm:$0xff] }
 0x1e4   : > { %v1065_v41 = vrot.slane %v1064_v24, 1  ;;  %v1074_v46 = vrot.slane %v1073_v25, 1  ;;  %v1012_v54 = vadd.f32 %v1011_v26, %v1010_v16  ;;  %v1021_v55 = vadd.f32 %v1020_v31, %v1019_v17  ;;  %v1202_v16 = vld [vmem:[%s3807_s6 + $0x198] sm:$0xff]  ;;  %v1204_v26 = vld [vmem:[%s3807_s6 + $0x1a8] sm:$0xff]  ;;  %v1205_v31 = vld [vmem:[%s3807_s6 + $0x1b0] sm:$0xff] }
 0x1e5   : > { %v1030_v56 = vadd.f32 %v1029_v32, %v1028_v18  ;;  %v1039_v62 = vadd.f32 %v1038_v33, %v1037_v60  ;;  %v1048_v63 = vadd.f32 %v1047_v39, %v1046_v19  ;;  %v1057_v0 = vadd.f32 %v1056_v40, %v1055_v20  ;;  %v1206_v39 = vld [vmem:[%s3807_s6 + $0x1b8] sm:$0xff]  ;;  %v1207_v40 = vld [vmem:[%s3807_s6 + $0x1c0] sm:$0xff] }
 0x1e6   : > { %v1066_v21 = vadd.f32 %v1065_v41, %v1064_v24  ;;  %v1075_v22 = vadd.f32 %v1074_v46, %v1073_v25  ;;  %v1076_v27 = vadd.f32 %v3918_v4, %v3882_v36  ;;  %v1085_v28 = vadd.f32 %v3921_v5, %v3885_v37  ;;  %v1203_v25 = vld [vmem:[%s3807_s6 + $0x1a0] sm:$0xff]  ;;  %v1208_v41 = vld [vmem:[%s3807_s6 + $0x1c8] sm:$0xff] }
 0x1e7   : > { %v1105_v29 = vcombine.low %v1012_v54, %v1021_v55  ;;  %v1106_v30 = vcombine.low %v1030_v56, %v1039_v62  ;;  %v1002_v42 = vmul.f32 %v962_v47, %v3903_v53  ;;  %v1003_v43 = vmul.f32 %v963_v48, %v3903_v53  ;;  %v1209_v56 = vld [vmem:[%s3807_s6 + $0x1d0] sm:$0xff]  ;;  %v1210_v62 = vld [vmem:[%s3807_s6 + $0x1d8] sm:$0xff] }
 0x1e8   : > { %v1107_v44 = vcombine.low %v1048_v63, %v1057_v0  ;;  %v1108_v45 = vcombine.low %v1066_v21, %v1075_v22  ;;  %v1077_v36 = vadd.f32 %v1076_v27, %v3926_v8  ;;  %v1086_v37 = vadd.f32 %v1085_v28, %v3929_v11  ;;  %v1197_v8 = vld [vmem:[%s3807_s6 + $0x80] sm:$0xff]  ;;  %v1211_v63 = vld [vmem:[%s3807_s6 + $0x2d0] sm:$0xff]  ;;  %v1212_v27 = vld [vmem:[%s3807_s6 + $0x2d8] sm:$0xff] }
 0x1e9   : > { %v1115_v4 = vrot.slane %v1105_v29, %v3867_v23  ;;  %v1122_v5 = vrot.slane %v1106_v30, %v3867_v23  ;;  %v3965_v11 = vmul.f32 %v1191_v34, %v3852_v10  ;;  %v3968_v59 = vmul.f32 %v1192_v35, %v3852_v10  ;;  %v1213_v28 = vld [vmem:[%s3807_s6 + $0x2e0] sm:$0xff]  ;;  %v1214_v29 = vld [vmem:[%s3807_s6 + $0x2e8] sm:$0xff] }
 0x1ea   : > { %v1129_v57 = vrot.slane %v1107_v44, %v3867_v23  ;;  %v1136_v58 = vrot.slane %v1108_v45, %v3867_v23  ;;  %v1078_v61 = vadd.f32 %v1077_v36, %v1002_v42  ;;  %v1087_v1 = vadd.f32 %v1086_v37, %v1003_v43  ;;  %v1215_v44 = vld [vmem:[%s3807_s6 + $0x2f0] sm:$0xff]  ;;  %v1216_v45 = vld [vmem:[%s3807_s6 + $0x2f8] sm:$0xff] }
 0x1eb   : > { %v1137_v3 = vcombine.low %v1115_v4, %v1122_v5  ;;  %v3975_v13 = vmul.f32 %v1193_v49, %v3852_v10  ;;  %v3980_v17 = vmul.f32 %v1194_v50, %v3852_v10  ;;  %v3983_v18 = vmul.f32 %v1195_v51, %v3852_v10  ;;  %v1217_v49 = vld [vmem:[%s3807_s6 + $0x300] sm:$0xff]  ;;  %v1218_v4 = vld [vmem:[%s3807_s6 + $0x308] sm:$0xff]  ;;  %v1219_v5 = vld [vmem:[%s3807_s6 + $0x310] sm:$0xff] }
 0x1ec   : > { %v1138_v14 = vcombine.low %v1129_v57, %v1136_v58  ;;  %v3986_v60 = vmul.f32 %v1196_v52, %v3852_v10  ;;  %v1079_v19 = vrot.slane %v1078_v61, 4  ;;  %v1088_v20 = vrot.slane %v1087_v1, 4  ;;  %v1220_v50 = vld [vmem:[%s3807_s6 + $0x318] sm:$0xff] }
 0x1ed   : > { %v1145_v24 = vrot.slane %v1137_v3, %v3867_v23  ;;  %v3993_v32 = vmul.f32 %v1197_v8, %v3852_v10  ;;  %v4000_v46 = vmul.f32 %v1198_v6, %v3852_v10  ;;  %v4003_v47 = vmul.f32 %v1199_v7, %v3852_v10  ;;  %v1222_v3 = vld [vmem:[%s3807_s6 + $0x418] sm:$0xff]  ;;  %v1223_v6 = vld [vmem:[%s3807_s6 + $0x420] sm:$0xff] }
 0x1ee   : > { %v1152_v33 = vrot.slane %v1138_v14, %v3867_v23  ;;  %v4006_v48 = vmul.f32 %v1200_v12, %v3852_v10  ;;  %v1080_v54 = vadd.f32 %v1079_v19, %v1078_v61  ;;  %v1089_v55 = vadd.f32 %v1088_v20, %v1087_v1  ;;  %v1221_v1 = vld [vmem:[%s3807_s6 + $0x410] sm:$0xff] }
 0x1ef   : > { %v1241_v0 = vmul.f32 %v1201_v15, %v3887_v38  ;;  %v1242_v21 = vmul.f32 %v1202_v16, %v3887_v38  ;;  %v1243_v30 = vmul.f32 %v1203_v25, %v3887_v38  ;;  %v1244_v34 = vmul.f32 %v1204_v26, %v3887_v38  ;;  %v1224_v16 = vld [vmem:[%s3807_s6 + $0x428] sm:$0xff]  ;;  %v1225_v19 = vld [vmem:[%s3807_s6 + $0x430] sm:$0xff] }
 0x1f0   : > { %v1153_v22 = vcombine.low %v1145_v24, %v1152_v33  ;;  %v1245_v35 = vmul.f32 %v1205_v31, %v3887_v38  ;;  %v1081_v42 = vrot.slane %v1080_v54, 2  ;;  %v1090_v43 = vrot.slane %v1089_v55, 2 }
 0x1f1   : > { %v1246_v36 = vmul.f32 %v1206_v39, %v3887_v38  ;;  %v1247_v37 = vmul.f32 %v1207_v40, %v3887_v38  ;;  %v4032_v51 = vmul.f32 %v1208_v41, %v3887_v38  ;;  %v4035_v52 = vmul.f32 %v1209_v56, %v3887_v38  ;;  %v1226_v39 = vld [vmem:[%s3807_s6 + $0x438] sm:$0xff]  ;;  %v1227_v40 = vld [vmem:[%s3807_s6 + $0x440] sm:$0xff]  ;;  %v1228_v41 = vld [vmem:[%s3807_s6 + $0x448] sm:$0xff] }
 0x1f2   : > { %1179 = vst [vmem:[%s4024_s24] ss:$8 sm:$0xf] %v1153_v22  ;;  %1180 = vst [vmem:[%s4024_s24] ss:$8 sm:$0xf0] %v1153_v22  ;;  %v4038_v57 = vmul.f32 %v1210_v62, %v3887_v38  ;;  %v1251_v58 = vmul.f32 %v1211_v63, %v3850_v9  ;;  %v1082_v8 = vadd.f32 %v1081_v42, %v1080_v54  ;;  %v5205_v14 = vlaneseq }
 0x1f3   : > { %v1091_v61 = vadd.f32 %v1090_v43, %v1089_v55  ;;  %v1252_v7 = vmul.f32 %v1212_v27, %v3850_v9  ;;  %v1253_v12 = vmul.f32 %v1213_v28, %v3850_v9  ;;  %v1254_v20 = vmul.f32 %v1214_v29, %v3850_v9 }
 0x1f4   : > { %vm4047_vm2 = vcmp.lt.s32.totalorder %v5205_v14, 256  ;;  %v1255_v24 = vmul.f32 %v1215_v44, %v3850_v9  ;;  %v1256_v25 = vmul.f32 %v1216_v45, %v3850_v9  ;;  %v1257_v26 = vmul.f32 %v1217_v49, %v3850_v9 }
 0x1f5   : > { %v1083_v31 = vrot.slane %v1082_v8, 1  ;;  %v1092_v33 = vrot.slane %v1091_v61, 1  ;;  %v1258_v54 = vmul.f32 %v1218_v4, %v3850_v9  ;;  %v4062_v55 = vmul.f32 %v1219_v5, %v3850_v9 }
 0x1f6   : > { %v4065_v56 = vmul.f32 %v1220_v50, %v3850_v9  ;;  %v1261_v62 = vmul.f32 %v1221_v1, %v3903_v53  ;;  %v1262_v63 = vmul.f32 %v1222_v3, %v3903_v53  ;;  %v1263_v22 = vmul.f32 %v1223_v6, %v3903_v53 }
 0x1f7   : > { %v1084_v27 = vadd.f32 %v1083_v31, %v1082_v8  ;;  %v1093_v28 = vadd.f32 %v1092_v33, %v1091_v61  ;;  %v1264_v29 = vmul.f32 %v1224_v16, %v3903_v53  ;;  %v1265_v42 = vmul.f32 %v1225_v19, %v3903_v53 }
 0x1f8   : > { %v1266_v43 = vmul.f32 %v1226_v39, %v3903_v53  ;;  %v1267_v44 = vmul.f32 %v1227_v40, %v3903_v53  ;;  %v1268_v45 = vmul.f32 %v1228_v41, %v3903_v53  ;;  %v1271_v49 = vadd.f32 %v1241_v0, %v3965_v11 }
 0x1f9   : > { %v1154_v4 = vcombine.low %v1084_v27, %v1093_v28  ;;  %v1280_v5 = vadd.f32 %v1242_v21, %v3968_v59  ;;  %v1289_v50 = vadd.f32 %v1243_v30, %v3975_v13  ;;  %v1298_v8 = vadd.f32 %v1244_v34, %v3980_v17 }
 0x1fa   : > { %v1272_v61 = vadd.f32 %v1271_v49, %v1251_v58  ;;  %v1307_v1 = vadd.f32 %v1245_v35, %v3983_v18  ;;  %v1316_v3 = vadd.f32 %v1246_v36, %v3986_v60  ;;  %v1325_v6 = vadd.f32 %v1247_v37, %v3993_v32 }
 0x1fb   : > { %v1161_v14 = vrot.slane %v1154_v4, %v3867_v23  ;;  %v1281_v16 = vadd.f32 %v1280_v5, %v1252_v7  ;;  %v1290_v19 = vadd.f32 %v1289_v50, %v1253_v12  ;;  %v1299_v11 = vadd.f32 %v1298_v8, %v1254_v20 }
 0x1fc   : > { %v1273_v0 = vadd.f32 %v1272_v61, %v1261_v62  ;;  %v1308_v31 = vadd.f32 %v1307_v1, %v1255_v24  ;;  %v1317_v59 = vadd.f32 %v1316_v3, %v1256_v25  ;;  %v1326_v21 = vadd.f32 %v1325_v6, %v1257_v26  ;;  %v1229_v3 = vld [vmem:[%s3807_s6 + $0x450] sm:$0xff] }
 0x1fd   : > { %v1168_v13 = vrot.slane %v1161_v14, %v3867_v23  ;;  %v1282_v17 = vadd.f32 %v1281_v16, %v1262_v63  ;;  %v1291_v30 = vadd.f32 %v1290_v19, %v1263_v22  ;;  %v1300_v34 = vadd.f32 %v1299_v11, %v1264_v29 }
 0x1fe   : > { %v1274_v18 = vrot.slane %v1273_v0, 4  ;;  %v1309_v35 = vadd.f32 %v1308_v31, %v1265_v42  ;;  %v1318_v60 = vadd.f32 %v1317_v59, %v1266_v43  ;;  %v1327_v36 = vadd.f32 %v1326_v21, %v1267_v44  ;;  %v1230_v59 = vld [vmem:[%s3807_s6 + $0x458] sm:$0xff] }
 0x1ff   : > { %3270 = vst.msk [vmem:[%s4024_s24 + $0x40] ss:$8 sm:$0x3] %vm4047_vm2, %v1168_v13  ;;  %v1283_v32 = vrot.slane %v1282_v17, 4  ;;  %v1292_v37 = vrot.slane %v1291_v30, 4  ;;  %v1301_v58 = vrot.slane %v1300_v34, 4  ;;  %v1334_v7 = vadd.f32 %v4032_v51, %v4000_v46 }
 0x200   : > { %v1275_v12 = vadd.f32 %v1274_v18, %v1273_v0  ;;  %v1310_v20 = vrot.slane %v1309_v35, 4  ;;  %v1319_v24 = vrot.slane %v1318_v60, 4  ;;  %v1328_v25 = vrot.slane %v1327_v36, 4 }
 0x201   : > { %v1284_v26 = vadd.f32 %v1283_v32, %v1282_v17  ;;  %v1293_v33 = vadd.f32 %v1292_v37, %v1291_v30  ;;  %v1302_v39 = vadd.f32 %v1301_v58, %v1300_v34  ;;  %v1335_v40 = vadd.f32 %v1334_v7, %v1258_v54  ;;  %v1454_v7 = vld [vmem:[%s3807_s6 + $0xa0] sm:$0xff] }
 0x202   : > { %v1276_v41 = vrot.slane %v1275_v12, 2  ;;  %v1311_v62 = vadd.f32 %v1310_v20, %v1309_v35  ;;  %v1320_v63 = vadd.f32 %v1319_v24, %v1318_v60  ;;  %v1329_v22 = vadd.f32 %v1328_v25, %v1327_v36  ;;  %v1456_v25 = vld [vmem:[%s3807_s6 + $0xb0] sm:$0xff] }
 0x203   : > { %v1285_v27 = vrot.slane %v1284_v26, 2  ;;  %v1294_v28 = vrot.slane %v1293_v33, 2  ;;  %v1303_v29 = vrot.slane %v1302_v39, 2  ;;  %v1336_v42 = vadd.f32 %v1335_v40, %v1268_v45  ;;  %v1458_v40 = vld [vmem:[%s3807_s6 + $0xc0] sm:$0xff] }
 0x204   : > { %v1277_v43 = vadd.f32 %v1276_v41, %v1275_v12  ;;  %v1312_v44 = vrot.slane %v1311_v62, 2  ;;  %v1321_v46 = vrot.slane %v1320_v63, 2  ;;  %v1330_v51 = vrot.slane %v1329_v22, 2  ;;  %v1455_v12 = vld [vmem:[%s3807_s6 + $0xa8] sm:$0xff] }
 0x205   : > { %v1286_v49 = vadd.f32 %v1285_v27, %v1284_v26  ;;  %v1295_v4 = vadd.f32 %v1294_v28, %v1293_v33  ;;  %v1304_v5 = vadd.f32 %v1303_v29, %v1302_v39  ;;  %v1337_v50 = vrot.slane %v1336_v42, 4  ;;  %v1457_v39 = vld [vmem:[%s3807_s6 + $0xb8] sm:$0xff]  ;;  %v1459_v41 = vld [vmem:[%s3807_s6 + $0xc8] sm:$0xff] }
 0x206   : > { %v1278_v8 = vrot.slane %v1277_v43, 1  ;;  %v1313_v54 = vadd.f32 %v1312_v44, %v1311_v62  ;;  %v1322_v61 = vadd.f32 %v1321_v46, %v1320_v63  ;;  %v1331_v1 = vadd.f32 %v1330_v51, %v1329_v22  ;;  %v1463_v44 = vld [vmem:[%s3807_s6 + $0xe8] sm:$0xff] }
 0x207   : > { %v1287_v6 = vrot.slane %v1286_v49, 1  ;;  %v1296_v14 = vrot.slane %v1295_v4, 1  ;;  %v1305_v16 = vrot.slane %v1304_v5, 1  ;;  %v1338_v19 = vadd.f32 %v1337_v50, %v1336_v42 }
 0x208   : > { %v1279_v45 = vadd.f32 %v1278_v8, %v1277_v43  ;;  %v1314_v11 = vrot.slane %v1313_v54, 1  ;;  %v1323_v0 = vrot.slane %v1322_v61, 1  ;;  %v1332_v31 = vrot.slane %v1331_v1, 1  ;;  %v1462_v43 = vld [vmem:[%s3807_s6 + $0xe0] sm:$0xff] }
 0x209   : > { %v1288_v21 = vadd.f32 %v1287_v6, %v1286_v49  ;;  %v1297_v13 = vadd.f32 %v1296_v14, %v1295_v4  ;;  %v1306_v17 = vadd.f32 %v1305_v16, %v1304_v5  ;;  %v1339_v30 = vrot.slane %v1338_v19, 2  ;;  %v1464_v49 = vld [vmem:[%s3807_s6 + $0x1e0] sm:$0xff]  ;;  %v1465_v4 = vld [vmem:[%s3807_s6 + $0x1e8] sm:$0xff] }
 0x20a   : > { %v1269_v34 = vmul.f32 %v1229_v3, %v3903_v53  ;;  %v1315_v18 = vadd.f32 %v1314_v11, %v1313_v54  ;;  %v1324_v35 = vadd.f32 %v1323_v0, %v1322_v61  ;;  %v1343_v60 = vadd.f32 %v4035_v52, %v4003_v47  ;;  %v1467_v3 = vld [vmem:[%s3807_s6 + $0x1f8] sm:$0xff]  ;;  %v1468_v6 = vld [vmem:[%s3807_s6 + $0x200] sm:$0xff]  ;;  %v1469_v11 = vld [vmem:[%s3807_s6 + $0x208] sm:$0xff] }
 0x20b   : > { %v1340_v36 = vadd.f32 %v1339_v30, %v1338_v19  ;;  %v1352_v32 = vadd.f32 %v4038_v57, %v4006_v48  ;;  %v1372_v37 = vcombine.low %v1279_v45, %v1288_v21  ;;  %v1373_v58 = vcombine.low %v1297_v13, %v1306_v17  ;;  %v1470_v0 = vld [vmem:[%s3807_s6 + $0x210] sm:$0xff]  ;;  %v1471_v17 = vld [vmem:[%s3807_s6 + $0x218] sm:$0xff]  ;;  %v1472_v30 = vld [vmem:[%s3807_s6 + $0x220] sm:$0xff] }
 0x20c   : > { %v1270_v20 = vmul.f32 %v1230_v59, %v3903_v53  ;;  %v1333_v24 = vadd.f32 %v1332_v31, %v1331_v1  ;;  %v1344_v47 = vadd.f32 %v1343_v60, %v4062_v55  ;;  %v1374_v52 = vcombine.low %v1315_v18, %v1324_v35  ;;  %v1460_v55 = vld [vmem:[%s3807_s6 + $0xd0] sm:$0xff] }
 0x20d   : > { %v1341_v26 = vrot.slane %v1340_v36, 1  ;;  %v1353_v48 = vadd.f32 %v1352_v32, %v4065_v56  ;;  %v1382_v57 = vrot.slane %v1372_v37, %v3867_v23  ;;  %v1389_v33 = vrot.slane %v1373_v58, %v3867_v23  ;;  %v1461_v56 = vld [vmem:[%s3807_s6 + $0xd8] sm:$0xff]  ;;  %v1466_v1 = vld [vmem:[%s3807_s6 + $0x1f0] sm:$0xff]  ;;  %v1475_v32 = vld [vmem:[%s3807_s6 + $0x328] sm:$0xff] }
 0x20e   : > { %v1345_v62 = vadd.f32 %v1344_v47, %v1269_v34  ;;  %v4109_v63 = vrot.slane %v1374_v52, %v3867_v23  ;;  %v4118_v22 = vmul.f32 %v1454_v7, %v3852_v10  ;;  %v4121_v27 = vmul.f32 %v1455_v12, %v3852_v10  ;;  %v1473_v34 = vld [vmem:[%s3807_s6 + $0x228] sm:$0xff]  ;;  %v1477_v47 = vld [vmem:[%s3807_s6 + $0x338] sm:$0xff]  ;;  %v1478_v52 = vld [vmem:[%s3807_s6 + $0x340] sm:$0xff] }
 0x20f   : > { %v1342_v28 = vadd.f32 %v1341_v26, %v1340_v36  ;;  %v1354_v29 = vadd.f32 %v1353_v48, %v1270_v20  ;;  %v1404_v42 = vcombine.low %v1382_v57, %v1389_v33  ;;  %v4126_v46 = vmul.f32 %v1456_v25, %v3852_v10  ;;  %v1474_v36 = vld [vmem:[%s3807_s6 + $0x320] sm:$0xff]  ;;  %v1479_v57 = vld [vmem:[%s3807_s6 + $0x348] sm:$0xff]  ;;  %v1480_v33 = vld [vmem:[%s3807_s6 + $0x350] sm:$0xff] }
 0x210   : > { %v1346_v51 = vrot.slane %v1345_v62, 4  ;;  %v4131_v5 = vmul.f32 %v1457_v39, %v3852_v10  ;;  %v4134_v50 = vmul.f32 %v1458_v40, %v3852_v10  ;;  %v4137_v8 = vmul.f32 %v1459_v41, %v3852_v10  ;;  %v1481_v39 = vld [vmem:[%s3807_s6 + $0x358] sm:$0xff] }
 0x211   : > { %v1355_v54 = vrot.slane %v1354_v29, 4  ;;  %v1375_v61 = vcombine.low %v1333_v24, %v1342_v28  ;;  %v4144_v14 = vmul.f32 %v1460_v55, %v3852_v10  ;;  %v4147_v16 = vmul.f32 %v1461_v56, %v3852_v10  ;;  %v1476_v24 = vld [vmem:[%s3807_s6 + $0x330] sm:$0xff]  ;;  %v1482_v56 = vld [vmem:[%s3807_s6 + $0x360] sm:$0xff]  ;;  %v1483_v28 = vld [vmem:[%s3807_s6 + $0x368] sm:$0xff] }
 0x212   : > { %v1347_v19 = vadd.f32 %v1346_v51, %v1345_v62  ;;  %v1412_v45 = vrot.slane %v1404_v42, %v3867_v23  ;;  %v4155_v31 = vmul.f32 %v1462_v43, %v3852_v10  ;;  %v4158_v59 = vmul.f32 %v1463_v44, %v3852_v10  ;;  %v1485_v51 = vld [vmem:[%s3807_s6 + $0x468] sm:$0xff] }
 0x213   : > { %v1356_v21 = vadd.f32 %v1355_v54, %v1354_v29  ;;  %v1403_v13 = vrot.slane %v1375_v61, %v3867_v23  ;;  %v1504_v18 = vmul.f32 %v1464_v49, %v3887_v38  ;;  %v1505_v35 = vmul.f32 %v1465_v4, %v3887_v38  ;;  %v1484_v29 = vld [vmem:[%s3807_s6 + $0x460] sm:$0xff]  ;;  %v1486_v49 = vld [vmem:[%s3807_s6 + $0x470] sm:$0xff]  ;;  %v1487_v4 = vld [vmem:[%s3807_s6 + $0x478] sm:$0xff] }
 0x214   : > { %v1348_v60 = vrot.slane %v1347_v19, 2  ;;  %v1506_v37 = vmul.f32 %v1466_v1, %v3887_v38  ;;  %v1507_v58 = vmul.f32 %v1467_v3, %v3887_v38  ;;  %v1508_v7 = vmul.f32 %v1468_v6, %v3887_v38 }
 0x215   : > { %v1357_v12 = vrot.slane %v1356_v21, 2  ;;  %v1405_v20 = vcombine.low %v4109_v63, %v1403_v13  ;;  %v1509_v25 = vmul.f32 %v1469_v11, %v3887_v38  ;;  %v1510_v26 = vmul.f32 %v1470_v0, %v3887_v38  ;;  %v1489_v11 = vld [vmem:[%s3807_s6 + $0x488] sm:$0xff]  ;;  %v1490_v0 = vld [vmem:[%s3807_s6 + $0x490] sm:$0xff] }
 0x216   : > { %v1349_v48 = vadd.f32 %v1348_v60, %v1347_v19  ;;  %v4183_v40 = vmul.f32 %v1471_v17, %v3887_v38  ;;  %v4186_v41 = vmul.f32 %v1472_v30, %v3887_v38  ;;  %v4189_v62 = vmul.f32 %v1473_v34, %v3887_v38  ;;  %v1488_v19 = vld [vmem:[%s3807_s6 + $0x480] sm:$0xff]  ;;  %v1491_v30 = vld [vmem:[%s3807_s6 + $0x498] sm:$0xff] }
 0x217   : > { %v1358_v63 = vadd.f32 %v1357_v12, %v1356_v21  ;;  %v1419_v55 = vrot.slane %v1405_v20, %v3867_v23  ;;  %v1514_v42 = vmul.f32 %v1474_v36, %v3850_v9  ;;  %v1515_v43 = vmul.f32 %v1475_v32, %v3850_v9 }
 0x218   : > { %v1350_v44 = vrot.slane %v1349_v48, 1  ;;  %v1516_v54 = vmul.f32 %v1476_v24, %v3850_v9  ;;  %v1517_v61 = vmul.f32 %v1477_v47, %v3850_v9  ;;  %v1518_v1 = vmul.f32 %v1478_v52, %v3850_v9 }
 0x219   : > { %v1359_v3 = vrot.slane %v1358_v63, 1  ;;  %v1420_v6 = vcombine.low %v1412_v45, %v1419_v55  ;;  %v1519_v21 = vmul.f32 %v1479_v57, %v3850_v9  ;;  %v1520_v13 = vmul.f32 %v1480_v33, %v3850_v9 }
 0x21a   : > { %v1351_v17 = vadd.f32 %v1350_v44, %v1349_v48  ;;  %v1521_v34 = vmul.f32 %v1481_v39, %v3850_v9  ;;  %v4211_v60 = vmul.f32 %v1482_v56, %v3850_v9  ;;  %v4214_v36 = vmul.f32 %v1483_v28, %v3850_v9 }
 0x21b   : > { %v1360_v32 = vadd.f32 %v1359_v3, %v1358_v63  ;;  %1446 = vst [vmem:[%s4217_s30] ss:$8 sm:$0xf] %v1420_v6  ;;  %1447 = vst [vmem:[%s4217_s30] ss:$8 sm:$0xf0] %v1420_v6  ;;  %v1524_v45 = vmul.f32 %v1484_v29, %v3903_v53  ;;  %v1525_v12 = vmul.f32 %v1485_v51, %v3903_v53 }
 0x21c   : > { %v1526_v20 = vmul.f32 %v1486_v49, %v3903_v53  ;;  %v1527_v24 = vmul.f32 %v1487_v4, %v3903_v53  ;;  %v1528_v47 = vmul.f32 %v1488_v19, %v3903_v53  ;;  %v1529_v52 = vmul.f32 %v1489_v11, %v3903_v53 }
 0x21d   : > { %v1530_v48 = vmul.f32 %v1490_v0, %v3903_v53  ;;  %v1421_v57 = vcombine.low %v1351_v17, %v1360_v32  ;;  %v1531_v33 = vmul.f32 %v1491_v30, %v3903_v53  ;;  %v1534_v39 = vadd.f32 %v1504_v18, %v4118_v22 }
 0x21e   : > { %v1543_v63 = vadd.f32 %v1505_v35, %v4121_v27  ;;  %v1552_v55 = vadd.f32 %v1506_v37, %v4126_v46  ;;  %v1561_v56 = vadd.f32 %v1507_v58, %v4131_v5  ;;  %v1570_v28 = vadd.f32 %v1508_v7, %v4134_v50 }
 0x21f   : > { %v1579_v29 = vadd.f32 %v1509_v25, %v4137_v8  ;;  %v1428_v44 = vrot.slane %v1421_v57, %v3867_v23  ;;  %v1535_v51 = vadd.f32 %v1534_v39, %v1514_v42  ;;  %v1588_v4 = vadd.f32 %v1510_v26, %v4144_v14 }
 0x220   : > { %v1544_v49 = vadd.f32 %v1543_v63, %v1515_v43  ;;  %v1553_v3 = vadd.f32 %v1552_v55, %v1516_v54  ;;  %v1562_v6 = vadd.f32 %v1561_v56, %v1517_v61  ;;  %v1571_v22 = vadd.f32 %v1570_v28, %v1518_v1 }
 0x221   : > { %v1580_v18 = vadd.f32 %v1579_v29, %v1519_v21  ;;  %v1435_v27 = vrot.slane %v1428_v44, %v3867_v23  ;;  %v1536_v46 = vadd.f32 %v1535_v51, %v1524_v45  ;;  %v1589_v5 = vadd.f32 %v1588_v4, %v1520_v13 }
 0x222   : > { %v1545_v35 = vadd.f32 %v1544_v49, %v1525_v12  ;;  %v1554_v37 = vadd.f32 %v1553_v3, %v1526_v20  ;;  %v1563_v50 = vadd.f32 %v1562_v6, %v1527_v24  ;;  %v1572_v58 = vadd.f32 %v1571_v22, %v1528_v47  ;;  %v1492_v49 = vld [vmem:[%s3807_s6 + $0x4a0] sm:$0xff]  ;;  %v1493_v22 = vld [vmem:[%s3807_s6 + $0x4a8] sm:$0xff] }
 0x223   : > { %v1581_v8 = vadd.f32 %v1580_v18, %v1529_v52  ;;  %3273 = vst.msk [vmem:[%s4217_s30 + $0x40] ss:$8 sm:$0x3] %vm4047_vm2, %v1435_v27  ;;  %v1537_v7 = vrot.slane %v1536_v46, 4  ;;  %v1590_v42 = vadd.f32 %v1589_v5, %v1530_v48  ;;  %v1597_v14 = vadd.f32 %v4183_v40, %v4147_v16 }
 0x224   : > { %v1546_v25 = vrot.slane %v1545_v35, 4  ;;  %v1555_v26 = vrot.slane %v1554_v37, 4  ;;  %v1564_v43 = vrot.slane %v1563_v50, 4  ;;  %v1573_v54 = vrot.slane %v1572_v58, 4 }
 0x225   : > { %v1582_v61 = vrot.slane %v1581_v8, 4  ;;  %v1538_v1 = vadd.f32 %v1537_v7, %v1536_v46  ;;  %v1591_v11 = vrot.slane %v1590_v42, 4  ;;  %v1598_v0 = vadd.f32 %v1597_v14, %v1521_v34  ;;  %v1717_v14 = vld [vmem:[%s3807_s6 + $0xf0] sm:$0xff] }
 0x226   : > { %v1547_v19 = vadd.f32 %v1546_v25, %v1545_v35  ;;  %v1556_v21 = vadd.f32 %v1555_v26, %v1554_v37  ;;  %v1565_v13 = vadd.f32 %v1564_v43, %v1563_v50  ;;  %v1574_v17 = vadd.f32 %v1573_v54, %v1572_v58  ;;  %v1718_v26 = vld [vmem:[%s3807_s6 + $0xf8] sm:$0xff] }
 0x227   : > { %v1583_v30 = vadd.f32 %v1582_v61, %v1581_v8  ;;  %v1539_v32 = vrot.slane %v1538_v1, 2  ;;  %v1592_v12 = vadd.f32 %v1591_v11, %v1590_v42  ;;  %v1599_v20 = vadd.f32 %v1598_v0, %v1531_v33 }
 0x228   : > { %v1548_v45 = vrot.slane %v1547_v19, 2  ;;  %v1557_v24 = vrot.slane %v1556_v21, 2  ;;  %v1566_v47 = vrot.slane %v1565_v13, 2  ;;  %v1575_v16 = vrot.slane %v1574_v17, 2 }
 0x229   : > { %v1584_v40 = vrot.slane %v1583_v30, 2  ;;  %v1540_v52 = vadd.f32 %v1539_v32, %v1538_v1  ;;  %v1593_v57 = vrot.slane %v1592_v12, 2  ;;  %v1600_v39 = vrot.slane %v1599_v20, 4 }
 0x22a   : > { %v1549_v48 = vadd.f32 %v1548_v45, %v1547_v19  ;;  %v1558_v63 = vadd.f32 %v1557_v24, %v1556_v21  ;;  %v1567_v34 = vadd.f32 %v1566_v47, %v1565_v13  ;;  %v1576_v55 = vadd.f32 %v1575_v16, %v1574_v17  ;;  %v1722_v17 = vld [vmem:[%s3807_s6 + $0x118] sm:$0xff]  ;;  %v1724_v24 = vld [vmem:[%s3807_s6 + $0x128] sm:$0xff]  ;;  %v1725_v47 = vld [vmem:[%s3807_s6 + $0x130] sm:$0xff] }
 0x22b   : > { %v1585_v56 = vadd.f32 %v1584_v40, %v1583_v30  ;;  %v1541_v28 = vrot.slane %v1540_v52, 1  ;;  %v1594_v44 = vadd.f32 %v1593_v57, %v1592_v12  ;;  %v1601_v51 = vadd.f32 %v1600_v39, %v1599_v20  ;;  %v1723_v20 = vld [vmem:[%s3807_s6 + $0x120] sm:$0xff]  ;;  %v1726_v40 = vld [vmem:[%s3807_s6 + $0x138] sm:$0xff] }
 0x22c   : > { %v1550_v29 = vrot.slane %v1549_v48, 1  ;;  %v1559_v33 = vrot.slane %v1558_v63, 1  ;;  %v1568_v4 = vrot.slane %v1567_v34, 1  ;;  %v1577_v3 = vrot.slane %v1576_v55, 1 }
 0x22d   : > { %v1586_v6 = vrot.slane %v1585_v56, 1  ;;  %v1542_v18 = vadd.f32 %v1541_v28, %v1540_v52  ;;  %v1595_v46 = vrot.slane %v1594_v44, 1  ;;  %v1602_v35 = vrot.slane %v1601_v51, 2  ;;  %v1727_v52 = vld [vmem:[%s3807_s6 + $0x230] sm:$0xff]  ;;  %v1729_v28 = vld [vmem:[%s3807_s6 + $0x240] sm:$0xff] }
 0x22e   : > { %v1551_v27 = vadd.f32 %v1550_v29, %v1549_v48  ;;  %v1560_v5 = vadd.f32 %v1559_v33, %v1558_v63  ;;  %v1569_v37 = vadd.f32 %v1568_v4, %v1567_v34  ;;  %v1578_v50 = vadd.f32 %v1577_v3, %v1576_v55  ;;  %v1730_v29 = vld [vmem:[%s3807_s6 + $0x248] sm:$0xff]  ;;  %v1732_v33 = vld [vmem:[%s3807_s6 + $0x258] sm:$0xff] }
 0x22f   : > { %v1587_v58 = vadd.f32 %v1586_v6, %v1585_v56  ;;  %v1532_v8 = vmul.f32 %v1492_v49, %v3903_v53  ;;  %v1603_v7 = vadd.f32 %v1602_v35, %v1601_v51  ;;  %v1606_v25 = vadd.f32 %v4186_v41, %v4155_v31  ;;  %v1720_v41 = vld [vmem:[%s3807_s6 + $0x108] sm:$0xff]  ;;  %v1728_v56 = vld [vmem:[%s3807_s6 + $0x238] sm:$0xff]  ;;  %v1731_v49 = vld [vmem:[%s3807_s6 + $0x250] sm:$0xff] }
 0x230   : > { %v1615_v42 = vadd.f32 %v4189_v62, %v4158_v59  ;;  %v1533_v43 = vmul.f32 %v1493_v22, %v3903_v53  ;;  %v1635_v54 = vcombine.low %v1542_v18, %v1551_v27  ;;  %v1636_v61 = vcombine.low %v1560_v5, %v1569_v37  ;;  %v1719_v59 = vld [vmem:[%s3807_s6 + $0x100] sm:$0xff]  ;;  %v1721_v62 = vld [vmem:[%s3807_s6 + $0x110] sm:$0xff]  ;;  %v1734_v35 = vld [vmem:[%s3807_s6 + $0x268] sm:$0xff] }
 0x231   : > { %v1637_v1 = vcombine.low %v1578_v50, %v1587_v58  ;;  %v1596_v19 = vadd.f32 %v1595_v46, %v1594_v44  ;;  %v1604_v11 = vrot.slane %v1603_v7, 1  ;;  %v1607_v0 = vadd.f32 %v1606_v25, %v4211_v60  ;;  %v1733_v46 = vld [vmem:[%s3807_s6 + $0x260] sm:$0xff]  ;;  %v1735_v5 = vld [vmem:[%s3807_s6 + $0x270] sm:$0xff]  ;;  %v1736_v50 = vld [vmem:[%s3807_s6 + $0x278] sm:$0xff] }
 0x232   : > { %v1616_v31 = vadd.f32 %v1615_v42, %v4214_v36  ;;  %v1645_v21 = vrot.slane %v1635_v54, %v3867_v23  ;;  %v1652_v13 = vrot.slane %v1636_v61, %v3867_v23  ;;  %v4267_v30 = vmul.f32 %v1717_v14, %v3852_v10  ;;  %v1737_v58 = vld [vmem:[%s3807_s6 + $0x370] sm:$0xff]  ;;  %v1739_v54 = vld [vmem:[%s3807_s6 + $0x380] sm:$0xff]  ;;  %v1740_v61 = vld [vmem:[%s3807_s6 + $0x388] sm:$0xff] }
 0x233   : > { %v4270_v60 = vmul.f32 %v1718_v26, %v3852_v10  ;;  %v1605_v36 = vadd.f32 %v1604_v11, %v1603_v7  ;;  %v1608_v32 = vadd.f32 %v1607_v0, %v1532_v8  ;;  %v1659_v12 = vrot.slane %v1637_v1, %v3867_v23  ;;  %v1742_v11 = vld [vmem:[%s3807_s6 + $0x398] sm:$0xff] }
 0x234   : > { %v1617_v45 = vadd.f32 %v1616_v31, %v1533_v43  ;;  %v1667_v16 = vcombine.low %v1645_v21, %v1652_v13  ;;  %v4279_v48 = vmul.f32 %v1719_v59, %v3852_v10  ;;  %v4282_v57 = vmul.f32 %v1720_v41, %v3852_v10 }
 0x235   : > { %v4285_v39 = vmul.f32 %v1721_v62, %v3852_v10  ;;  %v1609_v63 = vrot.slane %v1608_v32, 4  ;;  %v1638_v55 = vcombine.low %v1596_v19, %v1605_v36  ;;  %v4292_v44 = vmul.f32 %v1722_v17, %v3852_v10  ;;  %v1741_v19 = vld [vmem:[%s3807_s6 + $0x390] sm:$0xff]  ;;  %v1743_v17 = vld [vmem:[%s3807_s6 + $0x3a0] sm:$0xff]  ;;  %v1744_v36 = vld [vmem:[%s3807_s6 + $0x3a8] sm:$0xff] }
 0x236   : > { %v1618_v34 = vrot.slane %v1617_v45, 4  ;;  %v1675_v51 = vrot.slane %v1667_v16, %v3867_v23  ;;  %v4300_v4 = vmul.f32 %v1723_v20, %v3852_v10  ;;  %v4303_v3 = vmul.f32 %v1724_v24, %v3852_v10  ;;  %v1747_v20 = vld [vmem:[%s3807_s6 + $0x4b0] sm:$0xff]  ;;  %v1748_v24 = vld [vmem:[%s3807_s6 + $0x4b8] sm:$0xff] }
 0x237   : > { %v4306_v6 = vmul.f32 %v1725_v47, %v3852_v10  ;;  %v1610_v22 = vadd.f32 %v1609_v63, %v1608_v32  ;;  %v1666_v27 = vrot.slane %v1638_v55, %v3867_v23  ;;  %v4313_v37 = vmul.f32 %v1726_v40, %v3852_v10  ;;  %v1738_v10 = vld [vmem:[%s3807_s6 + $0x378] sm:$0xff]  ;;  %v1745_v32 = vld [vmem:[%s3807_s6 + $0x3b0] sm:$0xff] }
 0x238   : > { %v1619_v18 = vadd.f32 %v1618_v34, %v1617_v45  ;;  %v1767_v8 = vmul.f32 %v1727_v52, %v3887_v38  ;;  %v1768_v7 = vmul.f32 %v1728_v56, %v3887_v38  ;;  %v1769_v25 = vmul.f32 %v1729_v28, %v3887_v38  ;;  %v1749_v56 = vld [vmem:[%s3807_s6 + $0x4c0] sm:$0xff]  ;;  %v1751_v28 = vld [vmem:[%s3807_s6 + $0x4d0] sm:$0xff] }
 0x239   : > { %v1770_v42 = vmul.f32 %v1730_v29, %v3887_v38  ;;  %v1611_v14 = vrot.slane %v1610_v22, 2  ;;  %v1668_v43 = vcombine.low %v1659_v12, %v1666_v27  ;;  %v1771_v1 = vmul.f32 %v1731_v49, %v3887_v38  ;;  %v1746_v12 = vld [vmem:[%s3807_s6 + $0x3b8] sm:$0xff] }
 0x23a   : > { %v1620_v26 = vrot.slane %v1619_v18, 2  ;;  %v1772_v0 = vmul.f32 %v1732_v33, %v3887_v38  ;;  %v1773_v31 = vmul.f32 %v1733_v46, %v3887_v38  ;;  %v4332_v59 = vmul.f32 %v1734_v35, %v3887_v38  ;;  %v1752_v49 = vld [vmem:[%s3807_s6 + $0x4d8] sm:$0xff]  ;;  %v1753_v33 = vld [vmem:[%s3807_s6 + $0x4e0] sm:$0xff] }
 0x23b   : > { %v4335_v41 = vmul.f32 %v1735_v5, %v3887_v38  ;;  %v1612_v62 = vadd.f32 %v1611_v14, %v1610_v22  ;;  %v1682_v13 = vrot.slane %v1668_v43, %v3867_v23  ;;  %v4342_v45 = vmul.f32 %v1736_v50, %v3887_v38  ;;  %v1750_v38 = vld [vmem:[%s3807_s6 + $0x4c8] sm:$0xff] }
 0x23c   : > { %v1621_v21 = vadd.f32 %v1620_v26, %v1619_v18  ;;  %v1777_v47 = vmul.f32 %v1737_v58, %v3850_v9  ;;  %v1778_v16 = vmul.f32 %v1738_v10, %v3850_v9  ;;  %v1779_v40 = vmul.f32 %v1739_v54, %v3850_v9  ;;  %v1754_v22 = vld [vmem:[%s3807_s6 + $0x4e8] sm:$0xff] }
 0x23d   : > { %v1780_v52 = vmul.f32 %v1740_v61, %v3850_v9  ;;  %v1613_v63 = vrot.slane %v1612_v62, 1  ;;  %v1683_v55 = vcombine.low %v1675_v51, %v1682_v13  ;;  %v1781_v29 = vmul.f32 %v1741_v19, %v3850_v9 }
 0x23e   : > { %v1622_v34 = vrot.slane %v1621_v21, 1  ;;  %v1782_v18 = vmul.f32 %v1742_v11, %v3850_v9  ;;  %v1783_v27 = vmul.f32 %v1743_v17, %v3850_v9  ;;  %v1784_v46 = vmul.f32 %v1744_v36, %v3850_v9 }
 0x23f   : > { %v4362_v35 = vmul.f32 %v1745_v32, %v3850_v9  ;;  %v1614_v5 = vadd.f32 %v1613_v63, %v1612_v62  ;;  %1709 = vst [vmem:[%s4365_s15] ss:$8 sm:$0xf] %v1683_v55  ;;  %1710 = vst [vmem:[%s4365_s15] ss:$8 sm:$0xf0] %v1683_v55  ;;  %v4370_v51 = vmul.f32 %v1746_v12, %v3850_v9 }
 0x240   : > { %v1623_v50 = vadd.f32 %v1622_v34, %v1621_v21  ;;  %v1787_v58 = vmul.f32 %v1747_v20, %v3903_v53  ;;  %v1788_v14 = vmul.f32 %v1748_v24, %v3903_v53  ;;  %v1789_v26 = vmul.f32 %v1749_v56, %v3903_v53 }
 0x241   : > { %v1790_v43 = vmul.f32 %v1750_v38, %v3903_v53  ;;  %v1791_v10 = vmul.f32 %v1751_v28, %v3903_v53  ;;  %v1792_v61 = vmul.f32 %v1752_v49, %v3903_v53  ;;  %v1793_v19 = vmul.f32 %v1753_v33, %v3903_v53 }
 0x242   : > { %v1684_v54 = vcombine.low %v1614_v5, %v1623_v50  ;;  %v1794_v11 = vmul.f32 %v1754_v22, %v3903_v53  ;;  %v1797_v9 = vadd.f32 %v1767_v8, %v4267_v30  ;;  %v1806_v62 = vadd.f32 %v1768_v7, %v4270_v60 }
 0x243   : > { %v1815_v21 = vadd.f32 %v1769_v25, %v4279_v48  ;;  %v1824_v13 = vadd.f32 %v1770_v42, %v4282_v57  ;;  %v1833_v36 = vadd.f32 %v1771_v1, %v4285_v39  ;;  %v1842_v32 = vadd.f32 %v1772_v0, %v4292_v44 }
 0x244   : > { %v1691_v17 = vrot.slane %v1684_v54, %v3867_v23  ;;  %v1851_v12 = vadd.f32 %v1773_v31, %v4300_v4  ;;  %v1798_v20 = vadd.f32 %v1797_v9, %v1777_v47  ;;  %v1807_v24 = vadd.f32 %v1806_v62, %v1778_v16 }
 0x245   : > { %v1816_v63 = vadd.f32 %v1815_v21, %v1779_v40  ;;  %v1825_v34 = vadd.f32 %v1824_v13, %v1780_v52  ;;  %v1834_v60 = vadd.f32 %v1833_v36, %v1781_v29  ;;  %v1843_v8 = vadd.f32 %v1842_v32, %v1782_v18  ;;  %v1755_v13 = vld [vmem:[%s3807_s6 + $0x4f0] sm:$0xff] }
 0x246   : > { %v1698_v30 = vrot.slane %v1691_v17, %v3867_v23  ;;  %v1852_v48 = vadd.f32 %v1851_v12, %v1783_v27  ;;  %v1799_v7 = vadd.f32 %v1798_v20, %v1787_v58  ;;  %v1808_v57 = vadd.f32 %v1807_v24, %v1788_v14 }
 0x247   : > { %v1817_v25 = vadd.f32 %v1816_v63, %v1789_v26  ;;  %v1826_v42 = vadd.f32 %v1825_v34, %v1790_v43  ;;  %v1835_v39 = vadd.f32 %v1834_v60, %v1791_v10  ;;  %v1844_v44 = vadd.f32 %v1843_v8, %v1792_v61  ;;  %v1756_v34 = vld [vmem:[%s3807_s6 + $0x4f8] sm:$0xff]  ;;  %s1964_s6 = sshra.s32 %s1887_s16, 3 }
 0x248   : > { %3276 = vst.msk [vmem:[%s4365_s15 + $0x40] ss:$8 sm:$0x3] %vm4047_vm2, %v1698_v30  ;;  %v1853_v1 = vadd.f32 %v1852_v48, %v1793_v19  ;;  %v1860_v4 = vadd.f32 %v4332_v59, %v4303_v3  ;;  %v1800_v0 = vrot.slane %v1799_v7, 4  ;;  %v1809_v31 = vrot.slane %v1808_v57, 4  ;;  %s3277_s10 = smul.u32 80, %s1964_s6 }
 0x249   : > { %v1818_v47 = vrot.slane %v1817_v25, 4  ;;  %v1827_v16 = vrot.slane %v1826_v42, 4  ;;  %v1836_v40 = vrot.slane %v1835_v39, 4  ;;  %v1845_v52 = vrot.slane %v1844_v44, 4 }
 0x24a   : > { %v1854_v55 = vrot.slane %v1853_v1, 4  ;;  %v1861_v56 = vadd.f32 %v1860_v4, %v1784_v46  ;;  %v1801_v38 = vadd.f32 %v1800_v0, %v1799_v7  ;;  %v1810_v28 = vadd.f32 %v1809_v31, %v1808_v57  ;;  %s1970_s11 = sadd.s32 %s3277_s10, %s1967_s19 }
 0x24b   : > { %v1819_v29 = vadd.f32 %v1818_v47, %v1817_v25  ;;  %v1828_v49 = vadd.f32 %v1827_v16, %v1826_v42  ;;  %v1837_v33 = vadd.f32 %v1836_v40, %v1835_v39  ;;  %v1846_v22 = vadd.f32 %v1845_v52, %v1844_v44  ;;  %s1971_s17 = scalar_lea.vmem [#allocation5], %s1970_s11 }
 0x24c   : > { %v1855_v18 = vadd.f32 %v1854_v55, %v1853_v1  ;;  %v1862_v27 = vadd.f32 %v1861_v56, %v1794_v11  ;;  %v1802_v5 = vrot.slane %v1801_v38, 2  ;;  %v1811_v50 = vrot.slane %v1810_v28, 2 }
 0x24d   : > { %v1820_v3 = vrot.slane %v1819_v29, 2  ;;  %v1829_v59 = vrot.slane %v1828_v49, 2  ;;  %v1838_v58 = vrot.slane %v1837_v33, 2  ;;  %v1847_v14 = vrot.slane %v1846_v22, 2 }
 0x24e   : > { %v1856_v26 = vrot.slane %v1855_v18, 2  ;;  %v1863_v43 = vrot.slane %v1862_v27, 4  ;;  %v1803_v10 = vadd.f32 %v1802_v5, %v1801_v38  ;;  %v1812_v54 = vadd.f32 %v1811_v50, %v1810_v28 }
 0x24f   : > { %v1821_v46 = vadd.f32 %v1820_v3, %v1819_v29  ;;  %v1830_v61 = vadd.f32 %v1829_v59, %v1828_v49  ;;  %v1839_v19 = vadd.f32 %v1838_v58, %v1837_v33  ;;  %v1848_v9 = vadd.f32 %v1847_v14, %v1846_v22 }
 0x250   : > { %v1857_v62 = vadd.f32 %v1856_v26, %v1855_v18  ;;  %v1864_v21 = vadd.f32 %v1863_v43, %v1862_v27  ;;  %v1804_v11 = vrot.slane %v1803_v10, 1  ;;  %v1813_v17 = vrot.slane %v1812_v54, 1 }
 0x251   : > { %v1822_v36 = vrot.slane %v1821_v46, 1  ;;  %v1831_v32 = vrot.slane %v1830_v61, 1  ;;  %v1840_v12 = vrot.slane %v1839_v19, 1  ;;  %v1849_v20 = vrot.slane %v1848_v9, 1 }
 0x252   : > { %v1858_v24 = vrot.slane %v1857_v62, 1  ;;  %v1865_v63 = vrot.slane %v1864_v21, 2  ;;  %v1805_v30 = vadd.f32 %v1804_v11, %v1803_v10  ;;  %v1814_v60 = vadd.f32 %v1813_v17, %v1812_v54 }
 0x253   : > { %v1823_v8 = vadd.f32 %v1822_v36, %v1821_v46  ;;  %v1832_v48 = vadd.f32 %v1831_v32, %v1830_v61  ;;  %v1795_v7 = vmul.f32 %v1755_v13, %v3903_v53  ;;  %v1841_v57 = vadd.f32 %v1840_v12, %v1839_v19 }
 0x254   : > { %v1850_v25 = vadd.f32 %v1849_v20, %v1848_v9  ;;  %v1866_v42 = vadd.f32 %v1865_v63, %v1864_v21  ;;  %v1869_v39 = vadd.f32 %v4335_v41, %v4306_v6  ;;  %v1878_v44 = vadd.f32 %v4342_v45, %v4313_v37 }
 0x255   : > { %v1898_v1 = vcombine.low %v1805_v30, %v1814_v60  ;;  %v1899_v4 = vcombine.low %v1823_v8, %v1832_v48  ;;  %v1796_v0 = vmul.f32 %v1756_v34, %v3903_v53  ;;  %v1859_v31 = vadd.f32 %v1858_v24, %v1857_v62 }
 0x256   : > { %v1867_v47 = vrot.slane %v1866_v42, 1  ;;  %v1900_v16 = vcombine.low %v1841_v57, %v1850_v25  ;;  %v1870_v40 = vadd.f32 %v1869_v39, %v4362_v35  ;;  %v1879_v52 = vadd.f32 %v1878_v44, %v4370_v51 }
 0x257   : > { %v1908_v55 = vrot.slane %v1898_v1, %v3867_v23  ;;  %v1915_v56 = vrot.slane %v1899_v4, %v3867_v23  ;;  %v1986_v61 = vmul.u32 (!%p3280_p0), 1280, %v3842_v2  ;;  %v5208_v19 = vlaneseq (!%p3280_p0) }
 0x258   : > { %v1868_v6 = vadd.f32 %v1867_v47, %v1866_v42  ;;  %v1871_v41 = vadd.f32 %v1870_v40, %v1795_v7  ;;  %v1880_v38 = vadd.f32 %v1879_v52, %v1796_v0  ;;  %v1922_v45 = vrot.slane %v1900_v16, %v3867_v23 }
 0x259   : > { %v1930_v28 = vcombine.low %v1908_v55, %v1915_v56  ;;  %v4418_v9 = vand.u32 (!%p3280_p0), 127, %v5208_v19 }
 0x25a   : > { %v1901_v37 = vcombine.low %v1859_v31, %v1868_v6  ;;  %v1872_v53 = vrot.slane %v1871_v41, 4  ;;  %v1881_v29 = vrot.slane %v1880_v38, 4 }
 0x25b   : > { %v1938_v22 = vrot.slane %v1930_v28, %v3867_v23  ;;  %v1989_v62 = vadd.s32 (!%p3280_p0), 128, %v4418_v9  ;;  %v1990_v21 = vadd.s32 (!%p3280_p0), 256, %v4418_v9  ;;  %v1991_v13 = vadd.s32 (!%p3280_p0), 384, %v4418_v9 }
 0x25c   : > { %v1929_v35 = vrot.slane %v1901_v37, %v3867_v23  ;;  %v1873_v49 = vadd.f32 %v1872_v53, %v1871_v41  ;;  %v1882_v51 = vadd.f32 %v1881_v29, %v1880_v38  ;;  %v1992_v11 = vadd.s32 (!%p3280_p0), 512, %v4418_v9 }
 0x25d   : > { %v1994_v15 = vadd.s32 (!%p3280_p0), 768, %v4418_v9  ;;  %v1995_v17 = vadd.s32 (!%p3280_p0), 896, %v4418_v9  ;;  %v1996_v36 = vadd.s32 (!%p3280_p0), 1024, %v4418_v9  ;;  %v1997_v2 = vadd.s32 (!%p3280_p0), 1152, %v4418_v9 }
 0x25e   : > { %v1931_v33 = vcombine.low %v1922_v45, %v1929_v35  ;;  %v1874_v18 = vrot.slane %v1873_v49, 2  ;;  %v1883_v27 = vrot.slane %v1882_v51, 2  ;;  %v4430_v32 = vadd.s32 (!%p3280_p0), %v4418_v9, %v1986_v61 }
 0x25f   : > { %v4432_v12 = vadd.s32 (!%p3280_p0), %v1989_v62, %v1986_v61  ;;  %v4434_v20 = vadd.s32 (!%p3280_p0), %v1990_v21, %v1986_v61  ;;  %v4436_v24 = vadd.s32 (!%p3280_p0), %v1991_v13, %v1986_v61  ;;  %v4438_v63 = vadd.s32 (!%p3280_p0), %v1992_v11, %v1986_v61 }
 0x260   : > { %v1945_v5 = vrot.slane %v1931_v33, %v3867_v23  ;;  %v1875_v50 = vadd.f32 %v1874_v18, %v1873_v49  ;;  %v1884_v3 = vadd.f32 %v1883_v27, %v1882_v51  ;;  %v4442_v30 = vadd.s32 (!%p3280_p0), %v1994_v15, %v1986_v61 }
 0x261   : > { %v4444_v7 = vadd.s32 (!%p3280_p0), %v1995_v17, %v1986_v61  ;;  %v4446_v57 = vadd.s32 (!%p3280_p0), %v1996_v36, %v1986_v61  ;;  %v4448_v25 = vadd.s32 (!%p3280_p0), %v1997_v2, %v1986_v61  ;;  %vm2008_vm3 = vcmp.lt.s32.totalorder (!%p3280_p0), %v4430_v32, 10000 }
 0x262   : > { %v1946_v59 = vcombine.low %v1938_v22, %v1945_v5  ;;  %v1876_v58 = vrot.slane %v1875_v50, 1  ;;  %v1885_v14 = vrot.slane %v1884_v3, 1  ;;  %vm2009_vm4 = vcmp.lt.s32.totalorder (!%p3280_p0), %v4432_v12, 10000 }
 0x263   : > { %vm2010_vm5 = vcmp.lt.s32.totalorder (!%p3280_p0), %v4434_v20, 10000  ;;  %vm2011_vm6 = vcmp.lt.s32.totalorder (!%p3280_p0), %v4436_v24, 10000  ;;  %vm2012_vm7 = vcmp.lt.s32.totalorder (!%p3280_p0), %v4438_v63, 10000  ;;  %vm2014_vm9 = vcmp.lt.s32.totalorder (!%p3280_p0), %v4442_v30, 10000 }
 0x264   : > { %1972 = vst [vmem:[%s1971_s17] ss:$8 sm:$0xf] %v1946_v59  ;;  %1973 = vst [vmem:[%s1971_s17] ss:$8 sm:$0xf0] %v1946_v59  ;;  %v1877_v26 = vadd.f32 %v1876_v58, %v1875_v50  ;;  %v1886_v43 = vadd.f32 %v1885_v14, %v1884_v3  ;;  %vm2015_vm10 = vcmp.lt.s32.totalorder (!%p3280_p0), %v4444_v7, 10000  ;;  %vm2016_vm11 = vcmp.lt.s32.totalorder (!%p3280_p0), %v4446_v57, 10000 }
 0x265   : > { %vm2017_vm12 = vcmp.lt.s32.totalorder (!%p3280_p0), %v4448_v25, 10000 }
 0x266   : > { %v1947_v10 = vcombine.low %v1877_v26, %v1886_v43  ;;  %1983 = sbr.rel (%p3280_p0) target bundleno = 5480 (0x1568), region = 295 }
 0x268   : > { %v1954_v54 = vrot.slane %v1947_v10, %v3867_v23 }
 0x26a   : > { %v1961_v46 = vrot.slane %v1954_v54, %v3867_v23  ;;  %v1993_v23 = vadd.s32 (!%p3280_p0), 640, %v4418_v9 }
 0x26c   : > { %3279 = vst.msk [vmem:[%s1971_s17 + $0x40] ss:$8 sm:$0x3] %vm4047_vm2, %v1961_v46  ;;  %v4440_v34 = vadd.s32 (!%p3280_p0), %v1993_v23, %v1986_v61 }
 0x26e   : > { %vm2013_vm8 = vcmp.lt.s32.totalorder %v4440_v34, 10000 }
 0x273   : > { %v2018_v60 = vld [vmem:[#allocation5] sm:$0xff]  ;;  %v2019_v8 = vld [vmem:[#allocation5 + $0x8] sm:$0xff]  ;;  %v2020_v48 = vld [vmem:[#allocation5 + $0x10] sm:$0xff] }
 0x274   : > { %v2021_v42 = vld [vmem:[#allocation5 + $0x18] sm:$0xff]  ;;  %v2022_v39 = vld [vmem:[#allocation5 + $0x20] sm:$0xff]  ;;  %v2023_v44 = vld [vmem:[#allocation5 + $0x28] sm:$0xff]  ;;  %v4462_v47 = vsel %vm2008_vm3, %v2018_v60, -inf  ;;  %v4464_v16 = vsel %vm2009_vm4, %v2019_v8, -inf  ;;  %v4466_v40 = vsel %vm2010_vm5, %v2020_v48, -inf }
 0x275   : > { %v2024_v1 = vld [vmem:[#allocation5 + $0x30] sm:$0xff]  ;;  %v2025_v4 = vld [vmem:[#allocation5 + $0x38] sm:$0xff]  ;;  %v2026_v0 = vld [vmem:[#allocation5 + $0x40] sm:$0xff]  ;;  %v4468_v52 = vsel %vm2011_vm6, %v2021_v42, -inf  ;;  %v4470_v55 = vsel %vm2012_vm7, %v2022_v39, -inf  ;;  %v4472_v56 = vsel %vm2013_vm8, %v2023_v44, -inf }
 0x276   : > { %v2027_v31 = vld [vmem:[#allocation5 + $0x48] sm:$0xff]  ;;  %v4474_v6 = vsel %vm2014_vm9, %v2024_v1, -inf  ;;  %v4476_v41 = vsel %vm2015_vm10, %v2025_v4, -inf  ;;  %v4478_v38 = vsel %vm2016_vm11, %v2026_v0, -inf  ;;  %v2038_v45 = vmax.f32 %v4462_v47, %v4470_v55 }
 0x277   : > { %v4480_v37 = vsel %vm2017_vm12, %v2027_v31, -inf  ;;  %v2039_v28 = vmax.f32 %v4464_v16, %v4472_v56  ;;  %v2040_v53 = vmax.f32 %v4466_v40, %v4474_v6  ;;  %v2041_v29 = vmax.f32 %v4468_v52, %v4476_v41 }
 0x278   : > { %v2042_v35 = vmax.f32 %v2038_v45, %v4478_v38 }
 0x279   : > { %v2043_v49 = vmax.f32 %v2039_v28, %v4480_v37  ;;  %v2045_v51 = vmax.f32 %v2040_v53, %v2041_v29 }
 0x27b   : > { %v2044_v33 = vmax.f32 %v2042_v35, %v2043_v49 }
 0x27d   : > { %v2046_v22 = vmax.f32 %v2044_v33, %v2045_v51 }
 0x27f   : > { %2047 = vmax.xlane.f32.xlu0 %v2046_v22 }
 0x30c   : > { %v2048_v18 = vpop.xlane.xlu0 %2047 }
 0x30d   : > { %v2049_v27 = vrot.slane %v2048_v18, 4 }
 0x30f   : > { %v2050_v5 = vmax.f32 %v2048_v18, %v2049_v27 }
 0x311   : > { %v2051_v50 = vrot.slane %v2050_v5, 2 }
 0x313   : > { %v2052_v3 = vmax.f32 %v2050_v5, %v2051_v50 }
 0x315   : > { %v2053_v59 = vrot.slane %v2052_v3, 1 }
 0x317   : > { %v2054_v58 = vmax.f32 %v2052_v3, %v2053_v59 }
 0x319   : > { %vm2055_vm13 = vcmp.eq.f32.partialorder %v4462_v47, %v2054_v58  ;;  %vm2056_vm14 = vcmp.eq.f32.partialorder %v4464_v16, %v2054_v58  ;;  %vm2057_vm15 = vcmp.eq.f32.partialorder %v4466_v40, %v2054_v58  ;;  %vm2058_vm0 = vcmp.eq.f32.partialorder %v4468_v52, %v2054_v58 }
 0x31a   : > { %vm2059_vm1 = vcmp.eq.f32.partialorder %v4470_v55, %v2054_v58  ;;  %vm2060_vm2 = vcmp.eq.f32.partialorder %v4472_v56, %v2054_v58  ;;  %vm2061_vm3 = vcmp.eq.f32.partialorder %v4474_v6, %v2054_v58  ;;  %vm2062_vm4 = vcmp.eq.f32.partialorder %v4476_v41, %v2054_v58 }
 0x31b   : > { %vm2063_vm5 = vcmp.eq.f32.partialorder %v4478_v38, %v2054_v58  ;;  %vm2064_vm6 = vcmp.eq.f32.partialorder %v4480_v37, %v2054_v58  ;;  %v2065_v14 = vsel %vm2055_vm13, %v4430_v32, 10240  ;;  %v2066_v26 = vsel %vm2056_vm14, %v4432_v12, 10240 }
 0x31c   : > { %v2067_v43 = vsel %vm2057_vm15, %v4434_v20, 10240  ;;  %v2068_v10 = vsel %vm2058_vm0, %v4436_v24, 10240  ;;  %v2069_v54 = vsel %vm2059_vm1, %v4438_v63, 10240  ;;  %v2070_v46 = vsel %vm2060_vm2, %v4440_v34, 10240 }
 0x31d   : > { %v2071_v61 = vsel %vm2061_vm3, %v4442_v30, 10240  ;;  %v2072_v19 = vsel %vm2062_vm4, %v4444_v7, 10240  ;;  %v2073_v62 = vsel %vm2063_vm5, %v4446_v57, 10240  ;;  %v2074_v21 = vsel %vm2064_vm6, %v4448_v25, 10240 }
 0x31e   : > { %vm2075_vm7 = vcmp.lt.s32.totalorder %v2065_v14, %v2069_v54  ;;  %vm2077_vm8 = vcmp.lt.s32.totalorder %v2066_v26, %v2070_v46  ;;  %vm2079_vm9 = vcmp.lt.s32.totalorder %v2067_v43, %v2071_v61  ;;  %vm2081_vm10 = vcmp.lt.s32.totalorder %v2068_v10, %v2072_v19 }
 0x31f   : > { %v2076_v13 = vsel %vm2075_vm7, %v2065_v14, %v2069_v54  ;;  %v2078_v11 = vsel %vm2077_vm8, %v2066_v26, %v2070_v46  ;;  %v2080_v23 = vsel %vm2079_vm9, %v2067_v43, %v2071_v61  ;;  %v2082_v15 = vsel %vm2081_vm10, %v2068_v10, %v2072_v19 }
 0x320   : > { %vm2083_vm11 = vcmp.lt.s32.totalorder %v2076_v13, %v2073_v62  ;;  %vm2085_vm12 = vcmp.lt.s32.totalorder %v2078_v11, %v2074_v21  ;;  %vm2089_vm13 = vcmp.lt.s32.totalorder %v2080_v23, %v2082_v15 }
 0x321   : > { %v2084_v17 = vsel %vm2083_vm11, %v2076_v13, %v2073_v62  ;;  %v2086_v36 = vsel %vm2085_vm12, %v2078_v11, %v2074_v21  ;;  %v2090_v60 = vsel %vm2089_vm13, %v2080_v23, %v2082_v15 }
 0x322   : > { %vm2087_vm14 = vcmp.lt.s32.totalorder %v2084_v17, %v2086_v36 }
 0x323   : > { %v2088_v2 = vsel %vm2087_vm14, %v2084_v17, %v2086_v36 }
 0x324   : > { %vm2091_vm15 = vcmp.lt.s32.totalorder %v2088_v2, %v2090_v60 }
 0x325   : > { %v2092_v8 = vsel %vm2091_vm15, %v2088_v2, %v2090_v60 }
 0x326   : > { %v2094_v48 = vshra.s32 %v2092_v8, 16  ;;  %v2093_v39 = vand.u32 65535, %v2092_v8 }
 0x328   : > { %v2096_v42 = vcvt.s32.f32 %v2094_v48  ;;  %v2095_v1 = vcvt.s32.f32 %v2093_v39 }
 0x32a   : > { %2097 = vmin.xlane.f32.xlu0 %v2096_v42 }
 0x3b7   : > { %v2098_v44 = vpop.xlane.xlu0 %2097 }
 0x3b8   : > { %vm2099_vm0 = vcmp.eq.f32.partialorder %v2096_v42, %v2098_v44  ;;  %v2104_v0 = vcvt.f32.s32 %v2098_v44 }
 0x3b9   : > { %v2100_v4 = vsel %vm2099_vm0, %v2095_v1, inf }
 0x3ba   : > { %2101 = vmin.xlane.f32.xlu1 %v2100_v4  ;;  %v2105_v45 = vshll.u32 %v2104_v0, 16 }
 0x447   : > { %v2102_v31 = vpop.xlane.xlu1 %2101 }
 0x448   : > { %v2103_v28 = vcvt.f32.s32 %v2102_v31 }
 0x44a   : > { %v2106_v53 = vadd.s32 %v2105_v45, %v2103_v28 }
 0x44c   : > { %v2107_v29 = vrot.slane %v2106_v53, 4 }
 0x44e   : > { %vm2108_vm1 = vcmp.lt.s32.totalorder %v2106_v53, %v2107_v29 }
 0x44f   : > { %v2109_v35 = vsel %vm2108_vm1, %v2106_v53, %v2107_v29 }
 0x450   : > { %v2110_v49 = vrot.slane %v2109_v35, 2 }
 0x452   : > { %vm2111_vm2 = vcmp.lt.s32.totalorder %v2109_v35, %v2110_v49 }
 0x453   : > { %v2112_v51 = vsel %vm2111_vm2, %v2109_v35, %v2110_v49 }
 0x454   : > { %v2113_v33 = vrot.slane %v2112_v51, 1 }
 0x456   : > { %vm2114_vm3 = vcmp.lt.s32.totalorder %v2112_v51, %v2113_v33 }
 0x457   : > { %v4512_v22 = vsel %vm2114_vm3, %v2112_v51, %v2113_v33 }
 0x458   : > { %vm2118_vm4 = vcmp.eq.s32.totalorder %v4430_v32, %v4512_v22  ;;  %vm2119_vm5 = vcmp.eq.s32.totalorder %v4432_v12, %v4512_v22  ;;  %vm2120_vm6 = vcmp.eq.s32.totalorder %v4434_v20, %v4512_v22  ;;  %vm2121_vm7 = vcmp.eq.s32.totalorder %v4436_v24, %v4512_v22 }
 0x459   : > { %vm2122_vm8 = vcmp.eq.s32.totalorder %v4438_v63, %v4512_v22  ;;  %vm2123_vm9 = vcmp.eq.s32.totalorder %v4440_v34, %v4512_v22  ;;  %vm2124_vm10 = vcmp.eq.s32.totalorder %v4442_v30, %v4512_v22  ;;  %vm2125_vm11 = vcmp.eq.s32.totalorder %v4444_v7, %v4512_v22 }
 0x45a   : > { %vm2126_vm12 = vcmp.eq.s32.totalorder %v4446_v57, %v4512_v22  ;;  %vm2127_vm13 = vcmp.eq.s32.totalorder %v4448_v25, %v4512_v22  ;;  %v4535_v18 = vsel %vm2118_vm4, -inf, %v4462_v47  ;;  %v4538_v27 = vsel %vm2119_vm5, -inf, %v4464_v16 }
 0x45b   : > { %v4541_v5 = vsel %vm2120_vm6, -inf, %v4466_v40  ;;  %v4544_v50 = vsel %vm2121_vm7, -inf, %v4468_v52  ;;  %v4547_v3 = vsel %vm2122_vm8, -inf, %v4470_v55  ;;  %v4550_v59 = vsel %vm2123_vm9, -inf, %v4472_v56 }
 0x45c   : > { %v4553_v58 = vsel %vm2124_vm10, -inf, %v4474_v6  ;;  %v4556_v47 = vsel %vm2125_vm11, -inf, %v4476_v41  ;;  %v2138_v16 = vmax.f32 %v4535_v18, %v4547_v3  ;;  %v2139_v40 = vmax.f32 %v4538_v27, %v4550_v59 }
 0x45d   : > { %v2140_v52 = vmax.f32 %v4541_v5, %v4553_v58  ;;  %v2141_v55 = vmax.f32 %v4544_v50, %v4556_v47  ;;  %v4567_v56 = vsel %vm2126_vm12, -inf, %v4478_v38  ;;  %v4570_v6 = vsel %vm2127_vm13, -inf, %v4480_v37 }
 0x45e   : > { %v2142_v41 = vmax.f32 %v2138_v16, %v4567_v56  ;;  %v2143_v14 = vmax.f32 %v2139_v40, %v4570_v6 }
 0x45f   : > { %v2145_v43 = vmax.f32 %v2140_v52, %v2141_v55 }
 0x460   : > { %v2144_v26 = vmax.f32 %v2142_v41, %v2143_v14 }
 0x462   : > { %v2146_v10 = vmax.f32 %v2144_v26, %v2145_v43 }
 0x464   : > { %2147 = vmax.xlane.f32.xlu1 %v2146_v10 }
 0x4f1   : > { %v2148_v54 = vpop.xlane.xlu1 %2147 }
 0x4f2   : > { %v2149_v46 = vrot.slane %v2148_v54, 4 }
 0x4f4   : > { %v2150_v61 = vmax.f32 %v2148_v54, %v2149_v46 }
 0x4f6   : > { %v2151_v19 = vrot.slane %v2150_v61, 2 }
 0x4f8   : > { %v2152_v62 = vmax.f32 %v2150_v61, %v2151_v19 }
 0x4fa   : > { %v2153_v21 = vrot.slane %v2152_v62, 1 }
 0x4fc   : > { %v2154_v13 = vmax.f32 %v2152_v62, %v2153_v21 }
 0x4fe   : > { %vm2155_vm14 = vcmp.eq.f32.partialorder %v4535_v18, %v2154_v13  ;;  %vm2156_vm15 = vcmp.eq.f32.partialorder %v4538_v27, %v2154_v13  ;;  %vm2157_vm0 = vcmp.eq.f32.partialorder %v4541_v5, %v2154_v13  ;;  %vm2158_vm1 = vcmp.eq.f32.partialorder %v4544_v50, %v2154_v13 }
 0x4ff   : > { %vm2159_vm2 = vcmp.eq.f32.partialorder %v4547_v3, %v2154_v13  ;;  %vm2160_vm3 = vcmp.eq.f32.partialorder %v4550_v59, %v2154_v13  ;;  %vm2161_vm4 = vcmp.eq.f32.partialorder %v4553_v58, %v2154_v13  ;;  %vm2162_vm5 = vcmp.eq.f32.partialorder %v4556_v47, %v2154_v13 }
 0x500   : > { %vm2163_vm6 = vcmp.eq.f32.partialorder %v4567_v56, %v2154_v13  ;;  %vm2164_vm7 = vcmp.eq.f32.partialorder %v4570_v6, %v2154_v13  ;;  %v2165_v38 = vsel %vm2155_vm14, %v4430_v32, 10240  ;;  %v2166_v37 = vsel %vm2156_vm15, %v4432_v12, 10240 }
 0x501   : > { %v2167_v11 = vsel %vm2157_vm0, %v4434_v20, 10240  ;;  %v2168_v23 = vsel %vm2158_vm1, %v4436_v24, 10240  ;;  %v2169_v15 = vsel %vm2159_vm2, %v4438_v63, 10240  ;;  %v2170_v17 = vsel %vm2160_vm3, %v4440_v34, 10240 }
 0x502   : > { %v2171_v36 = vsel %vm2161_vm4, %v4442_v30, 10240  ;;  %v2172_v2 = vsel %vm2162_vm5, %v4444_v7, 10240  ;;  %v2173_v60 = vsel %vm2163_vm6, %v4446_v57, 10240  ;;  %v2174_v8 = vsel %vm2164_vm7, %v4448_v25, 10240 }
 0x503   : > { %vm2175_vm8 = vcmp.lt.s32.totalorder %v2165_v38, %v2169_v15  ;;  %vm2177_vm9 = vcmp.lt.s32.totalorder %v2166_v37, %v2170_v17  ;;  %vm2179_vm10 = vcmp.lt.s32.totalorder %v2167_v11, %v2171_v36  ;;  %vm2181_vm11 = vcmp.lt.s32.totalorder %v2168_v23, %v2172_v2 }
 0x504   : > { %v2176_v48 = vsel %vm2175_vm8, %v2165_v38, %v2169_v15  ;;  %v2178_v42 = vsel %vm2177_vm9, %v2166_v37, %v2170_v17  ;;  %v2180_v39 = vsel %vm2179_vm10, %v2167_v11, %v2171_v36  ;;  %v2182_v44 = vsel %vm2181_vm11, %v2168_v23, %v2172_v2 }
 0x505   : > { %vm2183_vm12 = vcmp.lt.s32.totalorder %v2176_v48, %v2173_v60  ;;  %vm2185_vm13 = vcmp.lt.s32.totalorder %v2178_v42, %v2174_v8  ;;  %vm2189_vm14 = vcmp.lt.s32.totalorder %v2180_v39, %v2182_v44  ;;  %vm2116_vm5 = vcmp.eq.s32.totalorder %v4418_v9, 0 }
 0x506   : > { %v2184_v1 = vsel %vm2183_vm12, %v2176_v48, %v2173_v60  ;;  %v2186_v4 = vsel %vm2185_vm13, %v2178_v42, %v2174_v8  ;;  %v2190_v31 = vsel %vm2189_vm14, %v2180_v39, %v2182_v44  ;;  %vm2216_vm6 = vcmp.eq.s32.totalorder %v4418_v9, 1 }
 0x507   : > { %vm2187_vm15 = vcmp.lt.s32.totalorder %v2184_v1, %v2186_v4 }
 0x508   : > { %v2188_v0 = vsel %vm2187_vm15, %v2184_v1, %v2186_v4 }
 0x509   : > { %vm2191_vm0 = vcmp.lt.s32.totalorder %v2188_v0, %v2190_v31 }
 0x50a   : > { %v2192_v45 = vsel %vm2191_vm0, %v2188_v0, %v2190_v31 }
 0x50b   : > { %v2194_v28 = vshra.s32 %v2192_v45, 16  ;;  %v2193_v29 = vand.u32 65535, %v2192_v45 }
 0x50d   : > { %v2196_v53 = vcvt.s32.f32 %v2194_v28  ;;  %v2195_v49 = vcvt.s32.f32 %v2193_v29 }
 0x50f   : > { %2197 = vmin.xlane.f32.xlu0 %v2196_v53 }
 0x59c   : > { %v2198_v35 = vpop.xlane.xlu0 %2197 }
 0x59d   : > { %vm2199_vm1 = vcmp.eq.f32.partialorder %v2196_v53, %v2198_v35  ;;  %v2204_v33 = vcvt.f32.s32 %v2198_v35 }
 0x59e   : > { %v2200_v51 = vsel %vm2199_vm1, %v2195_v49, inf }
 0x59f   : > { %2201 = vmin.xlane.f32.xlu1 %v2200_v51  ;;  %v2205_v40 = vshll.u32 %v2204_v33, 16 }
 0x62c   : > { %v2202_v16 = vpop.xlane.xlu1 %2201 }
 0x62d   : > { %v2203_v52 = vcvt.f32.s32 %v2202_v16 }
 0x62f   : > { %v2206_v55 = vadd.s32 %v2205_v40, %v2203_v52 }
 0x631   : > { %v2207_v41 = vrot.slane %v2206_v55, 4 }
 0x633   : > { %vm2208_vm2 = vcmp.lt.s32.totalorder %v2206_v55, %v2207_v41 }
 0x634   : > { %v2209_v14 = vsel %vm2208_vm2, %v2206_v55, %v2207_v41 }
 0x635   : > { %v2210_v26 = vrot.slane %v2209_v14, 2 }
 0x637   : > { %vm2211_vm3 = vcmp.lt.s32.totalorder %v2209_v14, %v2210_v26 }
 0x638   : > { %v2212_v43 = vsel %vm2211_vm3, %v2209_v14, %v2210_v26 }
 0x639   : > { %v2213_v10 = vrot.slane %v2212_v43, 1 }
 0x63b   : > { %vm2214_vm4 = vcmp.lt.s32.totalorder %v2212_v43, %v2213_v10 }
 0x63c   : > { %v2215_v54 = vsel %vm2214_vm4, %v2212_v43, %v2213_v10 }
 0x63d   : > { %vm2218_vm7 = vcmp.eq.s32.totalorder %v4430_v32, %v2215_v54  ;;  %vm2219_vm8 = vcmp.eq.s32.totalorder %v4432_v12, %v2215_v54  ;;  %vm2220_vm9 = vcmp.eq.s32.totalorder %v4434_v20, %v2215_v54  ;;  %vm2221_vm10 = vcmp.eq.s32.totalorder %v4436_v24, %v2215_v54 }
 0x63e   : > { %vm2222_vm11 = vcmp.eq.s32.totalorder %v4438_v63, %v2215_v54  ;;  %vm2223_vm12 = vcmp.eq.s32.totalorder %v4440_v34, %v2215_v54  ;;  %vm2224_vm13 = vcmp.eq.s32.totalorder %v4442_v30, %v2215_v54  ;;  %vm2225_vm14 = vcmp.eq.s32.totalorder %v4444_v7, %v2215_v54 }
 0x63f   : > { %vm2226_vm15 = vcmp.eq.s32.totalorder %v4446_v57, %v2215_v54  ;;  %vm2227_vm0 = vcmp.eq.s32.totalorder %v4448_v25, %v2215_v54  ;;  %v4607_v46 = vsel %vm2218_vm7, -inf, %v4535_v18  ;;  %v4610_v61 = vsel %vm2219_vm8, -inf, %v4538_v27 }
 0x640   : > { %v4613_v19 = vsel %vm2220_vm9, -inf, %v4541_v5  ;;  %v4616_v62 = vsel %vm2221_vm10, -inf, %v4544_v50  ;;  %v4619_v21 = vsel %vm2222_vm11, -inf, %v4547_v3  ;;  %v4622_v13 = vsel %vm2223_vm12, -inf, %v4550_v59 }
 0x641   : > { %v4625_v38 = vsel %vm2224_vm13, -inf, %v4553_v58  ;;  %v4628_v18 = vsel %vm2225_vm14, -inf, %v4556_v47  ;;  %v2117_v27 = vsel %vm2116_vm5, %v4512_v22, 0  ;;  %v2238_v5 = vmax.f32 %v4607_v46, %v4619_v21 }
 0x642   : > { %v2239_v50 = vmax.f32 %v4610_v61, %v4622_v13  ;;  %v2240_v3 = vmax.f32 %v4613_v19, %v4625_v38  ;;  %v2241_v59 = vmax.f32 %v4616_v62, %v4628_v18  ;;  %v4642_v58 = vsel %vm2226_vm15, -inf, %v4567_v56 }
 0x643   : > { %v4645_v47 = vsel %vm2227_vm0, -inf, %v4570_v6  ;;  %v4649_v22 = vsel %vm2216_vm6, %v2215_v54, %v2117_v27  ;;  %v2242_v37 = vmax.f32 %v2238_v5, %v4642_v58 }
 0x644   : > { %v2243_v11 = vmax.f32 %v2239_v50, %v4645_v47  ;;  %v2245_v15 = vmax.f32 %v2240_v3, %v2241_v59 }
 0x646   : > { %v2244_v23 = vmax.f32 %v2242_v37, %v2243_v11 }
 0x648   : > { %v2246_v17 = vmax.f32 %v2244_v23, %v2245_v15 }
 0x64a   : > { %2247 = vmax.xlane.f32.xlu0 %v2246_v17 }
 0x6d7   : > { %v2248_v36 = vpop.xlane.xlu0 %2247 }
 0x6d8   : > { %v2249_v2 = vrot.slane %v2248_v36, 4 }
 0x6da   : > { %v2250_v60 = vmax.f32 %v2248_v36, %v2249_v2 }
 0x6dc   : > { %v2251_v56 = vrot.slane %v2250_v60, 2 }
 0x6de   : > { %v2252_v8 = vmax.f32 %v2250_v60, %v2251_v56 }
 0x6e0   : > { %v2253_v48 = vrot.slane %v2252_v8, 1 }
 0x6e2   : > { %v2254_v6 = vmax.f32 %v2252_v8, %v2253_v48 }
 0x6e4   : > { %vm2255_vm1 = vcmp.eq.f32.partialorder %v4607_v46, %v2254_v6  ;;  %vm2256_vm2 = vcmp.eq.f32.partialorder %v4610_v61, %v2254_v6  ;;  %vm2257_vm3 = vcmp.eq.f32.partialorder %v4613_v19, %v2254_v6  ;;  %vm2258_vm4 = vcmp.eq.f32.partialorder %v4616_v62, %v2254_v6 }
 0x6e5   : > { %vm2259_vm5 = vcmp.eq.f32.partialorder %v4619_v21, %v2254_v6  ;;  %vm2260_vm6 = vcmp.eq.f32.partialorder %v4622_v13, %v2254_v6  ;;  %vm2261_vm7 = vcmp.eq.f32.partialorder %v4625_v38, %v2254_v6  ;;  %vm2262_vm8 = vcmp.eq.f32.partialorder %v4628_v18, %v2254_v6 }
 0x6e6   : > { %vm2263_vm9 = vcmp.eq.f32.partialorder %v4642_v58, %v2254_v6  ;;  %vm2264_vm10 = vcmp.eq.f32.partialorder %v4645_v47, %v2254_v6  ;;  %v2265_v42 = vsel %vm2255_vm1, %v4430_v32, 10240  ;;  %v2266_v39 = vsel %vm2256_vm2, %v4432_v12, 10240 }
 0x6e7   : > { %v2267_v44 = vsel %vm2257_vm3, %v4434_v20, 10240  ;;  %v2268_v1 = vsel %vm2258_vm4, %v4436_v24, 10240  ;;  %v2269_v4 = vsel %vm2259_vm5, %v4438_v63, 10240  ;;  %v2270_v0 = vsel %vm2260_vm6, %v4440_v34, 10240 }
 0x6e8   : > { %v2271_v31 = vsel %vm2261_vm7, %v4442_v30, 10240  ;;  %v2272_v45 = vsel %vm2262_vm8, %v4444_v7, 10240  ;;  %v2273_v28 = vsel %vm2263_vm9, %v4446_v57, 10240  ;;  %v2274_v53 = vsel %vm2264_vm10, %v4448_v25, 10240 }
 0x6e9   : > { %vm2275_vm11 = vcmp.lt.s32.totalorder %v2265_v42, %v2269_v4  ;;  %vm2277_vm12 = vcmp.lt.s32.totalorder %v2266_v39, %v2270_v0  ;;  %vm2279_vm13 = vcmp.lt.s32.totalorder %v2267_v44, %v2271_v31  ;;  %vm2281_vm14 = vcmp.lt.s32.totalorder %v2268_v1, %v2272_v45 }
 0x6ea   : > { %v2276_v29 = vsel %vm2275_vm11, %v2265_v42, %v2269_v4  ;;  %v2278_v35 = vsel %vm2277_vm12, %v2266_v39, %v2270_v0  ;;  %v2280_v49 = vsel %vm2279_vm13, %v2267_v44, %v2271_v31  ;;  %v2282_v51 = vsel %vm2281_vm14, %v2268_v1, %v2272_v45 }
 0x6eb   : > { %vm2283_vm15 = vcmp.lt.s32.totalorder %v2276_v29, %v2273_v28  ;;  %vm2285_vm0 = vcmp.lt.s32.totalorder %v2278_v35, %v2274_v53  ;;  %vm2289_vm1 = vcmp.lt.s32.totalorder %v2280_v49, %v2282_v51  ;;  %vm2316_vm8 = vcmp.eq.s32.totalorder %v4418_v9, 2 }
 0x6ec   : > { %v2284_v33 = vsel %vm2283_vm15, %v2276_v29, %v2273_v28  ;;  %v2286_v16 = vsel %vm2285_vm0, %v2278_v35, %v2274_v53  ;;  %v2290_v52 = vsel %vm2289_vm1, %v2280_v49, %v2282_v51 }
 0x6ed   : > { %vm2287_vm2 = vcmp.lt.s32.totalorder %v2284_v33, %v2286_v16 }
 0x6ee   : > { %v2288_v40 = vsel %vm2287_vm2, %v2284_v33, %v2286_v16 }
 0x6ef   : > { %vm2291_vm3 = vcmp.lt.s32.totalorder %v2288_v40, %v2290_v52 }
 0x6f0   : > { %v2292_v55 = vsel %vm2291_vm3, %v2288_v40, %v2290_v52 }
 0x6f1   : > { %v2294_v41 = vshra.s32 %v2292_v55, 16  ;;  %v2293_v26 = vand.u32 65535, %v2292_v55 }
 0x6f3   : > { %v2296_v14 = vcvt.s32.f32 %v2294_v41  ;;  %v2295_v10 = vcvt.s32.f32 %v2293_v26 }
 0x6f5   : > { %2297 = vmin.xlane.f32.xlu1 %v2296_v14 }
 0x782   : > { %v2298_v43 = vpop.xlane.xlu1 %2297 }
 0x783   : > { %vm2299_vm4 = vcmp.eq.f32.partialorder %v2296_v14, %v2298_v43  ;;  %v2304_v27 = vcvt.f32.s32 %v2298_v43 }
 0x784   : > { %v2300_v54 = vsel %vm2299_vm4, %v2295_v10, inf }
 0x785   : > { %2301 = vmin.xlane.f32.xlu0 %v2300_v54  ;;  %v2305_v50 = vshll.u32 %v2304_v27, 16 }
 0x812   : > { %v2302_v5 = vpop.xlane.xlu0 %2301 }
 0x813   : > { %v2303_v3 = vcvt.f32.s32 %v2302_v5 }
 0x815   : > { %v2306_v59 = vadd.s32 %v2305_v50, %v2303_v3 }
 0x817   : > { %v2307_v37 = vrot.slane %v2306_v59, 4 }
 0x819   : > { %vm2308_vm5 = vcmp.lt.s32.totalorder %v2306_v59, %v2307_v37 }
 0x81a   : > { %v2309_v11 = vsel %vm2308_vm5, %v2306_v59, %v2307_v37 }
 0x81b   : > { %v2310_v23 = vrot.slane %v2309_v11, 2 }
 0x81d   : > { %vm2311_vm6 = vcmp.lt.s32.totalorder %v2309_v11, %v2310_v23 }
 0x81e   : > { %v2312_v15 = vsel %vm2311_vm6, %v2309_v11, %v2310_v23 }
 0x81f   : > { %v2313_v17 = vrot.slane %v2312_v15, 1 }
 0x821   : > { %vm2314_vm7 = vcmp.lt.s32.totalorder %v2312_v15, %v2313_v17 }
 0x822   : > { %v2315_v36 = vsel %vm2314_vm7, %v2312_v15, %v2313_v17 }
 0x823   : > { %vm2318_vm9 = vcmp.eq.s32.totalorder %v4430_v32, %v2315_v36  ;;  %vm2319_vm10 = vcmp.eq.s32.totalorder %v4432_v12, %v2315_v36  ;;  %vm2320_vm11 = vcmp.eq.s32.totalorder %v4434_v20, %v2315_v36  ;;  %vm2321_vm12 = vcmp.eq.s32.totalorder %v4436_v24, %v2315_v36 }
 0x824   : > { %vm2322_vm13 = vcmp.eq.s32.totalorder %v4438_v63, %v2315_v36  ;;  %vm2323_vm14 = vcmp.eq.s32.totalorder %v4440_v34, %v2315_v36  ;;  %vm2324_vm15 = vcmp.eq.s32.totalorder %v4442_v30, %v2315_v36  ;;  %vm2325_vm0 = vcmp.eq.s32.totalorder %v4444_v7, %v2315_v36 }
 0x825   : > { %vm2326_vm1 = vcmp.eq.s32.totalorder %v4446_v57, %v2315_v36  ;;  %vm2327_vm2 = vcmp.eq.s32.totalorder %v4448_v25, %v2315_v36  ;;  %v4685_v2 = vsel %vm2318_vm9, -inf, %v4607_v46  ;;  %v4688_v60 = vsel %vm2319_vm10, -inf, %v4610_v61 }
 0x826   : > { %v4691_v56 = vsel %vm2320_vm11, -inf, %v4613_v19  ;;  %v4694_v8 = vsel %vm2321_vm12, -inf, %v4616_v62  ;;  %v4697_v48 = vsel %vm2322_vm13, -inf, %v4619_v21  ;;  %v4700_v6 = vsel %vm2323_vm14, -inf, %v4622_v13 }
 0x827   : > { %v4703_v42 = vsel %vm2324_vm15, -inf, %v4625_v38  ;;  %v4706_v46 = vsel %vm2325_vm0, -inf, %v4628_v18  ;;  %v2338_v61 = vmax.f32 %v4685_v2, %v4697_v48  ;;  %v2339_v19 = vmax.f32 %v4688_v60, %v4700_v6 }
 0x828   : > { %v2340_v62 = vmax.f32 %v4691_v56, %v4703_v42  ;;  %v2341_v21 = vmax.f32 %v4694_v8, %v4706_v46  ;;  %v4717_v13 = vsel %vm2326_vm1, -inf, %v4642_v58  ;;  %v4720_v38 = vsel %vm2327_vm2, -inf, %v4645_v47 }
 0x829   : > { %v4725_v18 = vsel %vm2316_vm8, %v2315_v36, %v4649_v22  ;;  %v2342_v39 = vmax.f32 %v2338_v61, %v4717_v13  ;;  %v2343_v44 = vmax.f32 %v2339_v19, %v4720_v38 }
 0x82a   : > { %v2345_v4 = vmax.f32 %v2340_v62, %v2341_v21 }
 0x82b   : > { %v2344_v1 = vmax.f32 %v2342_v39, %v2343_v44 }
 0x82d   : > { %v2346_v0 = vmax.f32 %v2344_v1, %v2345_v4 }
 0x82f   : > { %2347 = vmax.xlane.f32.xlu1 %v2346_v0 }
 0x8bc   : > { %v2348_v31 = vpop.xlane.xlu1 %2347 }
 0x8bd   : > { %v2349_v45 = vrot.slane %v2348_v31, 4 }
 0x8bf   : > { %v2350_v58 = vmax.f32 %v2348_v31, %v2349_v45 }
 0x8c1   : > { %v2351_v28 = vrot.slane %v2350_v58, 2 }
 0x8c3   : > { %v2352_v53 = vmax.f32 %v2350_v58, %v2351_v28 }
 0x8c5   : > { %v2353_v47 = vrot.slane %v2352_v53, 1 }
 0x8c7   : > { %v2354_v29 = vmax.f32 %v2352_v53, %v2353_v47 }
 0x8c9   : > { %vm2355_vm3 = vcmp.eq.f32.partialorder %v4685_v2, %v2354_v29  ;;  %vm2356_vm4 = vcmp.eq.f32.partialorder %v4688_v60, %v2354_v29  ;;  %vm2357_vm5 = vcmp.eq.f32.partialorder %v4691_v56, %v2354_v29  ;;  %vm2358_vm6 = vcmp.eq.f32.partialorder %v4694_v8, %v2354_v29 }
 0x8ca   : > { %vm2359_vm7 = vcmp.eq.f32.partialorder %v4697_v48, %v2354_v29  ;;  %vm2360_vm8 = vcmp.eq.f32.partialorder %v4700_v6, %v2354_v29  ;;  %vm2361_vm9 = vcmp.eq.f32.partialorder %v4703_v42, %v2354_v29  ;;  %vm2362_vm10 = vcmp.eq.f32.partialorder %v4706_v46, %v2354_v29 }
 0x8cb   : > { %vm2363_vm11 = vcmp.eq.f32.partialorder %v4717_v13, %v2354_v29  ;;  %vm2364_vm12 = vcmp.eq.f32.partialorder %v4720_v38, %v2354_v29  ;;  %v2365_v22 = vsel %vm2355_vm3, %v4430_v32, 10240  ;;  %v2366_v35 = vsel %vm2356_vm4, %v4432_v12, 10240 }
 0x8cc   : > { %v2367_v49 = vsel %vm2357_vm5, %v4434_v20, 10240  ;;  %v2368_v51 = vsel %vm2358_vm6, %v4436_v24, 10240  ;;  %v2369_v33 = vsel %vm2359_vm7, %v4438_v63, 10240  ;;  %v2370_v16 = vsel %vm2360_vm8, %v4440_v34, 10240 }
 0x8cd   : > { %v2371_v40 = vsel %vm2361_vm9, %v4442_v30, 10240  ;;  %v2372_v52 = vsel %vm2362_vm10, %v4444_v7, 10240  ;;  %v2373_v55 = vsel %vm2363_vm11, %v4446_v57, 10240  ;;  %v2374_v41 = vsel %vm2364_vm12, %v4448_v25, 10240 }
 0x8ce   : > { %vm2375_vm13 = vcmp.lt.s32.totalorder %v2365_v22, %v2369_v33  ;;  %vm2377_vm14 = vcmp.lt.s32.totalorder %v2366_v35, %v2370_v16  ;;  %vm2379_vm15 = vcmp.lt.s32.totalorder %v2367_v49, %v2371_v40  ;;  %vm2381_vm0 = vcmp.lt.s32.totalorder %v2368_v51, %v2372_v52 }
 0x8cf   : > { %v2376_v14 = vsel %vm2375_vm13, %v2365_v22, %v2369_v33  ;;  %v2378_v26 = vsel %vm2377_vm14, %v2366_v35, %v2370_v16  ;;  %v2380_v43 = vsel %vm2379_vm15, %v2367_v49, %v2371_v40  ;;  %v2382_v10 = vsel %vm2381_vm0, %v2368_v51, %v2372_v52 }
 0x8d0   : > { %vm2383_vm1 = vcmp.lt.s32.totalorder %v2376_v14, %v2373_v55  ;;  %vm2385_vm2 = vcmp.lt.s32.totalorder %v2378_v26, %v2374_v41  ;;  %vm2389_vm3 = vcmp.lt.s32.totalorder %v2380_v43, %v2382_v10  ;;  %vm2416_vm10 = vcmp.eq.s32.totalorder %v4418_v9, 3 }
 0x8d1   : > { %v2384_v54 = vsel %vm2383_vm1, %v2376_v14, %v2373_v55  ;;  %v2386_v27 = vsel %vm2385_vm2, %v2378_v26, %v2374_v41  ;;  %v2390_v50 = vsel %vm2389_vm3, %v2380_v43, %v2382_v10 }
 0x8d2   : > { %vm2387_vm4 = vcmp.lt.s32.totalorder %v2384_v54, %v2386_v27 }
 0x8d3   : > { %v2388_v5 = vsel %vm2387_vm4, %v2384_v54, %v2386_v27 }
 0x8d4   : > { %vm2391_vm5 = vcmp.lt.s32.totalorder %v2388_v5, %v2390_v50 }
 0x8d5   : > { %v2392_v3 = vsel %vm2391_vm5, %v2388_v5, %v2390_v50 }
 0x8d6   : > { %v2394_v59 = vshra.s32 %v2392_v3, 16  ;;  %v2393_v11 = vand.u32 65535, %v2392_v3 }
 0x8d8   : > { %v2396_v37 = vcvt.s32.f32 %v2394_v59  ;;  %v2395_v15 = vcvt.s32.f32 %v2393_v11 }
 0x8da   : > { %2397 = vmin.xlane.f32.xlu0 %v2396_v37 }
 0x967   : > { %v2398_v23 = vpop.xlane.xlu0 %2397 }
 0x968   : > { %vm2399_vm6 = vcmp.eq.f32.partialorder %v2396_v37, %v2398_v23  ;;  %v2404_v36 = vcvt.f32.s32 %v2398_v23 }
 0x969   : > { %v2400_v17 = vsel %vm2399_vm6, %v2395_v15, inf }
 0x96a   : > { %2401 = vmin.xlane.f32.xlu1 %v2400_v17  ;;  %v2405_v19 = vshll.u32 %v2404_v36, 16 }
 0x9f7   : > { %v2402_v61 = vpop.xlane.xlu1 %2401 }
 0x9f8   : > { %v2403_v62 = vcvt.f32.s32 %v2402_v61 }
 0x9fa   : > { %v2406_v21 = vadd.s32 %v2405_v19, %v2403_v62 }
 0x9fc   : > { %v2407_v39 = vrot.slane %v2406_v21, 4 }
 0x9fe   : > { %vm2408_vm7 = vcmp.lt.s32.totalorder %v2406_v21, %v2407_v39 }
 0x9ff   : > { %v2409_v44 = vsel %vm2408_vm7, %v2406_v21, %v2407_v39 }
 0xa00   : > { %v2410_v1 = vrot.slane %v2409_v44, 2 }
 0xa02   : > { %vm2411_vm8 = vcmp.lt.s32.totalorder %v2409_v44, %v2410_v1 }
 0xa03   : > { %v2412_v4 = vsel %vm2411_vm8, %v2409_v44, %v2410_v1 }
 0xa04   : > { %v2413_v0 = vrot.slane %v2412_v4, 1 }
 0xa06   : > { %vm2414_vm9 = vcmp.lt.s32.totalorder %v2412_v4, %v2413_v0 }
 0xa07   : > { %v2415_v31 = vsel %vm2414_vm9, %v2412_v4, %v2413_v0 }
 0xa08   : > { %vm2418_vm11 = vcmp.eq.s32.totalorder %v4430_v32, %v2415_v31  ;;  %vm2419_vm12 = vcmp.eq.s32.totalorder %v4432_v12, %v2415_v31  ;;  %vm2420_vm13 = vcmp.eq.s32.totalorder %v4434_v20, %v2415_v31  ;;  %vm2421_vm14 = vcmp.eq.s32.totalorder %v4436_v24, %v2415_v31 }
 0xa09   : > { %vm2422_vm15 = vcmp.eq.s32.totalorder %v4438_v63, %v2415_v31  ;;  %vm2423_vm0 = vcmp.eq.s32.totalorder %v4440_v34, %v2415_v31  ;;  %vm2424_vm1 = vcmp.eq.s32.totalorder %v4442_v30, %v2415_v31  ;;  %vm2425_vm2 = vcmp.eq.s32.totalorder %v4444_v7, %v2415_v31 }
 0xa0a   : > { %vm2426_vm3 = vcmp.eq.s32.totalorder %v4446_v57, %v2415_v31  ;;  %vm2427_vm4 = vcmp.eq.s32.totalorder %v4448_v25, %v2415_v31  ;;  %v4761_v45 = vsel %vm2418_vm11, -inf, %v4685_v2  ;;  %v4764_v58 = vsel %vm2419_vm12, -inf, %v4688_v60 }
 0xa0b   : > { %v4767_v28 = vsel %vm2420_vm13, -inf, %v4691_v56  ;;  %v4770_v53 = vsel %vm2421_vm14, -inf, %v4694_v8  ;;  %v4773_v47 = vsel %vm2422_vm15, -inf, %v4697_v48  ;;  %v4776_v29 = vsel %vm2423_vm0, -inf, %v4700_v6 }
 0xa0c   : > { %v4779_v22 = vsel %vm2424_vm1, -inf, %v4703_v42  ;;  %v4782_v2 = vsel %vm2425_vm2, -inf, %v4706_v46  ;;  %v2438_v60 = vmax.f32 %v4761_v45, %v4773_v47  ;;  %v2439_v56 = vmax.f32 %v4764_v58, %v4776_v29 }
 0xa0d   : > { %v2440_v8 = vmax.f32 %v4767_v28, %v4779_v22  ;;  %v2441_v48 = vmax.f32 %v4770_v53, %v4782_v2  ;;  %v4793_v6 = vsel %vm2426_vm3, -inf, %v4717_v13  ;;  %v4796_v42 = vsel %vm2427_vm4, -inf, %v4720_v38 }
 0xa0e   : > { %v4801_v46 = vsel %vm2416_vm10, %v2415_v31, %v4725_v18  ;;  %v2442_v35 = vmax.f32 %v2438_v60, %v4793_v6  ;;  %v2443_v49 = vmax.f32 %v2439_v56, %v4796_v42 }
 0xa0f   : > { %v2445_v33 = vmax.f32 %v2440_v8, %v2441_v48 }
 0xa10   : > { %v2444_v51 = vmax.f32 %v2442_v35, %v2443_v49 }
 0xa12   : > { %v2446_v16 = vmax.f32 %v2444_v51, %v2445_v33 }
 0xa14   : > { %2447 = vmax.xlane.f32.xlu0 %v2446_v16 }
 0xaa1   : > { %v2448_v40 = vpop.xlane.xlu0 %2447 }
 0xaa2   : > { %v2449_v52 = vrot.slane %v2448_v40, 4 }
 0xaa4   : > { %v2450_v13 = vmax.f32 %v2448_v40, %v2449_v52 }
 0xaa6   : > { %v2451_v55 = vrot.slane %v2450_v13, 2 }
 0xaa8   : > { %v2452_v41 = vmax.f32 %v2450_v13, %v2451_v55 }
 0xaaa   : > { %v2453_v38 = vrot.slane %v2452_v41, 1 }
 0xaac   : > { %v2454_v14 = vmax.f32 %v2452_v41, %v2453_v38 }
 0xaae   : > { %vm2455_vm5 = vcmp.eq.f32.partialorder %v4761_v45, %v2454_v14  ;;  %vm2456_vm6 = vcmp.eq.f32.partialorder %v4764_v58, %v2454_v14  ;;  %vm2457_vm7 = vcmp.eq.f32.partialorder %v4767_v28, %v2454_v14  ;;  %vm2458_vm8 = vcmp.eq.f32.partialorder %v4770_v53, %v2454_v14 }
 0xaaf   : > { %vm2459_vm9 = vcmp.eq.f32.partialorder %v4773_v47, %v2454_v14  ;;  %vm2460_vm10 = vcmp.eq.f32.partialorder %v4776_v29, %v2454_v14  ;;  %vm2461_vm11 = vcmp.eq.f32.partialorder %v4779_v22, %v2454_v14  ;;  %vm2462_vm12 = vcmp.eq.f32.partialorder %v4782_v2, %v2454_v14 }
 0xab0   : > { %vm2463_vm13 = vcmp.eq.f32.partialorder %v4793_v6, %v2454_v14  ;;  %vm2464_vm14 = vcmp.eq.f32.partialorder %v4796_v42, %v2454_v14  ;;  %v2465_v18 = vsel %vm2455_vm5, %v4430_v32, 10240  ;;  %v2466_v26 = vsel %vm2456_vm6, %v4432_v12, 10240 }
 0xab1   : > { %v2467_v43 = vsel %vm2457_vm7, %v4434_v20, 10240  ;;  %v2468_v10 = vsel %vm2458_vm8, %v4436_v24, 10240  ;;  %v2469_v54 = vsel %vm2459_vm9, %v4438_v63, 10240  ;;  %v2470_v27 = vsel %vm2460_vm10, %v4440_v34, 10240 }
 0xab2   : > { %v2471_v5 = vsel %vm2461_vm11, %v4442_v30, 10240  ;;  %v2472_v50 = vsel %vm2462_vm12, %v4444_v7, 10240  ;;  %v2473_v3 = vsel %vm2463_vm13, %v4446_v57, 10240  ;;  %v2474_v59 = vsel %vm2464_vm14, %v4448_v25, 10240 }
 0xab3   : > { %vm2475_vm15 = vcmp.lt.s32.totalorder %v2465_v18, %v2469_v54  ;;  %vm2477_vm0 = vcmp.lt.s32.totalorder %v2466_v26, %v2470_v27  ;;  %vm2479_vm1 = vcmp.lt.s32.totalorder %v2467_v43, %v2471_v5  ;;  %vm2481_vm2 = vcmp.lt.s32.totalorder %v2468_v10, %v2472_v50 }
 0xab4   : > { %v2476_v37 = vsel %vm2475_vm15, %v2465_v18, %v2469_v54  ;;  %v2478_v11 = vsel %vm2477_vm0, %v2466_v26, %v2470_v27  ;;  %v2480_v23 = vsel %vm2479_vm1, %v2467_v43, %v2471_v5  ;;  %v2482_v15 = vsel %vm2481_vm2, %v2468_v10, %v2472_v50 }
 0xab5   : > { %vm2483_vm3 = vcmp.lt.s32.totalorder %v2476_v37, %v2473_v3  ;;  %vm2485_vm4 = vcmp.lt.s32.totalorder %v2478_v11, %v2474_v59  ;;  %vm2489_vm5 = vcmp.lt.s32.totalorder %v2480_v23, %v2482_v15  ;;  %vm2516_vm12 = vcmp.eq.s32.totalorder %v4418_v9, 4 }
 0xab6   : > { %v2484_v17 = vsel %vm2483_vm3, %v2476_v37, %v2473_v3  ;;  %v2486_v36 = vsel %vm2485_vm4, %v2478_v11, %v2474_v59  ;;  %v2490_v19 = vsel %vm2489_vm5, %v2480_v23, %v2482_v15 }
 0xab7   : > { %vm2487_vm6 = vcmp.lt.s32.totalorder %v2484_v17, %v2486_v36 }
 0xab8   : > { %v2488_v61 = vsel %vm2487_vm6, %v2484_v17, %v2486_v36 }
 0xab9   : > { %vm2491_vm7 = vcmp.lt.s32.totalorder %v2488_v61, %v2490_v19 }
 0xaba   : > { %v2492_v62 = vsel %vm2491_vm7, %v2488_v61, %v2490_v19 }
 0xabb   : > { %v2494_v21 = vshra.s32 %v2492_v62, 16  ;;  %v2493_v44 = vand.u32 65535, %v2492_v62 }
 0xabd   : > { %v2496_v39 = vcvt.s32.f32 %v2494_v21  ;;  %v2495_v4 = vcvt.s32.f32 %v2493_v44 }
 0xabf   : > { %2497 = vmin.xlane.f32.xlu1 %v2496_v39 }
 0xb4c   : > { %v2498_v1 = vpop.xlane.xlu1 %2497 }
 0xb4d   : > { %vm2499_vm8 = vcmp.eq.f32.partialorder %v2496_v39, %v2498_v1  ;;  %v2504_v31 = vcvt.f32.s32 %v2498_v1 }
 0xb4e   : > { %v2500_v0 = vsel %vm2499_vm8, %v2495_v4, inf }
 0xb4f   : > { %2501 = vmin.xlane.f32.xlu0 %v2500_v0  ;;  %v2505_v56 = vshll.u32 %v2504_v31, 16 }
 0xbdc   : > { %v2502_v60 = vpop.xlane.xlu0 %2501 }
 0xbdd   : > { %v2503_v8 = vcvt.f32.s32 %v2502_v60 }
 0xbdf   : > { %v2506_v48 = vadd.s32 %v2505_v56, %v2503_v8 }
 0xbe1   : > { %v2507_v35 = vrot.slane %v2506_v48, 4 }
 0xbe3   : > { %vm2508_vm9 = vcmp.lt.s32.totalorder %v2506_v48, %v2507_v35 }
 0xbe4   : > { %v2509_v49 = vsel %vm2508_vm9, %v2506_v48, %v2507_v35 }
 0xbe5   : > { %v2510_v51 = vrot.slane %v2509_v49, 2 }
 0xbe7   : > { %vm2511_vm10 = vcmp.lt.s32.totalorder %v2509_v49, %v2510_v51 }
 0xbe8   : > { %v2512_v33 = vsel %vm2511_vm10, %v2509_v49, %v2510_v51 }
 0xbe9   : > { %v2513_v16 = vrot.slane %v2512_v33, 1 }
 0xbeb   : > { %vm2514_vm11 = vcmp.lt.s32.totalorder %v2512_v33, %v2513_v16 }
 0xbec   : > { %v2515_v40 = vsel %vm2514_vm11, %v2512_v33, %v2513_v16 }
 0xbed   : > { %vm2518_vm13 = vcmp.eq.s32.totalorder %v4430_v32, %v2515_v40  ;;  %vm2519_vm14 = vcmp.eq.s32.totalorder %v4432_v12, %v2515_v40  ;;  %vm2520_vm15 = vcmp.eq.s32.totalorder %v4434_v20, %v2515_v40  ;;  %vm2521_vm0 = vcmp.eq.s32.totalorder %v4436_v24, %v2515_v40 }
 0xbee   : > { %vm2522_vm1 = vcmp.eq.s32.totalorder %v4438_v63, %v2515_v40  ;;  %vm2523_vm2 = vcmp.eq.s32.totalorder %v4440_v34, %v2515_v40  ;;  %vm2524_vm3 = vcmp.eq.s32.totalorder %v4442_v30, %v2515_v40  ;;  %vm2525_vm4 = vcmp.eq.s32.totalorder %v4444_v7, %v2515_v40 }
 0xbef   : > { %vm2526_vm5 = vcmp.eq.s32.totalorder %v4446_v57, %v2515_v40  ;;  %vm2527_vm6 = vcmp.eq.s32.totalorder %v4448_v25, %v2515_v40  ;;  %v4837_v52 = vsel %vm2518_vm13, -inf, %v4761_v45  ;;  %v4840_v13 = vsel %vm2519_vm14, -inf, %v4764_v58 }
 0xbf0   : > { %v4843_v55 = vsel %vm2520_vm15, -inf, %v4767_v28  ;;  %v4846_v41 = vsel %vm2521_vm0, -inf, %v4770_v53  ;;  %v4849_v38 = vsel %vm2522_vm1, -inf, %v4773_v47  ;;  %v4852_v14 = vsel %vm2523_vm2, -inf, %v4776_v29 }
 0xbf1   : > { %v4855_v18 = vsel %vm2524_vm3, -inf, %v4779_v22  ;;  %v4858_v45 = vsel %vm2525_vm4, -inf, %v4782_v2  ;;  %v2538_v58 = vmax.f32 %v4837_v52, %v4849_v38  ;;  %v2539_v28 = vmax.f32 %v4840_v13, %v4852_v14 }
 0xbf2   : > { %v2540_v53 = vmax.f32 %v4843_v55, %v4855_v18  ;;  %v2541_v47 = vmax.f32 %v4846_v41, %v4858_v45  ;;  %v4869_v29 = vsel %vm2526_vm5, -inf, %v4793_v6  ;;  %v4872_v22 = vsel %vm2527_vm6, -inf, %v4796_v42 }
 0xbf3   : > { %v4877_v2 = vsel %vm2516_vm12, %v2515_v40, %v4801_v46  ;;  %v2542_v26 = vmax.f32 %v2538_v58, %v4869_v29  ;;  %v2543_v43 = vmax.f32 %v2539_v28, %v4872_v22 }
 0xbf4   : > { %v2545_v54 = vmax.f32 %v2540_v53, %v2541_v47 }
 0xbf5   : > { %v2544_v10 = vmax.f32 %v2542_v26, %v2543_v43 }
 0xbf7   : > { %v2546_v27 = vmax.f32 %v2544_v10, %v2545_v54 }
 0xbf9   : > { %2547 = vmax.xlane.f32.xlu1 %v2546_v27 }
 0xc86   : > { %v2548_v5 = vpop.xlane.xlu1 %2547 }
 0xc87   : > { %v2549_v50 = vrot.slane %v2548_v5, 4 }
 0xc89   : > { %v2550_v6 = vmax.f32 %v2548_v5, %v2549_v50 }
 0xc8b   : > { %v2551_v3 = vrot.slane %v2550_v6, 2 }
 0xc8d   : > { %v2552_v59 = vmax.f32 %v2550_v6, %v2551_v3 }
 0xc8f   : > { %v2553_v42 = vrot.slane %v2552_v59, 1 }
 0xc91   : > { %v2554_v37 = vmax.f32 %v2552_v59, %v2553_v42 }
 0xc93   : > { %vm2555_vm7 = vcmp.eq.f32.partialorder %v4837_v52, %v2554_v37  ;;  %vm2556_vm8 = vcmp.eq.f32.partialorder %v4840_v13, %v2554_v37  ;;  %vm2557_vm9 = vcmp.eq.f32.partialorder %v4843_v55, %v2554_v37  ;;  %vm2558_vm10 = vcmp.eq.f32.partialorder %v4846_v41, %v2554_v37 }
 0xc94   : > { %vm2559_vm11 = vcmp.eq.f32.partialorder %v4849_v38, %v2554_v37  ;;  %vm2560_vm12 = vcmp.eq.f32.partialorder %v4852_v14, %v2554_v37  ;;  %vm2561_vm13 = vcmp.eq.f32.partialorder %v4855_v18, %v2554_v37  ;;  %vm2562_vm14 = vcmp.eq.f32.partialorder %v4858_v45, %v2554_v37 }
 0xc95   : > { %vm2563_vm15 = vcmp.eq.f32.partialorder %v4869_v29, %v2554_v37  ;;  %vm2564_vm0 = vcmp.eq.f32.partialorder %v4872_v22, %v2554_v37  ;;  %v2565_v46 = vsel %vm2555_vm7, %v4430_v32, 10240  ;;  %v2566_v11 = vsel %vm2556_vm8, %v4432_v12, 10240 }
 0xc96   : > { %v2567_v23 = vsel %vm2557_vm9, %v4434_v20, 10240  ;;  %v2568_v15 = vsel %vm2558_vm10, %v4436_v24, 10240  ;;  %v2569_v17 = vsel %vm2559_vm11, %v4438_v63, 10240  ;;  %v2570_v36 = vsel %vm2560_vm12, %v4440_v34, 10240 }
 0xc97   : > { %v2571_v61 = vsel %vm2561_vm13, %v4442_v30, 10240  ;;  %v2572_v19 = vsel %vm2562_vm14, %v4444_v7, 10240  ;;  %v2573_v62 = vsel %vm2563_vm15, %v4446_v57, 10240  ;;  %v2574_v21 = vsel %vm2564_vm0, %v4448_v25, 10240 }
 0xc98   : > { %vm2575_vm1 = vcmp.lt.s32.totalorder %v2565_v46, %v2569_v17  ;;  %vm2577_vm2 = vcmp.lt.s32.totalorder %v2566_v11, %v2570_v36  ;;  %vm2579_vm3 = vcmp.lt.s32.totalorder %v2567_v23, %v2571_v61  ;;  %vm2581_vm4 = vcmp.lt.s32.totalorder %v2568_v15, %v2572_v19 }
 0xc99   : > { %v2576_v39 = vsel %vm2575_vm1, %v2565_v46, %v2569_v17  ;;  %v2578_v44 = vsel %vm2577_vm2, %v2566_v11, %v2570_v36  ;;  %v2580_v1 = vsel %vm2579_vm3, %v2567_v23, %v2571_v61  ;;  %v2582_v4 = vsel %vm2581_vm4, %v2568_v15, %v2572_v19 }
 0xc9a   : > { %vm2583_vm5 = vcmp.lt.s32.totalorder %v2576_v39, %v2573_v62  ;;  %vm2585_vm6 = vcmp.lt.s32.totalorder %v2578_v44, %v2574_v21  ;;  %vm2589_vm7 = vcmp.lt.s32.totalorder %v2580_v1, %v2582_v4  ;;  %vm2616_vm14 = vcmp.eq.s32.totalorder %v4418_v9, 5 }
 0xc9b   : > { %v2584_v0 = vsel %vm2583_vm5, %v2576_v39, %v2573_v62  ;;  %v2586_v31 = vsel %vm2585_vm6, %v2578_v44, %v2574_v21  ;;  %v2590_v56 = vsel %vm2589_vm7, %v2580_v1, %v2582_v4 }
 0xc9c   : > { %vm2587_vm8 = vcmp.lt.s32.totalorder %v2584_v0, %v2586_v31 }
 0xc9d   : > { %v2588_v60 = vsel %vm2587_vm8, %v2584_v0, %v2586_v31 }
 0xc9e   : > { %vm2591_vm9 = vcmp.lt.s32.totalorder %v2588_v60, %v2590_v56 }
 0xc9f   : > { %v2592_v8 = vsel %vm2591_vm9, %v2588_v60, %v2590_v56 }
 0xca0   : > { %v2594_v48 = vshra.s32 %v2592_v8, 16  ;;  %v2593_v49 = vand.u32 65535, %v2592_v8 }
 0xca2   : > { %v2596_v35 = vcvt.s32.f32 %v2594_v48  ;;  %v2595_v33 = vcvt.s32.f32 %v2593_v49 }
 0xca4   : > { %2597 = vmin.xlane.f32.xlu0 %v2596_v35 }
 0xd31   : > { %v2598_v51 = vpop.xlane.xlu0 %2597 }
 0xd32   : > { %vm2599_vm10 = vcmp.eq.f32.partialorder %v2596_v35, %v2598_v51  ;;  %v2604_v40 = vcvt.f32.s32 %v2598_v51 }
 0xd33   : > { %v2600_v16 = vsel %vm2599_vm10, %v2595_v33, inf }
 0xd34   : > { %2601 = vmin.xlane.f32.xlu1 %v2600_v16  ;;  %v2605_v28 = vshll.u32 %v2604_v40, 16 }
 0xdc1   : > { %v2602_v58 = vpop.xlane.xlu1 %2601 }
 0xdc2   : > { %v2603_v53 = vcvt.f32.s32 %v2602_v58 }
 0xdc4   : > { %v2606_v47 = vadd.s32 %v2605_v28, %v2603_v53 }
 0xdc6   : > { %v2607_v26 = vrot.slane %v2606_v47, 4 }
 0xdc8   : > { %vm2608_vm11 = vcmp.lt.s32.totalorder %v2606_v47, %v2607_v26 }
 0xdc9   : > { %v2609_v43 = vsel %vm2608_vm11, %v2606_v47, %v2607_v26 }
 0xdca   : > { %v2610_v10 = vrot.slane %v2609_v43, 2 }
 0xdcc   : > { %vm2611_vm12 = vcmp.lt.s32.totalorder %v2609_v43, %v2610_v10 }
 0xdcd   : > { %v2612_v54 = vsel %vm2611_vm12, %v2609_v43, %v2610_v10 }
 0xdce   : > { %v2613_v27 = vrot.slane %v2612_v54, 1 }
 0xdd0   : > { %vm2614_vm13 = vcmp.lt.s32.totalorder %v2612_v54, %v2613_v27 }
 0xdd1   : > { %v2615_v5 = vsel %vm2614_vm13, %v2612_v54, %v2613_v27 }
 0xdd2   : > { %vm2618_vm15 = vcmp.eq.s32.totalorder %v4430_v32, %v2615_v5  ;;  %vm2619_vm0 = vcmp.eq.s32.totalorder %v4432_v12, %v2615_v5  ;;  %vm2620_vm1 = vcmp.eq.s32.totalorder %v4434_v20, %v2615_v5  ;;  %vm2621_vm2 = vcmp.eq.s32.totalorder %v4436_v24, %v2615_v5 }
 0xdd3   : > { %vm2622_vm3 = vcmp.eq.s32.totalorder %v4438_v63, %v2615_v5  ;;  %vm2623_vm4 = vcmp.eq.s32.totalorder %v4440_v34, %v2615_v5  ;;  %vm2624_vm5 = vcmp.eq.s32.totalorder %v4442_v30, %v2615_v5  ;;  %vm2625_vm6 = vcmp.eq.s32.totalorder %v4444_v7, %v2615_v5 }
 0xdd4   : > { %vm2626_vm7 = vcmp.eq.s32.totalorder %v4446_v57, %v2615_v5  ;;  %vm2627_vm8 = vcmp.eq.s32.totalorder %v4448_v25, %v2615_v5  ;;  %v4913_v50 = vsel %vm2618_vm15, -inf, %v4837_v52  ;;  %v4916_v6 = vsel %vm2619_vm0, -inf, %v4840_v13 }
 0xdd5   : > { %v4919_v3 = vsel %vm2620_vm1, -inf, %v4843_v55  ;;  %v4922_v59 = vsel %vm2621_vm2, -inf, %v4846_v41  ;;  %v4925_v42 = vsel %vm2622_vm3, -inf, %v4849_v38  ;;  %v4928_v37 = vsel %vm2623_vm4, -inf, %v4852_v14 }
 0xdd6   : > { %v4931_v46 = vsel %vm2624_vm5, -inf, %v4855_v18  ;;  %v4934_v52 = vsel %vm2625_vm6, -inf, %v4858_v45  ;;  %v2638_v13 = vmax.f32 %v4913_v50, %v4925_v42  ;;  %v2639_v55 = vmax.f32 %v4916_v6, %v4928_v37 }
 0xdd7   : > { %v2640_v41 = vmax.f32 %v4919_v3, %v4931_v46  ;;  %v2641_v38 = vmax.f32 %v4922_v59, %v4934_v52  ;;  %v4945_v14 = vsel %vm2626_vm7, -inf, %v4869_v29  ;;  %v4948_v18 = vsel %vm2627_vm8, -inf, %v4872_v22 }
 0xdd8   : > { %v4953_v45 = vsel %vm2616_vm14, %v2615_v5, %v4877_v2  ;;  %v2642_v11 = vmax.f32 %v2638_v13, %v4945_v14  ;;  %v2643_v23 = vmax.f32 %v2639_v55, %v4948_v18 }
 0xdd9   : > { %v2645_v17 = vmax.f32 %v2640_v41, %v2641_v38 }
 0xdda   : > { %v2644_v15 = vmax.f32 %v2642_v11, %v2643_v23 }
 0xddc   : > { %v2646_v36 = vmax.f32 %v2644_v15, %v2645_v17 }
 0xdde   : > { %2647 = vmax.xlane.f32.xlu0 %v2646_v36 }
 0xe6b   : > { %v2648_v61 = vpop.xlane.xlu0 %2647 }
 0xe6c   : > { %v2649_v19 = vrot.slane %v2648_v61, 4 }
 0xe6e   : > { %v2650_v29 = vmax.f32 %v2648_v61, %v2649_v19 }
 0xe70   : > { %v2651_v62 = vrot.slane %v2650_v29, 2 }
 0xe72   : > { %v2652_v21 = vmax.f32 %v2650_v29, %v2651_v62 }
 0xe74   : > { %v2653_v22 = vrot.slane %v2652_v21, 1 }
 0xe76   : > { %v2654_v39 = vmax.f32 %v2652_v21, %v2653_v22 }
 0xe78   : > { %vm2655_vm9 = vcmp.eq.f32.partialorder %v4913_v50, %v2654_v39  ;;  %vm2656_vm10 = vcmp.eq.f32.partialorder %v4916_v6, %v2654_v39  ;;  %vm2657_vm11 = vcmp.eq.f32.partialorder %v4919_v3, %v2654_v39  ;;  %vm2658_vm12 = vcmp.eq.f32.partialorder %v4922_v59, %v2654_v39 }
 0xe79   : > { %vm2659_vm13 = vcmp.eq.f32.partialorder %v4925_v42, %v2654_v39  ;;  %vm2660_vm14 = vcmp.eq.f32.partialorder %v4928_v37, %v2654_v39  ;;  %vm2661_vm15 = vcmp.eq.f32.partialorder %v4931_v46, %v2654_v39  ;;  %vm2662_vm0 = vcmp.eq.f32.partialorder %v4934_v52, %v2654_v39 }
 0xe7a   : > { %vm2663_vm1 = vcmp.eq.f32.partialorder %v4945_v14, %v2654_v39  ;;  %vm2664_vm2 = vcmp.eq.f32.partialorder %v4948_v18, %v2654_v39  ;;  %v2665_v2 = vsel %vm2655_vm9, %v4430_v32, 10240  ;;  %v2666_v44 = vsel %vm2656_vm10, %v4432_v12, 10240 }
 0xe7b   : > { %v2667_v1 = vsel %vm2657_vm11, %v4434_v20, 10240  ;;  %v2668_v4 = vsel %vm2658_vm12, %v4436_v24, 10240  ;;  %v2669_v0 = vsel %vm2659_vm13, %v4438_v63, 10240  ;;  %v2670_v31 = vsel %vm2660_vm14, %v4440_v34, 10240 }
 0xe7c   : > { %v2671_v60 = vsel %vm2661_vm15, %v4442_v30, 10240  ;;  %v2672_v56 = vsel %vm2662_vm0, %v4444_v7, 10240  ;;  %v2673_v8 = vsel %vm2663_vm1, %v4446_v57, 10240  ;;  %v2674_v48 = vsel %vm2664_vm2, %v4448_v25, 10240 }
 0xe7d   : > { %vm2675_vm3 = vcmp.lt.s32.totalorder %v2665_v2, %v2669_v0  ;;  %vm2677_vm4 = vcmp.lt.s32.totalorder %v2666_v44, %v2670_v31  ;;  %vm2679_vm5 = vcmp.lt.s32.totalorder %v2667_v1, %v2671_v60  ;;  %vm2681_vm6 = vcmp.lt.s32.totalorder %v2668_v4, %v2672_v56 }
 0xe7e   : > { %v2676_v35 = vsel %vm2675_vm3, %v2665_v2, %v2669_v0  ;;  %v2678_v49 = vsel %vm2677_vm4, %v2666_v44, %v2670_v31  ;;  %v2680_v51 = vsel %vm2679_vm5, %v2667_v1, %v2671_v60  ;;  %v2682_v33 = vsel %vm2681_vm6, %v2668_v4, %v2672_v56 }
 0xe7f   : > { %vm2683_vm7 = vcmp.lt.s32.totalorder %v2676_v35, %v2673_v8  ;;  %vm2685_vm8 = vcmp.lt.s32.totalorder %v2678_v49, %v2674_v48  ;;  %vm2689_vm9 = vcmp.lt.s32.totalorder %v2680_v51, %v2682_v33  ;;  %vm2716_vm0 = vcmp.eq.s32.totalorder %v4418_v9, 6 }
 0xe80   : > { %v2684_v16 = vsel %vm2683_vm7, %v2676_v35, %v2673_v8  ;;  %v2686_v40 = vsel %vm2685_vm8, %v2678_v49, %v2674_v48  ;;  %v2690_v28 = vsel %vm2689_vm9, %v2680_v51, %v2682_v33 }
 0xe81   : > { %vm2687_vm10 = vcmp.lt.s32.totalorder %v2684_v16, %v2686_v40 }
 0xe82   : > { %v2688_v58 = vsel %vm2687_vm10, %v2684_v16, %v2686_v40 }
 0xe83   : > { %vm2691_vm11 = vcmp.lt.s32.totalorder %v2688_v58, %v2690_v28 }
 0xe84   : > { %v2692_v53 = vsel %vm2691_vm11, %v2688_v58, %v2690_v28 }
 0xe85   : > { %v2694_v47 = vshra.s32 %v2692_v53, 16  ;;  %v2693_v43 = vand.u32 65535, %v2692_v53 }
 0xe87   : > { %v2696_v26 = vcvt.s32.f32 %v2694_v47  ;;  %v2695_v54 = vcvt.s32.f32 %v2693_v43 }
 0xe89   : > { %2697 = vmin.xlane.f32.xlu1 %v2696_v26 }
 0xf16   : > { %v2698_v10 = vpop.xlane.xlu1 %2697 }
 0xf17   : > { %vm2699_vm12 = vcmp.eq.f32.partialorder %v2696_v26, %v2698_v10  ;;  %v2704_v5 = vcvt.f32.s32 %v2698_v10 }
 0xf18   : > { %v2700_v27 = vsel %vm2699_vm12, %v2695_v54, inf }
 0xf19   : > { %2701 = vmin.xlane.f32.xlu0 %v2700_v27  ;;  %v2705_v55 = vshll.u32 %v2704_v5, 16 }
 0xfa6   : > { %v2702_v13 = vpop.xlane.xlu0 %2701 }
 0xfa7   : > { %v2703_v41 = vcvt.f32.s32 %v2702_v13 }
 0xfa9   : > { %v2706_v38 = vadd.s32 %v2705_v55, %v2703_v41 }
 0xfab   : > { %v2707_v11 = vrot.slane %v2706_v38, 4 }
 0xfad   : > { %vm2708_vm13 = vcmp.lt.s32.totalorder %v2706_v38, %v2707_v11 }
 0xfae   : > { %v2709_v23 = vsel %vm2708_vm13, %v2706_v38, %v2707_v11 }
 0xfaf   : > { %v2710_v15 = vrot.slane %v2709_v23, 2 }
 0xfb1   : > { %vm2711_vm14 = vcmp.lt.s32.totalorder %v2709_v23, %v2710_v15 }
 0xfb2   : > { %v2712_v17 = vsel %vm2711_vm14, %v2709_v23, %v2710_v15 }
 0xfb3   : > { %v2713_v36 = vrot.slane %v2712_v17, 1 }
 0xfb5   : > { %vm2714_vm15 = vcmp.lt.s32.totalorder %v2712_v17, %v2713_v36 }
 0xfb6   : > { %v2715_v61 = vsel %vm2714_vm15, %v2712_v17, %v2713_v36 }
 0xfb7   : > { %vm2718_vm1 = vcmp.eq.s32.totalorder %v4430_v32, %v2715_v61  ;;  %vm2719_vm2 = vcmp.eq.s32.totalorder %v4432_v12, %v2715_v61  ;;  %vm2720_vm3 = vcmp.eq.s32.totalorder %v4434_v20, %v2715_v61  ;;  %vm2721_vm4 = vcmp.eq.s32.totalorder %v4436_v24, %v2715_v61 }
 0xfb8   : > { %vm2722_vm5 = vcmp.eq.s32.totalorder %v4438_v63, %v2715_v61  ;;  %vm2723_vm6 = vcmp.eq.s32.totalorder %v4440_v34, %v2715_v61  ;;  %vm2724_vm7 = vcmp.eq.s32.totalorder %v4442_v30, %v2715_v61  ;;  %vm2725_vm8 = vcmp.eq.s32.totalorder %v4444_v7, %v2715_v61 }
 0xfb9   : > { %vm2726_vm9 = vcmp.eq.s32.totalorder %v4446_v57, %v2715_v61  ;;  %vm2727_vm10 = vcmp.eq.s32.totalorder %v4448_v25, %v2715_v61  ;;  %v4989_v19 = vsel %vm2718_vm1, -inf, %v4913_v50  ;;  %v4992_v29 = vsel %vm2719_vm2, -inf, %v4916_v6 }
 0xfba   : > { %v4995_v62 = vsel %vm2720_vm3, -inf, %v4919_v3  ;;  %v4998_v21 = vsel %vm2721_vm4, -inf, %v4922_v59  ;;  %v5001_v22 = vsel %vm2722_vm5, -inf, %v4925_v42  ;;  %v5004_v39 = vsel %vm2723_vm6, -inf, %v4928_v37 }
 0xfbb   : > { %v5007_v2 = vsel %vm2724_vm7, -inf, %v4931_v46  ;;  %v5010_v50 = vsel %vm2725_vm8, -inf, %v4934_v52  ;;  %v2738_v6 = vmax.f32 %v4989_v19, %v5001_v22  ;;  %v2739_v3 = vmax.f32 %v4992_v29, %v5004_v39 }
 0xfbc   : > { %v2740_v59 = vmax.f32 %v4995_v62, %v5007_v2  ;;  %v2741_v42 = vmax.f32 %v4998_v21, %v5010_v50  ;;  %v5021_v37 = vsel %vm2726_vm9, -inf, %v4945_v14  ;;  %v5024_v46 = vsel %vm2727_vm10, -inf, %v4948_v18 }
 0xfbd   : > { %v5029_v52 = vsel %vm2716_vm0, %v2715_v61, %v4953_v45  ;;  %v2742_v44 = vmax.f32 %v2738_v6, %v5021_v37  ;;  %v2743_v1 = vmax.f32 %v2739_v3, %v5024_v46 }
 0xfbe   : > { %v2745_v0 = vmax.f32 %v2740_v59, %v2741_v42 }
 0xfbf   : > { %v2744_v4 = vmax.f32 %v2742_v44, %v2743_v1 }
 0xfc1   : > { %v2746_v31 = vmax.f32 %v2744_v4, %v2745_v0 }
 0xfc3   : > { %2747 = vmax.xlane.f32.xlu1 %v2746_v31 }
0x1050   : > { %v2748_v60 = vpop.xlane.xlu1 %2747 }
0x1051   : > { %v2749_v56 = vrot.slane %v2748_v60, 4 }
0x1053   : > { %v2750_v14 = vmax.f32 %v2748_v60, %v2749_v56 }
0x1055   : > { %v2751_v8 = vrot.slane %v2750_v14, 2 }
0x1057   : > { %v2752_v48 = vmax.f32 %v2750_v14, %v2751_v8 }
0x1059   : > { %v2753_v18 = vrot.slane %v2752_v48, 1 }
0x105b   : > { %v2754_v35 = vmax.f32 %v2752_v48, %v2753_v18 }
0x105d   : > { %vm2755_vm11 = vcmp.eq.f32.partialorder %v4989_v19, %v2754_v35  ;;  %vm2756_vm12 = vcmp.eq.f32.partialorder %v4992_v29, %v2754_v35  ;;  %vm2757_vm13 = vcmp.eq.f32.partialorder %v4995_v62, %v2754_v35  ;;  %vm2758_vm14 = vcmp.eq.f32.partialorder %v4998_v21, %v2754_v35 }
0x105e   : > { %vm2759_vm15 = vcmp.eq.f32.partialorder %v5001_v22, %v2754_v35  ;;  %vm2760_vm0 = vcmp.eq.f32.partialorder %v5004_v39, %v2754_v35  ;;  %vm2761_vm1 = vcmp.eq.f32.partialorder %v5007_v2, %v2754_v35  ;;  %vm2762_vm2 = vcmp.eq.f32.partialorder %v5010_v50, %v2754_v35 }
0x105f   : > { %vm2763_vm3 = vcmp.eq.f32.partialorder %v5021_v37, %v2754_v35  ;;  %vm2764_vm4 = vcmp.eq.f32.partialorder %v5024_v46, %v2754_v35  ;;  %v2765_v45 = vsel %vm2755_vm11, %v4430_v32, 10240  ;;  %v2766_v49 = vsel %vm2756_vm12, %v4432_v12, 10240 }
0x1060   : > { %v2767_v51 = vsel %vm2757_vm13, %v4434_v20, 10240  ;;  %v2768_v33 = vsel %vm2758_vm14, %v4436_v24, 10240  ;;  %v2769_v16 = vsel %vm2759_vm15, %v4438_v63, 10240  ;;  %v2770_v40 = vsel %vm2760_vm0, %v4440_v34, 10240 }
0x1061   : > { %v2771_v58 = vsel %vm2761_vm1, %v4442_v30, 10240  ;;  %v2772_v28 = vsel %vm2762_vm2, %v4444_v7, 10240  ;;  %v2773_v53 = vsel %vm2763_vm3, %v4446_v57, 10240  ;;  %v2774_v47 = vsel %vm2764_vm4, %v4448_v25, 10240 }
0x1062   : > { %vm2775_vm5 = vcmp.lt.s32.totalorder %v2765_v45, %v2769_v16  ;;  %vm2777_vm6 = vcmp.lt.s32.totalorder %v2766_v49, %v2770_v40  ;;  %vm2779_vm7 = vcmp.lt.s32.totalorder %v2767_v51, %v2771_v58  ;;  %vm2781_vm8 = vcmp.lt.s32.totalorder %v2768_v33, %v2772_v28 }
0x1063   : > { %v2776_v26 = vsel %vm2775_vm5, %v2765_v45, %v2769_v16  ;;  %v2778_v43 = vsel %vm2777_vm6, %v2766_v49, %v2770_v40  ;;  %v2780_v10 = vsel %vm2779_vm7, %v2767_v51, %v2771_v58  ;;  %v2782_v54 = vsel %vm2781_vm8, %v2768_v33, %v2772_v28 }
0x1064   : > { %vm2783_vm9 = vcmp.lt.s32.totalorder %v2776_v26, %v2773_v53  ;;  %vm2785_vm10 = vcmp.lt.s32.totalorder %v2778_v43, %v2774_v47  ;;  %vm2789_vm11 = vcmp.lt.s32.totalorder %v2780_v10, %v2782_v54  ;;  %vm2816_vm2 = vcmp.eq.s32.totalorder %v4418_v9, 7 }
0x1065   : > { %v2784_v27 = vsel %vm2783_vm9, %v2776_v26, %v2773_v53  ;;  %v2786_v5 = vsel %vm2785_vm10, %v2778_v43, %v2774_v47  ;;  %v2790_v55 = vsel %vm2789_vm11, %v2780_v10, %v2782_v54 }
0x1066   : > { %vm2787_vm12 = vcmp.lt.s32.totalorder %v2784_v27, %v2786_v5 }
0x1067   : > { %v2788_v13 = vsel %vm2787_vm12, %v2784_v27, %v2786_v5 }
0x1068   : > { %vm2791_vm13 = vcmp.lt.s32.totalorder %v2788_v13, %v2790_v55 }
0x1069   : > { %v2792_v41 = vsel %vm2791_vm13, %v2788_v13, %v2790_v55 }
0x106a   : > { %v2794_v38 = vshra.s32 %v2792_v41, 16  ;;  %v2793_v23 = vand.u32 65535, %v2792_v41 }
0x106c   : > { %v2796_v11 = vcvt.s32.f32 %v2794_v38  ;;  %v2795_v17 = vcvt.s32.f32 %v2793_v23 }
0x106e   : > { %2797 = vmin.xlane.f32.xlu0 %v2796_v11 }
0x10fb   : > { %v2798_v15 = vpop.xlane.xlu0 %2797 }
0x10fc   : > { %vm2799_vm14 = vcmp.eq.f32.partialorder %v2796_v11, %v2798_v15  ;;  %v2804_v61 = vcvt.f32.s32 %v2798_v15 }
0x10fd   : > { %v2800_v36 = vsel %vm2799_vm14, %v2795_v17, inf }
0x10fe   : > { %2801 = vmin.xlane.f32.xlu1 %v2800_v36  ;;  %v2805_v3 = vshll.u32 %v2804_v61, 16 }
0x118b   : > { %v2802_v6 = vpop.xlane.xlu1 %2801 }
0x118c   : > { %v2803_v59 = vcvt.f32.s32 %v2802_v6 }
0x118e   : > { %v2806_v42 = vadd.s32 %v2805_v3, %v2803_v59 }
0x1190   : > { %v2807_v44 = vrot.slane %v2806_v42, 4 }
0x1192   : > { %vm2808_vm15 = vcmp.lt.s32.totalorder %v2806_v42, %v2807_v44 }
0x1193   : > { %v2809_v1 = vsel %vm2808_vm15, %v2806_v42, %v2807_v44 }
0x1194   : > { %v2810_v4 = vrot.slane %v2809_v1, 2 }
0x1196   : > { %vm2811_vm0 = vcmp.lt.s32.totalorder %v2809_v1, %v2810_v4 }
0x1197   : > { %v2812_v0 = vsel %vm2811_vm0, %v2809_v1, %v2810_v4 }
0x1198   : > { %v2813_v31 = vrot.slane %v2812_v0, 1 }
0x119a   : > { %vm2814_vm1 = vcmp.lt.s32.totalorder %v2812_v0, %v2813_v31 }
0x119b   : > { %v2815_v60 = vsel %vm2814_vm1, %v2812_v0, %v2813_v31 }
0x119c   : > { %vm2818_vm3 = vcmp.eq.s32.totalorder %v4430_v32, %v2815_v60  ;;  %vm2819_vm4 = vcmp.eq.s32.totalorder %v4432_v12, %v2815_v60  ;;  %vm2820_vm5 = vcmp.eq.s32.totalorder %v4434_v20, %v2815_v60  ;;  %vm2821_vm6 = vcmp.eq.s32.totalorder %v4436_v24, %v2815_v60 }
0x119d   : > { %vm2822_vm7 = vcmp.eq.s32.totalorder %v4438_v63, %v2815_v60  ;;  %vm2823_vm8 = vcmp.eq.s32.totalorder %v4440_v34, %v2815_v60  ;;  %vm2824_vm9 = vcmp.eq.s32.totalorder %v4442_v30, %v2815_v60  ;;  %vm2825_vm10 = vcmp.eq.s32.totalorder %v4444_v7, %v2815_v60 }
0x119e   : > { %vm2826_vm11 = vcmp.eq.s32.totalorder %v4446_v57, %v2815_v60  ;;  %vm2827_vm12 = vcmp.eq.s32.totalorder %v4448_v25, %v2815_v60  ;;  %v5065_v56 = vsel %vm2818_vm3, -inf, %v4989_v19  ;;  %v5068_v14 = vsel %vm2819_vm4, -inf, %v4992_v29 }
0x119f   : > { %v5071_v8 = vsel %vm2820_vm5, -inf, %v4995_v62  ;;  %v5074_v48 = vsel %vm2821_vm6, -inf, %v4998_v21  ;;  %v5077_v18 = vsel %vm2822_vm7, -inf, %v5001_v22  ;;  %v5080_v35 = vsel %vm2823_vm8, -inf, %v5004_v39 }
0x11a0   : > { %v5083_v45 = vsel %vm2824_vm9, -inf, %v5007_v2  ;;  %v5086_v19 = vsel %vm2825_vm10, -inf, %v5010_v50  ;;  %v2838_v29 = vmax.f32 %v5065_v56, %v5077_v18  ;;  %v2839_v62 = vmax.f32 %v5068_v14, %v5080_v35 }
0x11a1   : > { %v2840_v21 = vmax.f32 %v5071_v8, %v5083_v45  ;;  %v2841_v22 = vmax.f32 %v5074_v48, %v5086_v19  ;;  %v5097_v39 = vsel %vm2826_vm11, -inf, %v5021_v37  ;;  %v5100_v2 = vsel %vm2827_vm12, -inf, %v5024_v46 }
0x11a2   : > { %v5105_v50 = vsel %vm2816_vm2, %v2815_v60, %v5029_v52  ;;  %v2842_v49 = vmax.f32 %v2838_v29, %v5097_v39  ;;  %v2843_v51 = vmax.f32 %v2839_v62, %v5100_v2 }
0x11a3   : > { %v2845_v16 = vmax.f32 %v2840_v21, %v2841_v22 }
0x11a4   : > { %v2844_v33 = vmax.f32 %v2842_v49, %v2843_v51 }
0x11a6   : > { %v2846_v40 = vmax.f32 %v2844_v33, %v2845_v16 }
0x11a8   : > { %2847 = vmax.xlane.f32.xlu0 %v2846_v40 }
0x1235   : > { %v2848_v58 = vpop.xlane.xlu0 %2847 }
0x1236   : > { %v2849_v28 = vrot.slane %v2848_v58, 4 }
0x1238   : > { %v2850_v37 = vmax.f32 %v2848_v58, %v2849_v28 }
0x123a   : > { %v2851_v53 = vrot.slane %v2850_v37, 2 }
0x123c   : > { %v2852_v47 = vmax.f32 %v2850_v37, %v2851_v53 }
0x123e   : > { %v2853_v46 = vrot.slane %v2852_v47, 1 }
0x1240   : > { %v2854_v26 = vmax.f32 %v2852_v47, %v2853_v46 }
0x1242   : > { %vm2855_vm13 = vcmp.eq.f32.partialorder %v5065_v56, %v2854_v26  ;;  %vm2856_vm14 = vcmp.eq.f32.partialorder %v5068_v14, %v2854_v26  ;;  %vm2857_vm15 = vcmp.eq.f32.partialorder %v5071_v8, %v2854_v26  ;;  %vm2858_vm0 = vcmp.eq.f32.partialorder %v5074_v48, %v2854_v26 }
0x1243   : > { %vm2859_vm1 = vcmp.eq.f32.partialorder %v5077_v18, %v2854_v26  ;;  %vm2860_vm2 = vcmp.eq.f32.partialorder %v5080_v35, %v2854_v26  ;;  %vm2861_vm3 = vcmp.eq.f32.partialorder %v5083_v45, %v2854_v26  ;;  %vm2862_vm4 = vcmp.eq.f32.partialorder %v5086_v19, %v2854_v26 }
0x1244   : > { %vm2863_vm5 = vcmp.eq.f32.partialorder %v5097_v39, %v2854_v26  ;;  %vm2864_vm6 = vcmp.eq.f32.partialorder %v5100_v2, %v2854_v26  ;;  %v2865_v52 = vsel %vm2855_vm13, %v4430_v32, 10240  ;;  %v2866_v43 = vsel %vm2856_vm14, %v4432_v12, 10240 }
0x1245   : > { %v2867_v10 = vsel %vm2857_vm15, %v4434_v20, 10240  ;;  %v2868_v54 = vsel %vm2858_vm0, %v4436_v24, 10240  ;;  %v2869_v27 = vsel %vm2859_vm1, %v4438_v63, 10240  ;;  %v2870_v5 = vsel %vm2860_vm2, %v4440_v34, 10240 }
0x1246   : > { %v2871_v13 = vsel %vm2861_vm3, %v4442_v30, 10240  ;;  %v2872_v55 = vsel %vm2862_vm4, %v4444_v7, 10240  ;;  %v2873_v41 = vsel %vm2863_vm5, %v4446_v57, 10240  ;;  %v2874_v38 = vsel %vm2864_vm6, %v4448_v25, 10240 }
0x1247   : > { %vm2875_vm7 = vcmp.lt.s32.totalorder %v2865_v52, %v2869_v27  ;;  %vm2877_vm8 = vcmp.lt.s32.totalorder %v2866_v43, %v2870_v5  ;;  %vm2879_vm9 = vcmp.lt.s32.totalorder %v2867_v10, %v2871_v13  ;;  %vm2881_vm10 = vcmp.lt.s32.totalorder %v2868_v54, %v2872_v55 }
0x1248   : > { %v2876_v11 = vsel %vm2875_vm7, %v2865_v52, %v2869_v27  ;;  %v2878_v23 = vsel %vm2877_vm8, %v2866_v43, %v2870_v5  ;;  %v2880_v15 = vsel %vm2879_vm9, %v2867_v10, %v2871_v13  ;;  %v2882_v17 = vsel %vm2881_vm10, %v2868_v54, %v2872_v55 }
0x1249   : > { %vm2883_vm11 = vcmp.lt.s32.totalorder %v2876_v11, %v2873_v41  ;;  %vm2885_vm12 = vcmp.lt.s32.totalorder %v2878_v23, %v2874_v38  ;;  %vm2889_vm13 = vcmp.lt.s32.totalorder %v2880_v15, %v2882_v17  ;;  %vm2916_vm4 = vcmp.eq.s32.totalorder %v4418_v9, 8 }
0x124a   : > { %v2884_v36 = vsel %vm2883_vm11, %v2876_v11, %v2873_v41  ;;  %v2886_v61 = vsel %vm2885_vm12, %v2878_v23, %v2874_v38  ;;  %v2890_v3 = vsel %vm2889_vm13, %v2880_v15, %v2882_v17 }
0x124b   : > { %vm2887_vm14 = vcmp.lt.s32.totalorder %v2884_v36, %v2886_v61 }
0x124c   : > { %v2888_v6 = vsel %vm2887_vm14, %v2884_v36, %v2886_v61 }
0x124d   : > { %vm2891_vm15 = vcmp.lt.s32.totalorder %v2888_v6, %v2890_v3 }
0x124e   : > { %v2892_v59 = vsel %vm2891_vm15, %v2888_v6, %v2890_v3 }
0x124f   : > { %v2894_v42 = vshra.s32 %v2892_v59, 16  ;;  %v2893_v1 = vand.u32 65535, %v2892_v59 }
0x1251   : > { %v2896_v44 = vcvt.s32.f32 %v2894_v42  ;;  %v2895_v0 = vcvt.s32.f32 %v2893_v1 }
0x1253   : > { %2897 = vmin.xlane.f32.xlu1 %v2896_v44 }
0x12e0   : > { %v2898_v4 = vpop.xlane.xlu1 %2897 }
0x12e1   : > { %vm2899_vm0 = vcmp.eq.f32.partialorder %v2896_v44, %v2898_v4  ;;  %v2904_v60 = vcvt.f32.s32 %v2898_v4 }
0x12e2   : > { %v2900_v31 = vsel %vm2899_vm0, %v2895_v0, inf }
0x12e3   : > { %2901 = vmin.xlane.f32.xlu0 %v2900_v31  ;;  %v2905_v62 = vshll.u32 %v2904_v60, 16 }
0x1370   : > { %v2902_v29 = vpop.xlane.xlu0 %2901 }
0x1371   : > { %v2903_v21 = vcvt.f32.s32 %v2902_v29 }
0x1373   : > { %v2906_v22 = vadd.s32 %v2905_v62, %v2903_v21 }
0x1375   : > { %v2907_v49 = vrot.slane %v2906_v22, 4 }
0x1377   : > { %vm2908_vm1 = vcmp.lt.s32.totalorder %v2906_v22, %v2907_v49 }
0x1378   : > { %v2909_v51 = vsel %vm2908_vm1, %v2906_v22, %v2907_v49 }
0x1379   : > { %v2910_v33 = vrot.slane %v2909_v51, 2 }
0x137b   : > { %vm2911_vm2 = vcmp.lt.s32.totalorder %v2909_v51, %v2910_v33 }
0x137c   : > { %v2912_v16 = vsel %vm2911_vm2, %v2909_v51, %v2910_v33 }
0x137d   : > { %v2913_v40 = vrot.slane %v2912_v16, 1 }
0x137f   : > { %vm2914_vm3 = vcmp.lt.s32.totalorder %v2912_v16, %v2913_v40 }
0x1380   : > { %v2915_v58 = vsel %vm2914_vm3, %v2912_v16, %v2913_v40 }
0x1381   : > { %vm2918_vm5 = vcmp.eq.s32.totalorder %v4430_v32, %v2915_v58  ;;  %vm2919_vm6 = vcmp.eq.s32.totalorder %v4432_v12, %v2915_v58  ;;  %vm2920_vm7 = vcmp.eq.s32.totalorder %v4434_v20, %v2915_v58  ;;  %vm2921_vm8 = vcmp.eq.s32.totalorder %v4436_v24, %v2915_v58 }
0x1382   : > { %vm2922_vm9 = vcmp.eq.s32.totalorder %v4438_v63, %v2915_v58  ;;  %vm2923_vm10 = vcmp.eq.s32.totalorder %v4440_v34, %v2915_v58  ;;  %vm2924_vm11 = vcmp.eq.s32.totalorder %v4442_v30, %v2915_v58  ;;  %vm2925_vm12 = vcmp.eq.s32.totalorder %v4444_v7, %v2915_v58 }
0x1383   : > { %vm2926_vm13 = vcmp.eq.s32.totalorder %v4446_v57, %v2915_v58  ;;  %vm2927_vm14 = vcmp.eq.s32.totalorder %v4448_v25, %v2915_v58  ;;  %v2928_v28 = vsel %vm2918_vm5, -inf, %v5065_v56  ;;  %v2929_v37 = vsel %vm2919_vm6, -inf, %v5068_v14 }
0x1384   : > { %v2930_v53 = vsel %vm2920_vm7, -inf, %v5071_v8  ;;  %v2931_v47 = vsel %vm2921_vm8, -inf, %v5074_v48  ;;  %v2932_v46 = vsel %vm2922_vm9, -inf, %v5077_v18  ;;  %v2933_v26 = vsel %vm2923_vm10, -inf, %v5080_v35 }
0x1385   : > { %v2934_v52 = vsel %vm2924_vm11, -inf, %v5083_v45  ;;  %v2935_v43 = vsel %vm2925_vm12, -inf, %v5086_v19  ;;  %v2938_v10 = vmax.f32 %v2928_v28, %v2932_v46  ;;  %v2939_v54 = vmax.f32 %v2929_v37, %v2933_v26 }
0x1386   : > { %v2940_v27 = vmax.f32 %v2930_v53, %v2934_v52  ;;  %v2941_v5 = vmax.f32 %v2931_v47, %v2935_v43  ;;  %v2936_v56 = vsel %vm2926_vm13, -inf, %v5097_v39  ;;  %v2937_v14 = vsel %vm2927_vm14, -inf, %v5100_v2 }
0x1387   : > { %v5153_v8 = vsel %vm2916_vm4, %v2915_v58, %v5105_v50  ;;  %v2942_v48 = vmax.f32 %v2938_v10, %v2936_v56  ;;  %v2943_v18 = vmax.f32 %v2939_v54, %v2937_v14 }
0x1388   : > { %v2945_v13 = vmax.f32 %v2940_v27, %v2941_v5 }
0x1389   : > { %v2944_v35 = vmax.f32 %v2942_v48, %v2943_v18 }
0x138b   : > { %v2946_v45 = vmax.f32 %v2944_v35, %v2945_v13 }
0x138d   : > { %2947 = vmax.xlane.f32.xlu1 %v2946_v45 }
0x141a   : > { %v2948_v19 = vpop.xlane.xlu1 %2947 }
0x141b   : > { %v2949_v55 = vrot.slane %v2948_v19, 4 }
0x141d   : > { %v2950_v41 = vmax.f32 %v2948_v19, %v2949_v55 }
0x141f   : > { %v2951_v38 = vrot.slane %v2950_v41, 2 }
0x1421   : > { %v2952_v11 = vmax.f32 %v2950_v41, %v2951_v38 }
0x1423   : > { %v2953_v23 = vrot.slane %v2952_v11, 1 }
0x1425   : > { %v2954_v39 = vmax.f32 %v2952_v11, %v2953_v23 }
0x1427   : > { %vm2955_vm15 = vcmp.eq.f32.partialorder %v2928_v28, %v2954_v39  ;;  %vm2956_vm0 = vcmp.eq.f32.partialorder %v2929_v37, %v2954_v39  ;;  %vm2957_vm1 = vcmp.eq.f32.partialorder %v2930_v53, %v2954_v39  ;;  %vm2958_vm2 = vcmp.eq.f32.partialorder %v2931_v47, %v2954_v39 }
0x1428   : > { %vm2959_vm3 = vcmp.eq.f32.partialorder %v2932_v46, %v2954_v39  ;;  %vm2960_vm4 = vcmp.eq.f32.partialorder %v2933_v26, %v2954_v39  ;;  %vm2961_vm5 = vcmp.eq.f32.partialorder %v2934_v52, %v2954_v39  ;;  %vm2962_vm6 = vcmp.eq.f32.partialorder %v2935_v43, %v2954_v39 }
0x1429   : > { %vm2963_vm7 = vcmp.eq.f32.partialorder %v2936_v56, %v2954_v39  ;;  %vm2964_vm8 = vcmp.eq.f32.partialorder %v2937_v14, %v2954_v39  ;;  %v2965_v2 = vsel %vm2955_vm15, %v4430_v32, 10240  ;;  %v2966_v50 = vsel %vm2956_vm0, %v4432_v12, 10240 }
0x142a   : > { %v2967_v15 = vsel %vm2957_vm1, %v4434_v20, 10240  ;;  %v2968_v17 = vsel %vm2958_vm2, %v4436_v24, 10240  ;;  %v2969_v36 = vsel %vm2959_vm3, %v4438_v63, 10240  ;;  %v2970_v61 = vsel %vm2960_vm4, %v4440_v34, 10240 }
0x142b   : > { %v2971_v6 = vsel %vm2961_vm5, %v4442_v30, 10240  ;;  %v2972_v3 = vsel %vm2962_vm6, %v4444_v7, 10240  ;;  %v2973_v59 = vsel %vm2963_vm7, %v4446_v57, 10240  ;;  %v2974_v42 = vsel %vm2964_vm8, %v4448_v25, 10240 }
0x142c   : > { %vm2975_vm9 = vcmp.lt.s32.totalorder %v2965_v2, %v2969_v36  ;;  %vm2977_vm10 = vcmp.lt.s32.totalorder %v2966_v50, %v2970_v61  ;;  %vm2979_vm11 = vcmp.lt.s32.totalorder %v2967_v15, %v2971_v6  ;;  %vm2981_vm12 = vcmp.lt.s32.totalorder %v2968_v17, %v2972_v3 }
0x142d   : > { %v2976_v32 = vsel %vm2975_vm9, %v2965_v2, %v2969_v36  ;;  %v2978_v12 = vsel %vm2977_vm10, %v2966_v50, %v2970_v61  ;;  %v2980_v20 = vsel %vm2979_vm11, %v2967_v15, %v2971_v6  ;;  %v2982_v24 = vsel %vm2981_vm12, %v2968_v17, %v2972_v3 }
0x142e   : > { %vm2983_vm13 = vcmp.lt.s32.totalorder %v2976_v32, %v2973_v59  ;;  %vm2985_vm14 = vcmp.lt.s32.totalorder %v2978_v12, %v2974_v42  ;;  %vm2989_vm15 = vcmp.lt.s32.totalorder %v2980_v20, %v2982_v24  ;;  %vm3016_vm5 = vcmp.eq.s32.totalorder %v4418_v9, 9 }
0x142f   : > { %v2984_v63 = vsel %vm2983_vm13, %v2976_v32, %v2973_v59  ;;  %v2986_v34 = vsel %vm2985_vm14, %v2978_v12, %v2974_v42  ;;  %v2990_v7 = vsel %vm2989_vm15, %v2980_v20, %v2982_v24  ;;  %vm3018_vm6 = vcmask 73728  }
0x1430   : > { %vm2987_vm0 = vcmp.lt.s32.totalorder %v2984_v63, %v2986_v34 }
0x1431   : > { %v2988_v30 = vsel %vm2987_vm0, %v2984_v63, %v2986_v34 }
0x1432   : > { %vm2991_vm1 = vcmp.lt.s32.totalorder %v2988_v30, %v2990_v7 }
0x1433   : > { %v2992_v57 = vsel %vm2991_vm1, %v2988_v30, %v2990_v7 }
0x1434   : > { %v2994_v44 = vshra.s32 %v2992_v57, 16  ;;  %v2993_v1 = vand.u32 65535, %v2992_v57 }
0x1436   : > { %v2996_v25 = vcvt.s32.f32 %v2994_v44  ;;  %v2995_v0 = vcvt.s32.f32 %v2993_v1 }
0x1438   : > { %2997 = vmin.xlane.f32.xlu0 %v2996_v25 }
0x14c5   : > { %v2998_v4 = vpop.xlane.xlu0 %2997 }
0x14c6   : > { %vm2999_vm2 = vcmp.eq.f32.partialorder %v2996_v25, %v2998_v4  ;;  %v3004_v60 = vcvt.f32.s32 %v2998_v4 }
0x14c7   : > { %v3000_v31 = vsel %vm2999_vm2, %v2995_v0, inf }
0x14c8   : > { %3001 = vmin.xlane.f32.xlu1 %v3000_v31  ;;  %v3005_v62 = vshll.u32 %v3004_v60, 16 }
0x1555   : > { %v3002_v29 = vpop.xlane.xlu1 %3001 }
0x1556   : > { %v3003_v21 = vcvt.f32.s32 %v3002_v29 }
0x1558   : > { %v3006_v22 = vadd.s32 %v3005_v62, %v3003_v21 }
0x155a   : > { %v3007_v49 = vrot.slane %v3006_v22, 4 }
0x155c   : > { %vm3008_vm3 = vcmp.lt.s32.totalorder %v3006_v22, %v3007_v49 }
0x155d   : > { %v3009_v51 = vsel %vm3008_vm3, %v3006_v22, %v3007_v49 }
0x155e   : > { %v3010_v33 = vrot.slane %v3009_v51, 2 }
0x1560   : > { %vm3011_vm4 = vcmp.lt.s32.totalorder %v3009_v51, %v3010_v33 }
0x1561   : > { %v3012_v16 = vsel %vm3011_vm4, %v3009_v51, %v3010_v33 }
0x1562   : > { %v3013_v40 = vrot.slane %v3012_v16, 1 }
0x1564   : > { %vm3014_vm7 = vcmp.lt.s32.totalorder %v3012_v16, %v3013_v40 }
0x1565   : > { %v3015_v58 = vsel %vm3014_vm7, %v3012_v16, %v3013_v40 }
0x1566   : > { %v3017_v28 = vsel %vm3016_vm5, %v3015_v58, %v5153_v8 }
0x1567   : > { %3019 = vst.msk [vmem:[#allocation9] sm:$0x1] %vm3018_vm6, %v3017_v28 }
0x1568 PF: > { %p3300_p1 = scmp.eq.s32.totalorder %s3460_s0, 1  ;;  %s3420_s12 = smov [#allocation9]  }
0x1569   : > { %s3027_s13 = sshll.u32 %s3420_s12, 4  ;;  %s3028_s13 = int_to_ptr.vmem [resolvable:$true] %s3027_s13 }
0x156a   : > { %s3345_s14 = scalar_lea.vmem %s3028_s13, 16  ;;  %s3351_s21 = scalar_lea.vmem %s3028_s13, 32 }
0x156b   : > { %p3346_p2 = scmp.ne.s32.totalorder %s3028_s13, %s3345_s14  ;;  %p3352_p5 = scmp.lt.s32.totalorder %s3028_s13, %s3028_s13 }
0x156c   : > { %p3353_p6 = scmp.lt.s32.totalorder %s3351_s21, %s3345_s14 }
0x156d   : > { %p3347_p3 = pnand %p3346_p2, %p3300_p1 }
0x156e   : > { %p3354_p7 = por %p3353_p6, %p3352_p5 }
0x156f   : > { %p3348_p4 = pneg %p3347_p3 }
0x1571   : > { %p3355_p8 = pnand %p3354_p7, %p3348_p4 }
0x1573   : > { %3358 = shalt.err (!%p3355_p8)
}
0x1574   : > { %s3359_s25 = scalar_lea.hbm %s5203_s3, 16 }
0x1575   : > { %p3360_p9 = scmp.ne.s32.totalorder %s5203_s3, %s3359_s25  ;;  %p3365_p12 = scmp.lt.u32.totalorder %s3359_s25, %s5203_s3 }
0x1577   : > { %p3361_p10 = pnand %p3360_p9, %p3300_p1 }
0x1579   : > { %p3362_p11 = pneg %p3361_p10 }
0x157b   : > { %p3367_p13 = pnand %p3365_p12, %p3362_p11 }
0x157d   : > { %3370 = shalt.err (!%p3367_p13)
}
0x157e   : > { %3297 = dma.vmem_to_hbm [thread:$0]  (%p3300_p1), %s3028_s13, 16, %s5203_s3, [#allocation10]  }
0x157f   : > { %3402 = dma.done.wait (%p3300_p1), [#allocation10], 16  }
0x1580   : > { %3404 = vsyncadd (%p3300_p1), [#allocation10], 4294967280 }
0x1581 PF: > { %p17_p0 = scmp.ge.s32.totalorder %s3463_s20, 4   ;;  %s5209_s17 = smov %s3411_s18 }
0x1582   : > { %s5210_s18 = smov %s3472_s23  ;;  %s5211_s19 = smov %s3463_s20 }
0x1583   :  { %19 = sbr.rel (!%p17_p0) target bundleno = 17 (0x11), region = 444 }
0x158a   :  { %3040 = vsyncpa [#allocation10], 1 }
0x158b   :  { %3042 = vsyncpa [#allocation10 + $0x1], 1 }
0x158c   :  { %3043 = vsyncmov [#allocation3] }
0x158f   :  { %s3044_s5 = vpop.sfrf %3043 }
0x1590   :  { %p3285_p2 = scmp.ne.s32.totalorder %s3044_s5, 0 }
0x1592   :  { %3048 = shalt.err (%p3285_p2)  }
0x1593   :  { %3050 = vsyncmov [#allocation3 + $0x1] }
0x1596   :  { %s3051_s0 = vpop.sfrf %3050 }
0x1597   :  { %p3286_p1 = scmp.ne.s32.totalorder %s3051_s0, 0 }
0x1599   :  { %3055 = shalt.err (%p3286_p1)  }
0x159a   :  { %3057 = vsyncmov [#allocation3 + $0x2] }
0x159d   :  { %s3058_s7 = vpop.sfrf %3057 }
0x159e   :  { %p3287_p3 = scmp.ne.s32.totalorder %s3058_s7, 0 }
0x15a0   :  { %3062 = shalt.err (%p3287_p3)  }
0x15a1   :  { %3064 = vsyncmov [#allocation3 + $0x3] }
0x15a4   :  { %s3065_s8 = vpop.sfrf %3064 }
0x15a5   :  { %p3288_p4 = scmp.ne.s32.totalorder %s3065_s8, 0 }
0x15a7   :  { %3069 = shalt.err (%p3288_p4)  }
0x15a8   :  { %3071 = vsyncmov [#allocation3 + $0x4] }
0x15ab   :  { %s3072_s20 = vpop.sfrf %3071 }
0x15ac   :  { %p3289_p5 = scmp.ne.s32.totalorder %s3072_s20, 0 }
0x15ae   :  { %3076 = shalt.err (%p3289_p5)  }
0x15af   :  { %3078 = vsyncmov [#allocation3 + $0x5] }
0x15b2   :  { %s3079_s1 = vpop.sfrf %3078 }
0x15b3   :  { %p3290_p6 = scmp.ne.s32.totalorder %s3079_s1, 0 }
0x15b5   :  { %3083 = shalt.err (%p3290_p6)  }
0x15b6   :  { %3085 = vsyncmov [#allocation3 + $0x6] }
0x15b9   :  { %s3086_s2 = vpop.sfrf %3085 }
0x15ba   :  { %p3291_p7 = scmp.ne.s32.totalorder %s3086_s2, 0 }
0x15bc   :  { %3090 = shalt.err (%p3291_p7)  }
0x15bd   :  { %3092 = vsyncmov [#allocation3 + $0x7] }
0x15c0   :  { %s3093_s3 = vpop.sfrf %3092 }
0x15c1   :  { %p3292_p8 = scmp.ne.s32.totalorder %s3093_s3, 0 }
0x15c3   :  { %3097 = shalt.err (%p3292_p8)  }

</bundles_post_ra>
